<compile_context>
chip_gen: v5e
topology: v5e:2x2
jax: 0.10.0
libtpu: 0.0.40
codegen_flags: <defaults>
</compile_context>

<pallas_src>
import functools

import jax
import jax.numpy as jnp
from jax import lax
from jax.experimental import pallas as pl
from jax.experimental.pallas import tpu as pltpu


def _pick_chunk(n, max_c, even=False):
    """Largest divisor of n that is <= max_c (optionally even)."""
    for c in range(min(max_c, n), 0, -1):
        if n % c == 0 and (not even or c % 2 == 0):
            return c
    return n


def _vmem_limit_bytes(default=64 * 1024 * 1024):
    """3/4 of the physical per-core VMEM (leaves headroom for double buffers)."""
    try:
        cap = getattr(pltpu.get_tpu_info(), "vmem_capacity_bytes", None)
        if cap:
            return int(cap) * 3 // 4
    except Exception:
        pass
    return default


# ------------------------------ fused Pallas kernel ------------------------------ #

def _vgg_block_kernel(p_ref, w1_ref, b1_ref, w2_ref, b2_ref, w3_ref, b3_ref,
                      w4_ref, b4_ref, o_ref, a1_ref, a2_ref, a3_ref, yh_ref,
                      *, hc1, hc2):
    # p_ref : (1, H, W, 32)          bf16  conv1 im2col patches (K=27 zero-padded to 32)
    # w1_ref: (32, C1) bf16 ; b1_ref: (1, C1) f32
    # w2_ref: (3, 3*C1, C1) bf16 ; b2_ref: (1, C1) f32    (ky, kx*Cin, Cout)
    # w3_ref: (3, 3*C1, C2) bf16 ; b3_ref: (1, C2) f32
    # w4_ref: (3, 3*C2, C2) bf16 ; b4_ref: (1, C2) f32
    # o_ref : (1, Hp, Wp, C2)        f32   final activation (NHWC, lane-dense C2=128)
    # a1_ref: (H+2,  W+16,  C1) bf16 scratch: conv1 out, interior at cols [8, 8+W)
    # a2_ref: (Hp+2, Wp+16, C1) bf16 scratch: pooled conv2 out (conv3 input)
    # a3_ref: (Hp+2, Wp+16, C2) bf16 scratch: conv3 out (conv4 input)
    # yh_ref: (hc1//2, W, C1)   f32  scratch: row-pooled conv2 chunk (col pool via strided ds)
    _, H, W, K1p = p_ref.shape
    C1 = w1_ref.shape[1]
    C2 = w4_ref.shape[2]
    Hp, Wp = H // 2, W // 2
    W1A = a1_ref.shape[1]          # == W + 16
    W2A = a2_ref.shape[1]          # == Wp + 16
    bdt = a1_ref.dtype

    # Biases read once (loop-invariant).
    b1 = b1_ref[...]
    b2 = b2_ref[...]
    b3 = b3_ref[...]
    b4 = b4_ref[...]

    # ---- zero the SAME-padding halo strips of the VMEM scratch activations ----
    # (aligned 8-wide column strips + 1-row slabs; done every grid step for
    #  megacore safety - see header comment)
    a1_ref[0:1, :, :] = jnp.zeros((1, W1A, C1), bdt)
    a1_ref[H + 1:H + 2, :, :] = jnp.zeros((1, W1A, C1), bdt)
    a1_ref[:, 0:8, :] = jnp.zeros((H + 2, 8, C1), bdt)
    a1_ref[:, W + 8:W + 16, :] = jnp.zeros((H + 2, 8, C1), bdt)

    a2_ref[0:1, :, :] = jnp.zeros((1, W2A, C1), bdt)
    a2_ref[Hp + 1:Hp + 2, :, :] = jnp.zeros((1, W2A, C1), bdt)
    a2_ref[:, 0:8, :] = jnp.zeros((Hp + 2, 8, C1), bdt)
    a2_ref[:, Wp + 8:Wp + 16, :] = jnp.zeros((Hp + 2, 8, C1), bdt)

    a3_ref[0:1, :, :] = jnp.zeros((1, W2A, C2), bdt)
    a3_ref[Hp + 1:Hp + 2, :, :] = jnp.zeros((1, W2A, C2), bdt)
    a3_ref[:, 0:8, :] = jnp.zeros((Hp + 2, 8, C2), bdt)
    a3_ref[:, Wp + 8:Wp + 16, :] = jnp.zeros((Hp + 2, 8, C2), bdt)

    n1 = H // hc1
    n2 = Hp // hc2

    # ---- conv1 (3 -> C1) + ReLU: one K=32 matmul per row chunk ----
    def conv1_body(i, carry):
        r0 = pl.multiple_of(i * hc1, hc1)
        lhs = p_ref[0, pl.ds(r0, hc1), :, :].reshape(hc1 * W, K1p)
        acc = jnp.dot(lhs, w1_ref[...], preferred_element_type=jnp.float32)
        y = jnp.maximum(acc + b1, 0.0)
        a1_ref[pl.ds(1 + r0, hc1), pl.ds(8, W), :] = (
            y.reshape(hc1, W, C1).astype(bdt))
        return carry

    lax.fori_loop(0, n1, conv1_body, 0)

    # ---- conv2 (C1 -> C1) + ReLU + 2x2 maxpool, per row chunk ----
    def conv2_body(i, carry):
        r0 = pl.multiple_of(i * hc1, hc1)
        rp0 = pl.multiple_of(i * (hc1 // 2), hc1 // 2)
        rows = pl.ds(r0, hc1 + 2)
        # fold the 3 dx taps into lanes -> 3 matmuls with K = 3*C1
        xcat = jnp.concatenate(
            [a1_ref[rows, pl.ds(7, W), :],
             a1_ref[rows, pl.ds(8, W), :],
             a1_ref[rows, pl.ds(9, W), :]], axis=-1)             # (hc1+2, W, 3*C1)
        acc = jnp.dot(xcat[0:hc1].reshape(hc1 * W, 3 * C1), w2_ref[0],
                      preferred_element_type=jnp.float32)
        acc = acc + jnp.dot(xcat[1:1 + hc1].reshape(hc1 * W, 3 * C1), w2_ref[1],
                            preferred_element_type=jnp.float32)
        acc = acc + jnp.dot(xcat[2:2 + hc1].reshape(hc1 * W, 3 * C1), w2_ref[2],
                            preferred_element_type=jnp.float32)
        y = jnp.maximum(acc + b2, 0.0)                            # (hc1*W, C1) f32
        # pool rows: adjacent output rows are W apart in the flattened layout
        y2 = y.reshape(hc1 // 2, 2 * W, C1)
        yh_ref[...] = jnp.maximum(y2[:, :W, :], y2[:, W:, :])     # (hc1//2, W, C1)
        # pool cols: strided sublane selection (even vs odd columns)
        pooled = jnp.maximum(yh_ref[:, pl.ds(0, Wp, 2), :],
                             yh_ref[:, pl.ds(1, Wp, 2), :])       # (hc1//2, Wp, C1)
        a2_ref[pl.ds(1 + rp0, hc1 // 2), pl.ds(8, Wp), :] = pooled.astype(bdt)
        return carry

    lax.fori_loop(0, n1, conv2_body, 0)

    # ---- conv3 (C1 -> C2) + ReLU ----
    def conv3_body(i, carry):
        r0 = pl.multiple_of(i * hc2, hc2)
        rows = pl.ds(r0, hc2 + 2)
        xcat = jnp.concatenate(
            [a2_ref[rows, pl.ds(7, Wp), :],
             a2_ref[rows, pl.ds(8, Wp), :],
             a2_ref[rows, pl.ds(9, Wp), :]], axis=-1)             # (hc2+2, Wp, 3*C1)
        acc = jnp.dot(xcat[0:hc2].reshape(hc2 * Wp, 3 * C1), w3_ref[0],
                      preferred_element_type=jnp.float32)
        acc = acc + jnp.dot(xcat[1:1 + hc2].reshape(hc2 * Wp, 3 * C1), w3_ref[1],
                            preferred_element_type=jnp.float32)
        acc = acc + jnp.dot(xcat[2:2 + hc2].reshape(hc2 * Wp, 3 * C1), w3_ref[2],
                            preferred_element_type=jnp.float32)
        y = jnp.maximum(acc + b3, 0.0)
        a3_ref[pl.ds(1 + r0, hc2), pl.ds(8, Wp), :] = (
            y.reshape(hc2, Wp, C2).astype(bdt))
        return carry

    lax.fori_loop(0, n2, conv3_body, 0)

    # ---- conv4 (C2 -> C2) + ReLU -> final output (f32, lane-dense 128 channels) ----
    def conv4_body(i, carry):
        r0 = pl.multiple_of(i * hc2, hc2)
        rows = pl.ds(r0, hc2 + 2)
        xcat = jnp.concatenate(
            [a3_ref[rows, pl.ds(7, Wp), :],
             a3_ref[rows, pl.ds(8, Wp), :],
             a3_ref[rows, pl.ds(9, Wp), :]], axis=-1)             # (hc2+2, Wp, 3*C2)
        acc = jnp.dot(xcat[0:hc2].reshape(hc2 * Wp, 3 * C2), w4_ref[0],
                      preferred_element_type=jnp.float32)
        acc = acc + jnp.dot(xcat[1:1 + hc2].reshape(hc2 * Wp, 3 * C2), w4_ref[1],
                            preferred_element_type=jnp.float32)
        acc = acc + jnp.dot(xcat[2:2 + hc2].reshape(hc2 * Wp, 3 * C2), w4_ref[2],
                            preferred_element_type=jnp.float32)
        y = jnp.maximum(acc + b4, 0.0)
        o_ref[0, pl.ds(r0, hc2), :, :] = y.reshape(hc2, Wp, C2).astype(o_ref.dtype)
        return carry

    lax.fori_loop(0, n2, conv4_body, 0)


# ------------------------------- wrapper (NCHW API) ------------------------------- #

def feature_extractor(x_nchw, params):
    """Forward pass of FeatureExtractor (VGG19 features[:9]) with one fused Pallas kernel."""
    x = jnp.transpose(x_nchw, (0, 2, 3, 1)).astype(jnp.bfloat16)   # NCHW -> NHWC, bf16
    N, H, W, Cin = x.shape
    C1 = params["w1"].shape[-1]
    C2 = params["w4"].shape[-1]
    assert Cin == 3 and H % 2 == 0 and W % 16 == 0

    # conv1 im2col in the wrapper (input has only 3 channels); pad K 27 -> 32.
    # TODO(synk): move this gather fully in-kernel (see header) to cut the extra HBM
    # round trip of the patches tensor.
    xp = jnp.pad(x, ((0, 0), (1, 1), (1, 1), (0, 0)))
    patches = jnp.concatenate(
        [xp[:, dy:dy + H, dx:dx + W, :] for dy in range(3) for dx in range(3)],
        axis=-1)                                                   # (N, H, W, 27)
    K1, K1p = patches.shape[-1], 32
    patches = jnp.pad(patches, ((0, 0), (0, 0), (0, 0), (0, K1p - K1)))

    # Weights: bf16; fold the 3 kx taps into the contraction dim (K = 3*Cin per ky row).
    w1r = jnp.pad(params["w1"].reshape(K1, C1).astype(jnp.bfloat16),
                  ((0, K1p - K1), (0, 0)))
    w2c = params["w2"].reshape(3, 3 * C1, C1).astype(jnp.bfloat16)
    w3c = params["w3"].reshape(3, 3 * C1, C2).astype(jnp.bfloat16)
    w4c = params["w4"].reshape(3, 3 * C2, C2).astype(jnp.bfloat16)
    b1 = params["b1"].reshape(1, C1).astype(jnp.float32)
    b2 = params["b2"].reshape(1, C1).astype(jnp.float32)
    b3 = params["b3"].reshape(1, C2).astype(jnp.float32)
    b4 = params["b4"].reshape(1, C2).astype(jnp.float32)

    Hp, Wp = H // 2, W // 2
    hc1 = _pick_chunk(H, 32, even=True)    # conv1/conv2 row-chunk size (even for pooling)
    hc2 = _pick_chunk(Hp, 32)              # conv3/conv4 row-chunk size

    cparams = pltpu.CompilerParams(
        dimension_semantics=("parallel",),
        vmem_limit_bytes=_vmem_limit_bytes())

    out_nhwc = pl.pallas_call(
        functools.partial(_vgg_block_kernel, hc1=hc1, hc2=hc2),
        out_shape=jax.ShapeDtypeStruct((N, Hp, Wp, C2), jnp.float32),
        grid=(N,),
        in_specs=[
            pl.BlockSpec((1, H, W, K1p), lambda n: (n, 0, 0, 0)),
            pl.BlockSpec((K1p, C1), lambda n: (0, 0)),
            pl.BlockSpec((1, C1), lambda n: (0, 0)),
            pl.BlockSpec((3, 3 * C1, C1), lambda n: (0, 0, 0)),
            pl.BlockSpec((1, C1), lambda n: (0, 0)),
            pl.BlockSpec((3, 3 * C1, C2), lambda n: (0, 0, 0)),
            pl.BlockSpec((1, C2), lambda n: (0, 0)),
            pl.BlockSpec((3, 3 * C2, C2), lambda n: (0, 0, 0)),
            pl.BlockSpec((1, C2), lambda n: (0, 0)),
        ],
        out_specs=pl.BlockSpec((1, Hp, Wp, C2), lambda n: (n, 0, 0, 0)),
        scratch_shapes=[
            pltpu.VMEM((H + 2, W + 16, C1), jnp.bfloat16),     # a1 (conv1 out + halo)
            pltpu.VMEM((Hp + 2, Wp + 16, C1), jnp.bfloat16),   # a2 (pooled + halo)
            pltpu.VMEM((Hp + 2, Wp + 16, C2), jnp.bfloat16),   # a3 (conv3 out + halo)
            pltpu.VMEM((hc1 // 2, W, C1), jnp.float32),        # yh (row-pooled chunk)
        ],
        compiler_params=cparams,
    )(patches, w1r, b1, w2c, b2, w3c, b3, w4c, b4)

    return jnp.transpose(out_nhwc, (0, 3, 1, 2))                   # NHWC -> NCHW (f32)


# ------------------------------- pure-JAX reference ------------------------------- #

def _ref_conv(x, w, b):
    y = lax.conv_general_dilated(
        x, w, window_strides=(1, 1), padding="SAME",
        dimension_numbers=("NHWC", "HWIO", "NHWC"),
        precision=lax.Precision.HIGHEST)
    return jnp.maximum(y + b, 0.0)


def _ref_pool(x):
    return lax.reduce_window(
        x, -jnp.inf, lax.max, (1, 2, 2, 1), (1, 2, 2, 1), "VALID")


def reference(x_nchw, params):
    x = jnp.transpose(x_nchw, (0, 2, 3, 1))
    x = _ref_conv(x, params["w1"], params["b1"])
    x = _ref_conv(x, params["w2"], params["b2"])
    x = _ref_pool(x)
    x = _ref_conv(x, params["w3"], params["b3"])
    x = _ref_conv(x, params["w4"], params["b4"])
    return jnp.transpose(x, (0, 3, 1, 2))


# -------------------------------------- main -------------------------------------- #

if __name__ == "__main__":
    key = jax.random.PRNGKey(0)
    N, Cin, H, W = 2, 3, 16, 16
    C1, C2 = 64, 128  # VGG19 features[:9] channel plan: 3->64->64->pool->128->128

    ks = jax.random.split(key, 9)
    x_nchw = jax.random.normal(ks[0], (N, Cin, H, W), jnp.float32)
    params = {
        "w1": jax.random.normal(ks[1], (3, 3, Cin, C1), jnp.float32) * 0.05,
        "b1": jax.random.normal(ks[2], (C1,), jnp.float32) * 0.01,
        "w2": jax.random.normal(ks[3], (3, 3, C1, C1), jnp.float32) * 0.05,
        "b2": jax.random.normal(ks[4], (C1,), jnp.float32) * 0.01,
        "w3": jax.random.normal(ks[5], (3, 3, C1, C2), jnp.float32) * 0.05,
        "b3": jax.random.normal(ks[6], (C2,), jnp.float32) * 0.01,
        "w4": jax.random.normal(ks[7], (3, 3, C2, C2), jnp.float32) * 0.05,
        "b4": jax.random.normal(ks[8], (C2,), jnp.float32) * 0.01,
    }

    out = jax.block_until_ready(feature_extractor(x_nchw, params))
    assert out.shape == (N, C2, H // 2, W // 2), out.shape

    ref = jax.block_until_ready(reference(x_nchw, params))
    max_err = float(jnp.max(jnp.abs(out - ref)))
    # Accepted error budget: bf16 weights/activations through a 4-conv chain vs an
    # f32 HIGHEST reference -> ~5e-2 absolute/relative at unit-scale inputs.
    assert jnp.allclose(out, ref, rtol=5e-2, atol=5e-2), f"max_err={max_err}"

    print("KERNEL_OK")
</pallas_src>

<mosaic_0001>
module attributes {stable_mosaic.version = 11 : i64} {
  func.func @_vgg_block_kernel(%arg0: i32, %arg1: memref<1x16x16x32xbf16, #tpu.memory_space<vmem>>, %arg2: memref<32x64xbf16, #tpu.memory_space<vmem>>, %arg3: memref<1x64xf32, #tpu.memory_space<vmem>>, %arg4: memref<3x192x64xbf16, #tpu.memory_space<vmem>>, %arg5: memref<1x64xf32, #tpu.memory_space<vmem>>, %arg6: memref<3x192x128xbf16, #tpu.memory_space<vmem>>, %arg7: memref<1x128xf32, #tpu.memory_space<vmem>>, %arg8: memref<3x384x128xbf16, #tpu.memory_space<vmem>>, %arg9: memref<1x128xf32, #tpu.memory_space<vmem>>, %arg10: memref<1x8x8x128xf32, #tpu.memory_space<vmem>>, %arg11: memref<18x32x64xbf16, #tpu.memory_space<vmem>>, %arg12: memref<10x24x64xbf16, #tpu.memory_space<vmem>>, %arg13: memref<10x24x128xbf16, #tpu.memory_space<vmem>>, %arg14: memref<8x16x64xf32, #tpu.memory_space<vmem>>) attributes {dimension_semantics = [#tpu.dimension_semantics<parallel>], iteration_bounds = array<i64: 2>, scalar_prefetch = 0 : i64, scratch_operands = 4 : i64, tpu.core_type = #tpu.core_type<tc>, window_params = [{transform_indices = @transform_0, window_bounds = array<i64: 1, 16, 16, 32>}, {pipeline_mode = #tpu.pipeline_mode<synchronous>, transform_indices = @transform_1, window_bounds = array<i64: 32, 64>}, {pipeline_mode = #tpu.pipeline_mode<synchronous>, transform_indices = @transform_2, window_bounds = array<i64: 1, 64>}, {pipeline_mode = #tpu.pipeline_mode<synchronous>, transform_indices = @transform_3, window_bounds = array<i64: 3, 192, 64>}, {pipeline_mode = #tpu.pipeline_mode<synchronous>, transform_indices = @transform_4, window_bounds = array<i64: 1, 64>}, {pipeline_mode = #tpu.pipeline_mode<synchronous>, transform_indices = @transform_5, window_bounds = array<i64: 3, 192, 128>}, {pipeline_mode = #tpu.pipeline_mode<synchronous>, transform_indices = @transform_6, window_bounds = array<i64: 1, 128>}, {pipeline_mode = #tpu.pipeline_mode<synchronous>, transform_indices = @transform_7, window_bounds = array<i64: 3, 384, 128>}, {pipeline_mode = #tpu.pipeline_mode<synchronous>, transform_indices = @transform_8, window_bounds = array<i64: 1, 128>}, {transform_indices = @transform_9, window_bounds = array<i64: 1, 8, 8, 128>}]} {
    %c0 = arith.constant 0 : index
    %c0_0 = arith.constant 0 : index
    %0 = vector.load %arg3[%c0, %c0_0] : memref<1x64xf32, #tpu.memory_space<vmem>>, vector<1x64xf32>
    %c0_1 = arith.constant 0 : index
    %c0_2 = arith.constant 0 : index
    %1 = vector.load %arg5[%c0_1, %c0_2] : memref<1x64xf32, #tpu.memory_space<vmem>>, vector<1x64xf32>
    %c0_3 = arith.constant 0 : index
    %c0_4 = arith.constant 0 : index
    %2 = vector.load %arg7[%c0_3, %c0_4] : memref<1x128xf32, #tpu.memory_space<vmem>>, vector<1x128xf32>
    %c0_5 = arith.constant 0 : index
    %c0_6 = arith.constant 0 : index
    %3 = vector.load %arg9[%c0_5, %c0_6] : memref<1x128xf32, #tpu.memory_space<vmem>>, vector<1x128xf32>
    %cst = arith.constant 0.000000e+00 : bf16
    %4 = vector.broadcast %cst : bf16 to vector<1x32x64xbf16>
    %c0_7 = arith.constant 0 : index
    %c0_8 = arith.constant 0 : index
    %c0_9 = arith.constant 0 : index
    %5 = vector.load %arg11[%c0_7, %c0_8, %c0_9] : memref<18x32x64xbf16, #tpu.memory_space<vmem>>, vector<1x32x64xbf16>
    tpu.vector_store %arg11[%c0_7, %c0_8, %c0_9], %4 {strides = array<i32>} : memref<18x32x64xbf16, #tpu.memory_space<vmem>>, vector<1x32x64xbf16>,
    %cst_10 = arith.constant 0.000000e+00 : bf16
    %6 = vector.broadcast %cst_10 : bf16 to vector<1x32x64xbf16>
    %c17 = arith.constant 17 : index
    %c0_11 = arith.constant 0 : index
    %c0_12 = arith.constant 0 : index
    %7 = vector.load %arg11[%c17, %c0_11, %c0_12] : memref<18x32x64xbf16, #tpu.memory_space<vmem>>, vector<1x32x64xbf16>
    tpu.vector_store %arg11[%c17, %c0_11, %c0_12], %6 {strides = array<i32>} : memref<18x32x64xbf16, #tpu.memory_space<vmem>>, vector<1x32x64xbf16>,
    %cst_13 = arith.constant 0.000000e+00 : bf16
    %8 = vector.broadcast %cst_13 : bf16 to vector<18x8x64xbf16>
    %c0_14 = arith.constant 0 : index
    %c0_15 = arith.constant 0 : index
    %c0_16 = arith.constant 0 : index
    %9 = vector.load %arg11[%c0_14, %c0_15, %c0_16] : memref<18x32x64xbf16, #tpu.memory_space<vmem>>, vector<18x8x64xbf16>
    tpu.vector_store %arg11[%c0_14, %c0_15, %c0_16], %8 {strides = array<i32>} : memref<18x32x64xbf16, #tpu.memory_space<vmem>>, vector<18x8x64xbf16>,
    %cst_17 = arith.constant 0.000000e+00 : bf16
    %10 = vector.broadcast %cst_17 : bf16 to vector<18x8x64xbf16>
    %c0_18 = arith.constant 0 : index
    %c24 = arith.constant 24 : index
    %c0_19 = arith.constant 0 : index
    %11 = vector.load %arg11[%c0_18, %c24, %c0_19] : memref<18x32x64xbf16, #tpu.memory_space<vmem>>, vector<18x8x64xbf16>
    tpu.vector_store %arg11[%c0_18, %c24, %c0_19], %10 {strides = array<i32>} : memref<18x32x64xbf16, #tpu.memory_space<vmem>>, vector<18x8x64xbf16>,
    %cst_20 = arith.constant 0.000000e+00 : bf16
    %12 = vector.broadcast %cst_20 : bf16 to vector<1x24x64xbf16>
    %c0_21 = arith.constant 0 : index
    %c0_22 = arith.constant 0 : index
    %c0_23 = arith.constant 0 : index
    %13 = vector.load %arg12[%c0_21, %c0_22, %c0_23] : memref<10x24x64xbf16, #tpu.memory_space<vmem>>, vector<1x24x64xbf16>
    tpu.vector_store %arg12[%c0_21, %c0_22, %c0_23], %12 {strides = array<i32>} : memref<10x24x64xbf16, #tpu.memory_space<vmem>>, vector<1x24x64xbf16>,
    %cst_24 = arith.constant 0.000000e+00 : bf16
    %14 = vector.broadcast %cst_24 : bf16 to vector<1x24x64xbf16>
    %c9 = arith.constant 9 : index
    %c0_25 = arith.constant 0 : index
    %c0_26 = arith.constant 0 : index
    %15 = vector.load %arg12[%c9, %c0_25, %c0_26] : memref<10x24x64xbf16, #tpu.memory_space<vmem>>, vector<1x24x64xbf16>
    tpu.vector_store %arg12[%c9, %c0_25, %c0_26], %14 {strides = array<i32>} : memref<10x24x64xbf16, #tpu.memory_space<vmem>>, vector<1x24x64xbf16>,
    %cst_27 = arith.constant 0.000000e+00 : bf16
    %16 = vector.broadcast %cst_27 : bf16 to vector<10x8x64xbf16>
    %c0_28 = arith.constant 0 : index
    %c0_29 = arith.constant 0 : index
    %c0_30 = arith.constant 0 : index
    %17 = vector.load %arg12[%c0_28, %c0_29, %c0_30] : memref<10x24x64xbf16, #tpu.memory_space<vmem>>, vector<10x8x64xbf16>
    tpu.vector_store %arg12[%c0_28, %c0_29, %c0_30], %16 {strides = array<i32>} : memref<10x24x64xbf16, #tpu.memory_space<vmem>>, vector<10x8x64xbf16>,
    %cst_31 = arith.constant 0.000000e+00 : bf16
    %18 = vector.broadcast %cst_31 : bf16 to vector<10x8x64xbf16>
    %c0_32 = arith.constant 0 : index
    %c16 = arith.constant 16 : index
    %c0_33 = arith.constant 0 : index
    %19 = vector.load %arg12[%c0_32, %c16, %c0_33] : memref<10x24x64xbf16, #tpu.memory_space<vmem>>, vector<10x8x64xbf16>
    tpu.vector_store %arg12[%c0_32, %c16, %c0_33], %18 {strides = array<i32>} : memref<10x24x64xbf16, #tpu.memory_space<vmem>>, vector<10x8x64xbf16>,
    %cst_34 = arith.constant 0.000000e+00 : bf16
    %20 = vector.broadcast %cst_34 : bf16 to vector<1x24x128xbf16>
    %c0_35 = arith.constant 0 : index
    %c0_36 = arith.constant 0 : index
    %c0_37 = arith.constant 0 : index
    %21 = vector.load %arg13[%c0_35, %c0_36, %c0_37] : memref<10x24x128xbf16, #tpu.memory_space<vmem>>, vector<1x24x128xbf16>
    tpu.vector_store %arg13[%c0_35, %c0_36, %c0_37], %20 {strides = array<i32>} : memref<10x24x128xbf16, #tpu.memory_space<vmem>>, vector<1x24x128xbf16>,
    %cst_38 = arith.constant 0.000000e+00 : bf16
    %22 = vector.broadcast %cst_38 : bf16 to vector<1x24x128xbf16>
    %c9_39 = arith.constant 9 : index
    %c0_40 = arith.constant 0 : index
    %c0_41 = arith.constant 0 : index
    %23 = vector.load %arg13[%c9_39, %c0_40, %c0_41] : memref<10x24x128xbf16, #tpu.memory_space<vmem>>, vector<1x24x128xbf16>
    tpu.vector_store %arg13[%c9_39, %c0_40, %c0_41], %22 {strides = array<i32>} : memref<10x24x128xbf16, #tpu.memory_space<vmem>>, vector<1x24x128xbf16>,
    %cst_42 = arith.constant 0.000000e+00 : bf16
    %24 = vector.broadcast %cst_42 : bf16 to vector<10x8x128xbf16>
    %c0_43 = arith.constant 0 : index
    %c0_44 = arith.constant 0 : index
    %c0_45 = arith.constant 0 : index
    %25 = vector.load %arg13[%c0_43, %c0_44, %c0_45] : memref<10x24x128xbf16, #tpu.memory_space<vmem>>, vector<10x8x128xbf16>
    tpu.vector_store %arg13[%c0_43, %c0_44, %c0_45], %24 {strides = array<i32>} : memref<10x24x128xbf16, #tpu.memory_space<vmem>>, vector<10x8x128xbf16>,
    %cst_46 = arith.constant 0.000000e+00 : bf16
    %26 = vector.broadcast %cst_46 : bf16 to vector<10x8x128xbf16>
    %c0_47 = arith.constant 0 : index
    %c16_48 = arith.constant 16 : index
    %c0_49 = arith.constant 0 : index
    %27 = vector.load %arg13[%c0_47, %c16_48, %c0_49] : memref<10x24x128xbf16, #tpu.memory_space<vmem>>, vector<10x8x128xbf16>
    tpu.vector_store %arg13[%c0_47, %c16_48, %c0_49], %26 {strides = array<i32>} : memref<10x24x128xbf16, #tpu.memory_space<vmem>>, vector<10x8x128xbf16>,
    %c0_i32 = arith.constant 0 : i32
    %c16_i32 = arith.constant 16 : i32
    %28 = arith.muli %c0_i32, %c16_i32 : i32
    %29 = tpu.assume_multiple %28, 16 : i32
    %c0_50 = arith.constant 0 : index
    %30 = arith.index_cast %29 : i32 to index
    %c0_51 = arith.constant 0 : index
    %c0_52 = arith.constant 0 : index
    %31 = vector.load %arg1[%c0_50, %30, %c0_51, %c0_52] : memref<1x16x16x32xbf16, #tpu.memory_space<vmem>>, vector<1x16x16x32xbf16>
    %32 = vector.shape_cast %31 : vector<1x16x16x32xbf16> to vector<16x16x32xbf16>
    %33 = vector.shape_cast %32 : vector<16x16x32xbf16> to vector<256x32xbf16>
    %c0_53 = arith.constant 0 : index
    %c0_54 = arith.constant 0 : index
    %34 = vector.load %arg2[%c0_53, %c0_54] : memref<32x64xbf16, #tpu.memory_space<vmem>>, vector<32x64xbf16>
    %cst_55 = arith.constant dense<0.000000e+00> : vector<256x64xf32>
    %35 = tpu.matmul %33, %34, %cst_55 {dimension_numbers = #tpu.dot_dimension_numbers<[1], [0], [0], [1], [0, 0, 1, 1], [], []>} : vector<256x32xbf16>, vector<32x64xbf16>, vector<256x64xf32> -> vector<256x64xf32>
    %36 = vector.broadcast %0 : vector<1x64xf32> to vector<256x64xf32>
    %37 = arith.addf %35, %36 : vector<256x64xf32>
    %cst_56 = arith.constant 0.000000e+00 : f32
    %38 = vector.broadcast %cst_56 : f32 to vector<256x64xf32>
    %39 = arith.maximumf %37, %38 : vector<256x64xf32>
    %40 = vector.shape_cast %39 : vector<256x64xf32> to vector<16x16x64xf32>
    %41 = arith.truncf %40 : vector<16x16x64xf32> to vector<16x16x64xbf16>
    %c1_i32 = arith.constant 1 : i32
    %42 = arith.addi %c1_i32, %29 : i32
    %43 = arith.index_cast %42 : i32 to index
    %c8 = arith.constant 8 : index
    %c0_57 = arith.constant 0 : index
    %44 = vector.load %arg11[%43, %c8, %c0_57] : memref<18x32x64xbf16, #tpu.memory_space<vmem>>, vector<16x16x64xbf16>
    tpu.vector_store %arg11[%43, %c8, %c0_57], %41 {strides = array<i32>} : memref<18x32x64xbf16, #tpu.memory_space<vmem>>, vector<16x16x64xbf16>,
    %c1_i32_58 = arith.constant 1 : i32
    %c0_i32_59 = arith.constant 0 : i32
    %c16_i32_60 = arith.constant 16 : i32
    %45 = arith.muli %c0_i32_59, %c16_i32_60 : i32
    %46 = tpu.assume_multiple %45, 16 : i32
    %c8_i32 = arith.constant 8 : i32
    %47 = arith.muli %c0_i32_59, %c8_i32 : i32
    %48 = tpu.assume_multiple %47, 8 : i32
    %49 = arith.index_cast %46 : i32 to index
    %c7 = arith.constant 7 : index
    %c0_61 = arith.constant 0 : index
    %50 = vector.load %arg11[%49, %c7, %c0_61] : memref<18x32x64xbf16, #tpu.memory_space<vmem>>, vector<18x16x64xbf16>
    %51 = arith.index_cast %46 : i32 to index
    %c8_62 = arith.constant 8 : index
    %c0_63 = arith.constant 0 : index
    %52 = vector.load %arg11[%51, %c8_62, %c0_63] : memref<18x32x64xbf16, #tpu.memory_space<vmem>>, vector<18x16x64xbf16>
    %53 = arith.index_cast %46 : i32 to index
    %c9_64 = arith.constant 9 : index
    %c0_65 = arith.constant 0 : index
    %54 = vector.load %arg11[%53, %c9_64, %c0_65] : memref<18x32x64xbf16, #tpu.memory_space<vmem>>, vector<18x16x64xbf16>
    %55 = tpu.concatenate %50, %52, %54 in 2 : vector<18x16x64xbf16>, vector<18x16x64xbf16>, vector<18x16x64xbf16> -> vector<18x16x192xbf16>
    %56 = vector.extract_strided_slice %55 {offsets = [0, 0, 0], sizes = [16, 16, 192], strides = [1, 1, 1]} : vector<18x16x192xbf16> to vector<16x16x192xbf16>
    %57 = vector.shape_cast %56 : vector<16x16x192xbf16> to vector<256x192xbf16>
    %c0_66 = arith.constant 0 : index
    %c0_67 = arith.constant 0 : index
    %c0_68 = arith.constant 0 : index
    %58 = vector.load %arg4[%c0_66, %c0_67, %c0_68] : memref<3x192x64xbf16, #tpu.memory_space<vmem>>, vector<1x192x64xbf16>
    %59 = vector.shape_cast %58 : vector<1x192x64xbf16> to vector<192x64xbf16>
    %cst_69 = arith.constant dense<0.000000e+00> : vector<256x64xf32>
    %60 = tpu.matmul %57, %59, %cst_69 {dimension_numbers = #tpu.dot_dimension_numbers<[1], [0], [0], [1], [0, 0, 1, 1], [], []>} : vector<256x192xbf16>, vector<192x64xbf16>, vector<256x64xf32> -> vector<256x64xf32>
    %61 = vector.extract_strided_slice %55 {offsets = [1, 0, 0], sizes = [16, 16, 192], strides = [1, 1, 1]} : vector<18x16x192xbf16> to vector<16x16x192xbf16>
    %62 = vector.shape_cast %61 : vector<16x16x192xbf16> to vector<256x192xbf16>
    %c1 = arith.constant 1 : index
    %c0_70 = arith.constant 0 : index
    %c0_71 = arith.constant 0 : index
    %63 = vector.load %arg4[%c1, %c0_70, %c0_71] : memref<3x192x64xbf16, #tpu.memory_space<vmem>>, vector<1x192x64xbf16>
    %64 = vector.shape_cast %63 : vector<1x192x64xbf16> to vector<192x64xbf16>
    %cst_72 = arith.constant dense<0.000000e+00> : vector<256x64xf32>
    %65 = tpu.matmul %62, %64, %cst_72 {dimension_numbers = #tpu.dot_dimension_numbers<[1], [0], [0], [1], [0, 0, 1, 1], [], []>} : vector<256x192xbf16>, vector<192x64xbf16>, vector<256x64xf32> -> vector<256x64xf32>
    %66 = arith.addf %60, %65 : vector<256x64xf32>
    %67 = vector.extract_strided_slice %55 {offsets = [2, 0, 0], sizes = [16, 16, 192], strides = [1, 1, 1]} : vector<18x16x192xbf16> to vector<16x16x192xbf16>
    %68 = vector.shape_cast %67 : vector<16x16x192xbf16> to vector<256x192xbf16>
    %c2 = arith.constant 2 : index
    %c0_73 = arith.constant 0 : index
    %c0_74 = arith.constant 0 : index
    %69 = vector.load %arg4[%c2, %c0_73, %c0_74] : memref<3x192x64xbf16, #tpu.memory_space<vmem>>, vector<1x192x64xbf16>
    %70 = vector.shape_cast %69 : vector<1x192x64xbf16> to vector<192x64xbf16>
    %cst_75 = arith.constant dense<0.000000e+00> : vector<256x64xf32>
    %71 = tpu.matmul %68, %70, %cst_75 {dimension_numbers = #tpu.dot_dimension_numbers<[1], [0], [0], [1], [0, 0, 1, 1], [], []>} : vector<256x192xbf16>, vector<192x64xbf16>, vector<256x64xf32> -> vector<256x64xf32>
    %72 = arith.addf %66, %71 : vector<256x64xf32>
    %73 = vector.broadcast %1 : vector<1x64xf32> to vector<256x64xf32>
    %74 = arith.addf %72, %73 : vector<256x64xf32>
    %cst_76 = arith.constant 0.000000e+00 : f32
    %75 = vector.broadcast %cst_76 : f32 to vector<256x64xf32>
    %76 = arith.maximumf %74, %75 : vector<256x64xf32>
    %77 = vector.shape_cast %76 : vector<256x64xf32> to vector<8x32x64xf32>
    %78 = vector.extract_strided_slice %77 {offsets = [0, 0, 0], sizes = [8, 16, 64], strides = [1, 1, 1]} : vector<8x32x64xf32> to vector<8x16x64xf32>
    %79 = vector.extract_strided_slice %77 {offsets = [0, 16, 0], sizes = [8, 16, 64], strides = [1, 1, 1]} : vector<8x32x64xf32> to vector<8x16x64xf32>
    %80 = arith.maximumf %78, %79 : vector<8x16x64xf32>
    %c0_77 = arith.constant 0 : index
    %c0_78 = arith.constant 0 : index
    %c0_79 = arith.constant 0 : index
    %81 = vector.load %arg14[%c0_77, %c0_78, %c0_79] : memref<8x16x64xf32, #tpu.memory_space<vmem>>, vector<8x16x64xf32>
    tpu.vector_store %arg14[%c0_77, %c0_78, %c0_79], %80 {strides = array<i32>} : memref<8x16x64xf32, #tpu.memory_space<vmem>>, vector<8x16x64xf32>,
    %c0_80 = arith.constant 0 : index
    %c0_81 = arith.constant 0 : index
    %c0_82 = arith.constant 0 : index
    %82 = tpu.strided_load %arg14[%c0_80, %c0_81, %c0_82] {strides = array<i32: 1, 2, 1>} : memref<8x16x64xf32, #tpu.memory_space<vmem>>, vector<8x8x64xf32>
    %c0_83 = arith.constant 0 : index
    %c1_84 = arith.constant 1 : index
    %c0_85 = arith.constant 0 : index
    %83 = tpu.strided_load %arg14[%c0_83, %c1_84, %c0_85] {strides = array<i32: 1, 2, 1>} : memref<8x16x64xf32, #tpu.memory_space<vmem>>, vector<8x8x64xf32>
    %84 = arith.maximumf %82, %83 : vector<8x8x64xf32>
    %85 = arith.truncf %84 : vector<8x8x64xf32> to vector<8x8x64xbf16>
    %c1_i32_86 = arith.constant 1 : i32
    %86 = arith.addi %c1_i32_86, %48 : i32
    %87 = arith.index_cast %86 : i32 to index
    %c8_87 = arith.constant 8 : index
    %c0_88 = arith.constant 0 : index
    %88 = vector.load %arg12[%87, %c8_87, %c0_88] : memref<10x24x64xbf16, #tpu.memory_space<vmem>>, vector<8x8x64xbf16>
    tpu.vector_store %arg12[%87, %c8_87, %c0_88], %85 {strides = array<i32>} : memref<10x24x64xbf16, #tpu.memory_space<vmem>>, vector<8x8x64xbf16>,
    %c1_i32_89 = arith.constant 1 : i32
    %c0_i32_90 = arith.constant 0 : i32
    %c8_i32_91 = arith.constant 8 : i32
    %89 = arith.muli %c0_i32_90, %c8_i32_91 : i32
    %90 = tpu.assume_multiple %89, 8 : i32
    %91 = arith.index_cast %90 : i32 to index
    %c7_92 = arith.constant 7 : index
    %c0_93 = arith.constant 0 : index
    %92 = vector.load %arg12[%91, %c7_92, %c0_93] : memref<10x24x64xbf16, #tpu.memory_space<vmem>>, vector<10x8x64xbf16>
    %93 = arith.index_cast %90 : i32 to index
    %c8_94 = arith.constant 8 : index
    %c0_95 = arith.constant 0 : index
    %94 = vector.load %arg12[%93, %c8_94, %c0_95] : memref<10x24x64xbf16, #tpu.memory_space<vmem>>, vector<10x8x64xbf16>
    %95 = arith.index_cast %90 : i32 to index
    %c9_96 = arith.constant 9 : index
    %c0_97 = arith.constant 0 : index
    %96 = vector.load %arg12[%95, %c9_96, %c0_97] : memref<10x24x64xbf16, #tpu.memory_space<vmem>>, vector<10x8x64xbf16>
    %97 = tpu.concatenate %92, %94, %96 in 2 : vector<10x8x64xbf16>, vector<10x8x64xbf16>, vector<10x8x64xbf16> -> vector<10x8x192xbf16>
    %98 = vector.extract_strided_slice %97 {offsets = [0, 0, 0], sizes = [8, 8, 192], strides = [1, 1, 1]} : vector<10x8x192xbf16> to vector<8x8x192xbf16>
    %99 = vector.shape_cast %98 : vector<8x8x192xbf16> to vector<64x192xbf16>
    %c0_98 = arith.constant 0 : index
    %c0_99 = arith.constant 0 : index
    %c0_100 = arith.constant 0 : index
    %100 = vector.load %arg6[%c0_98, %c0_99, %c0_100] : memref<3x192x128xbf16, #tpu.memory_space<vmem>>, vector<1x192x128xbf16>
    %101 = vector.shape_cast %100 : vector<1x192x128xbf16> to vector<192x128xbf16>
    %cst_101 = arith.constant dense<0.000000e+00> : vector<64x128xf32>
    %102 = tpu.matmul %99, %101, %cst_101 {dimension_numbers = #tpu.dot_dimension_numbers<[1], [0], [0], [1], [0, 0, 1, 1], [], []>} : vector<64x192xbf16>, vector<192x128xbf16>, vector<64x128xf32> -> vector<64x128xf32>
    %103 = vector.extract_strided_slice %97 {offsets = [1, 0, 0], sizes = [8, 8, 192], strides = [1, 1, 1]} : vector<10x8x192xbf16> to vector<8x8x192xbf16>
    %104 = vector.shape_cast %103 : vector<8x8x192xbf16> to vector<64x192xbf16>
    %c1_102 = arith.constant 1 : index
    %c0_103 = arith.constant 0 : index
    %c0_104 = arith.constant 0 : index
    %105 = vector.load %arg6[%c1_102, %c0_103, %c0_104] : memref<3x192x128xbf16, #tpu.memory_space<vmem>>, vector<1x192x128xbf16>
    %106 = vector.shape_cast %105 : vector<1x192x128xbf16> to vector<192x128xbf16>
    %cst_105 = arith.constant dense<0.000000e+00> : vector<64x128xf32>
    %107 = tpu.matmul %104, %106, %cst_105 {dimension_numbers = #tpu.dot_dimension_numbers<[1], [0], [0], [1], [0, 0, 1, 1], [], []>} : vector<64x192xbf16>, vector<192x128xbf16>, vector<64x128xf32> -> vector<64x128xf32>
    %108 = arith.addf %102, %107 : vector<64x128xf32>
    %109 = vector.extract_strided_slice %97 {offsets = [2, 0, 0], sizes = [8, 8, 192], strides = [1, 1, 1]} : vector<10x8x192xbf16> to vector<8x8x192xbf16>
    %110 = vector.shape_cast %109 : vector<8x8x192xbf16> to vector<64x192xbf16>
    %c2_106 = arith.constant 2 : index
    %c0_107 = arith.constant 0 : index
    %c0_108 = arith.constant 0 : index
    %111 = vector.load %arg6[%c2_106, %c0_107, %c0_108] : memref<3x192x128xbf16, #tpu.memory_space<vmem>>, vector<1x192x128xbf16>
    %112 = vector.shape_cast %111 : vector<1x192x128xbf16> to vector<192x128xbf16>
    %cst_109 = arith.constant dense<0.000000e+00> : vector<64x128xf32>
    %113 = tpu.matmul %110, %112, %cst_109 {dimension_numbers = #tpu.dot_dimension_numbers<[1], [0], [0], [1], [0, 0, 1, 1], [], []>} : vector<64x192xbf16>, vector<192x128xbf16>, vector<64x128xf32> -> vector<64x128xf32>
    %114 = arith.addf %108, %113 : vector<64x128xf32>
    %115 = vector.broadcast %2 : vector<1x128xf32> to vector<64x128xf32>
    %116 = arith.addf %114, %115 : vector<64x128xf32>
    %cst_110 = arith.constant 0.000000e+00 : f32
    %117 = vector.broadcast %cst_110 : f32 to vector<64x128xf32>
    %118 = arith.maximumf %116, %117 : vector<64x128xf32>
    %119 = vector.shape_cast %118 : vector<64x128xf32> to vector<8x8x128xf32>
    %120 = arith.truncf %119 : vector<8x8x128xf32> to vector<8x8x128xbf16>
    %c1_i32_111 = arith.constant 1 : i32
    %121 = arith.addi %c1_i32_111, %90 : i32
    %122 = arith.index_cast %121 : i32 to index
    %c8_112 = arith.constant 8 : index
    %c0_113 = arith.constant 0 : index
    %123 = vector.load %arg13[%122, %c8_112, %c0_113] : memref<10x24x128xbf16, #tpu.memory_space<vmem>>, vector<8x8x128xbf16>
    tpu.vector_store %arg13[%122, %c8_112, %c0_113], %120 {strides = array<i32>} : memref<10x24x128xbf16, #tpu.memory_space<vmem>>, vector<8x8x128xbf16>,
    %c1_i32_114 = arith.constant 1 : i32
    %c0_i32_115 = arith.constant 0 : i32
    %c8_i32_116 = arith.constant 8 : i32
    %124 = arith.muli %c0_i32_115, %c8_i32_116 : i32
    %125 = tpu.assume_multiple %124, 8 : i32
    %126 = arith.index_cast %125 : i32 to index
    %c7_117 = arith.constant 7 : index
    %c0_118 = arith.constant 0 : index
    %127 = vector.load %arg13[%126, %c7_117, %c0_118] : memref<10x24x128xbf16, #tpu.memory_space<vmem>>, vector<10x8x128xbf16>
    %128 = arith.index_cast %125 : i32 to index
    %c8_119 = arith.constant 8 : index
    %c0_120 = arith.constant 0 : index
    %129 = vector.load %arg13[%128, %c8_119, %c0_120] : memref<10x24x128xbf16, #tpu.memory_space<vmem>>, vector<10x8x128xbf16>
    %130 = arith.index_cast %125 : i32 to index
    %c9_121 = arith.constant 9 : index
    %c0_122 = arith.constant 0 : index
    %131 = vector.load %arg13[%130, %c9_121, %c0_122] : memref<10x24x128xbf16, #tpu.memory_space<vmem>>, vector<10x8x128xbf16>
    %132 = tpu.concatenate %127, %129, %131 in 2 : vector<10x8x128xbf16>, vector<10x8x128xbf16>, vector<10x8x128xbf16> -> vector<10x8x384xbf16>
    %133 = vector.extract_strided_slice %132 {offsets = [0, 0, 0], sizes = [8, 8, 384], strides = [1, 1, 1]} : vector<10x8x384xbf16> to vector<8x8x384xbf16>
    %134 = vector.shape_cast %133 : vector<8x8x384xbf16> to vector<64x384xbf16>
    %c0_123 = arith.constant 0 : index
    %c0_124 = arith.constant 0 : index
    %c0_125 = arith.constant 0 : index
    %135 = vector.load %arg8[%c0_123, %c0_124, %c0_125] : memref<3x384x128xbf16, #tpu.memory_space<vmem>>, vector<1x384x128xbf16>
    %136 = vector.shape_cast %135 : vector<1x384x128xbf16> to vector<384x128xbf16>
    %cst_126 = arith.constant dense<0.000000e+00> : vector<64x128xf32>
    %137 = tpu.matmul %134, %136, %cst_126 {dimension_numbers = #tpu.dot_dimension_numbers<[1], [0], [0], [1], [0, 0, 1, 1], [], []>} : vector<64x384xbf16>, vector<384x128xbf16>, vector<64x128xf32> -> vector<64x128xf32>
    %138 = vector.extract_strided_slice %132 {offsets = [1, 0, 0], sizes = [8, 8, 384], strides = [1, 1, 1]} : vector<10x8x384xbf16> to vector<8x8x384xbf16>
    %139 = vector.shape_cast %138 : vector<8x8x384xbf16> to vector<64x384xbf16>
    %c1_127 = arith.constant 1 : index
    %c0_128 = arith.constant 0 : index
    %c0_129 = arith.constant 0 : index
    %140 = vector.load %arg8[%c1_127, %c0_128, %c0_129] : memref<3x384x128xbf16, #tpu.memory_space<vmem>>, vector<1x384x128xbf16>
    %141 = vector.shape_cast %140 : vector<1x384x128xbf16> to vector<384x128xbf16>
    %cst_130 = arith.constant dense<0.000000e+00> : vector<64x128xf32>
    %142 = tpu.matmul %139, %141, %cst_130 {dimension_numbers = #tpu.dot_dimension_numbers<[1], [0], [0], [1], [0, 0, 1, 1], [], []>} : vector<64x384xbf16>, vector<384x128xbf16>, vector<64x128xf32> -> vector<64x128xf32>
    %143 = arith.addf %137, %142 : vector<64x128xf32>
    %144 = vector.extract_strided_slice %132 {offsets = [2, 0, 0], sizes = [8, 8, 384], strides = [1, 1, 1]} : vector<10x8x384xbf16> to vector<8x8x384xbf16>
    %145 = vector.shape_cast %144 : vector<8x8x384xbf16> to vector<64x384xbf16>
    %c2_131 = arith.constant 2 : index
    %c0_132 = arith.constant 0 : index
    %c0_133 = arith.constant 0 : index
    %146 = vector.load %arg8[%c2_131, %c0_132, %c0_133] : memref<3x384x128xbf16, #tpu.memory_space<vmem>>, vector<1x384x128xbf16>
    %147 = vector.shape_cast %146 : vector<1x384x128xbf16> to vector<384x128xbf16>
    %cst_134 = arith.constant dense<0.000000e+00> : vector<64x128xf32>
    %148 = tpu.matmul %145, %147, %cst_134 {dimension_numbers = #tpu.dot_dimension_numbers<[1], [0], [0], [1], [0, 0, 1, 1], [], []>} : vector<64x384xbf16>, vector<384x128xbf16>, vector<64x128xf32> -> vector<64x128xf32>
    %149 = arith.addf %143, %148 : vector<64x128xf32>
    %150 = vector.broadcast %3 : vector<1x128xf32> to vector<64x128xf32>
    %151 = arith.addf %149, %150 : vector<64x128xf32>
    %cst_135 = arith.constant 0.000000e+00 : f32
    %152 = vector.broadcast %cst_135 : f32 to vector<64x128xf32>
    %153 = arith.maximumf %151, %152 : vector<64x128xf32>
    %154 = vector.shape_cast %153 : vector<64x128xf32> to vector<8x8x128xf32>
    %c0_136 = arith.constant 0 : index
    %155 = arith.index_cast %125 : i32 to index
    %c0_137 = arith.constant 0 : index
    %c0_138 = arith.constant 0 : index
    %156 = vector.load %arg10[%c0_136, %155, %c0_137, %c0_138] : memref<1x8x8x128xf32, #tpu.memory_space<vmem>>, vector<1x8x8x128xf32>
    %157 = vector.shape_cast %156 : vector<1x8x8x128xf32> to vector<8x8x128xf32>
    %158 = vector.shape_cast %154 : vector<8x8x128xf32> to vector<1x8x8x128xf32>
    tpu.vector_store %arg10[%c0_136, %155, %c0_137, %c0_138], %158 {strides = array<i32>} : memref<1x8x8x128xf32, #tpu.memory_space<vmem>>, vector<1x8x8x128xf32>,
    %c1_i32_139 = arith.constant 1 : i32
    return
  }
  func.func @transform_0(%arg0: i32) -> (i32, i32, i32, i32) {
    %c0_i32 = arith.constant 0 : i32
    %c0_i32_0 = arith.constant 0 : i32
    %c0_i32_1 = arith.constant 0 : i32
    %c0_i32_2 = arith.constant 0 : i32
    return %arg0, %c0_i32, %c0_i32_0, %c0_i32_1 : i32, i32, i32, i32
  }
  func.func @transform_1(%arg0: i32) -> (i32, i32) {
    %c0_i32 = arith.constant 0 : i32
    %c0_i32_0 = arith.constant 0 : i32
    %c0_i32_1 = arith.constant 0 : i32
    return %c0_i32, %c0_i32_0 : i32, i32
  }
  func.func @transform_2(%arg0: i32) -> (i32, i32) {
    %c0_i32 = arith.constant 0 : i32
    %c0_i32_0 = arith.constant 0 : i32
    %c0_i32_1 = arith.constant 0 : i32
    return %c0_i32, %c0_i32_0 : i32, i32
  }
  func.func @transform_3(%arg0: i32) -> (i32, i32, i32) {
    %c0_i32 = arith.constant 0 : i32
    %c0_i32_0 = arith.constant 0 : i32
    %c0_i32_1 = arith.constant 0 : i32
    %c0_i32_2 = arith.constant 0 : i32
    return %c0_i32, %c0_i32_0, %c0_i32_1 : i32, i32, i32
  }
  func.func @transform_4(%arg0: i32) -> (i32, i32) {
    %c0_i32 = arith.constant 0 : i32
    %c0_i32_0 = arith.constant 0 : i32
    %c0_i32_1 = arith.constant 0 : i32
    return %c0_i32, %c0_i32_0 : i32, i32
  }
  func.func @transform_5(%arg0: i32) -> (i32, i32, i32) {
    %c0_i32 = arith.constant 0 : i32
    %c0_i32_0 = arith.constant 0 : i32
    %c0_i32_1 = arith.constant 0 : i32
    %c0_i32_2 = arith.constant 0 : i32
    return %c0_i32, %c0_i32_0, %c0_i32_1 : i32, i32, i32
  }
  func.func @transform_6(%arg0: i32) -> (i32, i32) {
    %c0_i32 = arith.constant 0 : i32
    %c0_i32_0 = arith.constant 0 : i32
    %c0_i32_1 = arith.constant 0 : i32
    return %c0_i32, %c0_i32_0 : i32, i32
  }
  func.func @transform_7(%arg0: i32) -> (i32, i32, i32) {
    %c0_i32 = arith.constant 0 : i32
    %c0_i32_0 = arith.constant 0 : i32
    %c0_i32_1 = arith.constant 0 : i32
    %c0_i32_2 = arith.constant 0 : i32
    return %c0_i32, %c0_i32_0, %c0_i32_1 : i32, i32, i32
  }
  func.func @transform_8(%arg0: i32) -> (i32, i32) {
    %c0_i32 = arith.constant 0 : i32
    %c0_i32_0 = arith.constant 0 : i32
    %c0_i32_1 = arith.constant 0 : i32
    return %c0_i32, %c0_i32_0 : i32, i32
  }
  func.func @transform_9(%arg0: i32) -> (i32, i32, i32, i32) {
    %c0_i32 = arith.constant 0 : i32
    %c0_i32_0 = arith.constant 0 : i32
    %c0_i32_1 = arith.constant 0 : i32
    %c0_i32_2 = arith.constant 0 : i32
    return %arg0, %c0_i32, %c0_i32_0, %c0_i32_1 : i32, i32, i32, i32
  }
}

</mosaic_0001>

<bundles_post_ra>
// kernel: tpu_custom_call.1
= control target key start
LH: loop header
LB: loop body
LE: loop exit
PB: predicated region body
PF: predicated region fallthrough
CT: control target
= control target key end

     0   :  { %s9437_s0 = inlined_call_operand.hbm [shape: bf16[2,16,16,32], index: 0, kind: input, shape index: {}]   ;;  %s9438_s1 = inlined_call_operand.vmem [shape: bf16[32,64], index: 1, kind: input, shape index: {}]   ;;  %s9439_s2 = inlined_call_operand.vmem [shape: f32[1,64], index: 2, kind: input, shape index: {}]   ;;  %s9440_s3 = inlined_call_operand.vmem [shape: bf16[3,192,64], index: 3, kind: input, shape index: {}]   ;;  %s9441_s4 = inlined_call_operand.vmem [shape: f32[1,64], index: 4, kind: input, shape index: {}]   ;;  %s9442_s5 = inlined_call_operand.vmem [shape: bf16[3,192,128], index: 5, kind: input, shape index: {}]   ;;  %s9443_s6 = inlined_call_operand.vmem [shape: f32[1,128], index: 6, kind: input, shape index: {}]   ;;  %s9444_s7 = inlined_call_operand.hbm [shape: bf16[3,384,128], index: 7, kind: input, shape index: {}]   ;;  %s9445_s8 = inlined_call_operand.vmem [shape: f32[1,128], index: 8, kind: input, shape index: {}]   ;;  %s9446_s9 = inlined_call_operand.hbm [shape: f32[2,8,8,128], index: 9, kind: output, shape index: {}]  }
   0x1   :  { %9453 = sst [smem:[#allocation65_spill]] %s9444_s7 }
   0x2   :  { %14 = vsyncpa [#allocation7], 0 }
   0x3   :  { %16 = vsyncpa [#allocation7 + $0x1], 0 }
   0x4   :  { %17 = vsyncpa [#allocation10], 0 }
   0x5   :  { %18 = vsyncpa [#allocation8], 0 }
   0x6   :  { %20 = vsyncpa [#allocation8 + $0x1], 0  ;;  %s7166_s30 = smov 0   ;;  %s7168_s10 = smov 0  }
   0x7   :  { %s7170_s11 = smov 0   ;;  %s7172_s12 = smov 0  }
   0x8 LB: > { %9454 = sst [smem:[#allocation15_spill]] %s7103_s11  ;;  %s7187_s13 = sadd.s32 4294967295, %s7107_s12   ;;  %s7107_s12 = sphi %s7172_s12, %s9580_s12   ;;  %s7103_s11 = sphi %s7170_s11, %s9577_s11   ;;  %s7099_s10 = sphi %s7168_s10, %s9579_s10   ;;  %s7095_s30 = sphi %s7166_s30, %s9578_s30  }
   0x9   : > { %s5780_s14 = sadd.s32 4294967294, %s7107_s12   ;;  %p46_p0 = scmp.ne.s32.totalorder %s7099_s10, %s7095_s30 }
   0xa   : > { %p47_p1 = scmp.eq.s32.totalorder %s7187_s13, 0  ;;  %p238_p2 = scmp.eq.s32.totalorder %s7187_s13, 1 }
   0xb   : > { %p244_p3 = scmp.eq.s32.totalorder %s5780_s14, 1  ;;  %p5781_p5 = scmp.ge.s32.totalorder %s7107_s12, 1 }
   0xc   : > { %p7196_p4 = por %p47_p1, %p46_p0  ;;  %p251_p7 = scmp.lt.s32.totalorder %s7107_s12, 3 }
   0xd   : > { %p7201_p6 = por %p244_p3, %p46_p0  ;;  %s9457_s7 = sld [smem:[#allocation65_spill]] }
   0xe   : > { %p7209_p8 = pnand %p5781_p5, %p251_p7  ;;  %s7109_s21 = smov [#allocation9]  }
   0xf   : > { %s282_s22 = sshll.u32 %s7109_s21, 4  ;;  %s7219_s23 = sadd.s32 1, %s7107_s12   ;;  %s283_s22 = int_to_ptr.vmem [resolvable:$true] %s282_s22 }
  0x10   : > { %p6826_p9 = pneg %p7209_p8  ;;  %s9447_s24 = smov 64  }
  0x11   : > { %s9448_s25 = smov 4   ;;  %s30_s26 = ssub.s32 %s7107_s12, %s7219_s23 }
  0x12   : > { %p6827_p10 = pnand %p6826_p9, %p47_p1  ;;  %s33_s27 = sadd.s32 1, %s7103_s11 }
  0x13   : > { %s280_s19 = sshll.u32 %s9457_s7, 4  ;;  %p31_p12 = scmp.eq.s32.totalorder %s30_s26, 0  ;;  %s281_s19 = int_to_ptr.hbm [resolvable:$true] %s280_s19 }
  0x14   : > { %6829 = dma.hbm_to_vmem [thread:$0]  (!%p6827_p10), %s281_s19, 9216, %s283_s22, [#allocation10], %s9447_s24, %s9447_s24, %s9448_s25  }
  0x15   : > { %p40_p13 = scmp.ne.s32.totalorder %s7103_s11, %s7099_s10  ;;  %p41_p0 = scmp.eq.s32.totalorder %s7107_s12, 0 }
  0x16   : > { %s7231_s28 = scalar_select %p31_p12, %s7103_s11, %s33_s27  }
  0x17   : > { %p7235_p3 = por %p238_p2, %p40_p13  ;;  %p6839_p5 = scmp.lt.s32.totalorder %s7107_s12, 2 }
  0x18   : > { %9459 = sst [smem:[#allocation16_spill]] %s7231_s28  ;;  %s299_s14 = sand.u32 1, %s7103_s11  }
  0x19   : > { %s6646_s17 = sshll.u32 %s7107_s12, 7  ;;  %p42_p7 = por %p41_p0, %p40_p13 }
  0x1a   : > { %s5784_s18 = sshll.u32 %s299_s14, 7  ;;  %s308_s19 = scalar_lea.hbm %s9437_s0, %s6646_s17 }
  0x1b   : > { %s309_s22 = sshll.u32 %s308_s19, 4  ;;  %s303_s26 = scalar_lea.vmem [#allocation6], %s5784_s18  ;;  %s310_s22 = int_to_ptr.hbm [resolvable:$true] %s309_s22 }
  0x1c   : > { %s311_s24 = sshll.u32 %s303_s26, 4  ;;  %p7245_p9 = pnand %p6839_p5, %p42_p7  ;;  %s312_s24 = int_to_ptr.vmem [resolvable:$true] %s311_s24 }
  0x1d   : > { %s300_s25 = scalar_lea.sflag [#allocation7], %s299_s14  ;;  %s6989_s28 = sshra.s32 %s310_s22, 4  ;;  %s6990_s28 = int_to_ptr.hbm [resolvable:$true] %s6989_s28 }
  0x1e   : > { %s6991_s11 = scalar_lea.hbm %s6990_s28, 128  ;;  %p6993_p10 = pneg %p7245_p9 }
  0x1f   : > { %p6992_p2 = scmp.ne.s32.totalorder %s6990_s28, %s6991_s11  ;;  %s6996_s18 = scalar_lea.hbm %s9437_s0, 256 }
  0x20   : > { %p6997_p0 = scmp.lt.s32.totalorder %s6990_s28, %s9437_s0  ;;  %p6998_p5 = scmp.lt.s32.totalorder %s6996_s18, %s6991_s11 }
  0x21   : > { %p6994_p12 = pnand %p6993_p10, %p6992_p2 }
  0x22   : > { %p6999_p7 = por %p6998_p5, %p6997_p0 }
  0x23   : > { %p6995_p13 = pneg %p6994_p12 }
  0x25   : > { %p7000_p11 = pnand %p6999_p7, %p6995_p13 }
  0x27   : > { %7003 = shalt.err (!%p7000_p11)
}
  0x28   : > { %s9462_s14 = smov 4   ;;  %s9463_s26 = smov 64  }
  0x29   : > { %6833 = dma.hbm_to_vmem [thread:$0]  (!%p7245_p9), %s310_s22, 2048, %s312_s24, %s300_s25, %s9463_s26, %s9463_s26, %s9462_s14  }
  0x2a   : > { %323 = sbr.rel (%p7209_p8) target bundleno = 1832 (0x728), region = 56 }
  0x2f   : > { %s7265_s7 = sand.u32 1, %s7099_s10  }
  0x30   : > { %s5788_s28 = sshll.u32 %s7265_s7, 7  ;;  %s326_s11 = scalar_lea.sflag [#allocation7], %s7265_s7 }
  0x31   : > { %s7269_s17 = scalar_lea.vmem [#allocation6], %s5788_s28 }
  0x32   : > { %7064 = dma.done.wait (%p7196_p4), %s326_s11, 2048  }
  0x33   : > { %7066 = vsyncadd (%p7196_p4), %s326_s11, 4294965248 }
  0x34   : > { %7068 = dma.done.wait (%p47_p1), [#allocation10], 9216  }
  0x35   : > { %7070 = vsyncadd (%p47_p1), [#allocation10], 4294958080  ;;  %v6664_v0 = vld [vmem:[%s9438_s1 + $0x8] sm:$0xff]  ;;  %v6663_v1 = vld [vmem:[%s9438_s1] sm:$0xff]  ;;  %vm609_vm0 = vcmask 261120   ;;  %vm375_vm1 = vcmask 519168  }
  0x36   : > { %664 = vmatpush.bf16.msra.mxu0 %v6664_v0  ;;  %v6647_v2 = vld [vmem:[%s7269_s17] sm:$0xff]  ;;  %v6648_v3 = vld [vmem:[%s7269_s17 + $0x8] sm:$0xff]  ;;  %v6649_v4 = vld [vmem:[%s7269_s17 + $0x10] sm:$0xff]  ;;  %v7112_v10 = vmov 0   ;;  %vm1318_vm2 = vcmask 1042432   ;;  %s7113_s24 = smov 64  }
  0x37   : > { %v6650_v5 = vld [vmem:[%s7269_s17 + $0x18] sm:$0xff]  ;;  %v6651_v6 = vld [vmem:[%s7269_s17 + $0x20] sm:$0xff]  ;;  %v6652_v7 = vld [vmem:[%s7269_s17 + $0x28] sm:$0xff]  ;;  %404 = vst.msk [vmem:[#allocation2 + $0x1c] sm:$0xf] %vm375_vm1, %v7112_v10  ;;  %vm1373_vm4 = vcmask 523264  }
  0x38   : > { %v6653_v8 = vld [vmem:[%s7269_s17 + $0x30] sm:$0xff]  ;;  %v6654_v9 = vld [vmem:[%s7269_s17 + $0x38] sm:$0xff]  ;;  %376 = vst.msk [vmem:[#allocation2] sm:$0xf] %vm375_vm1, %v7112_v10  ;;  %v6688_v11 = vld [vmem:[%s9440_s3 + $0xb8] sm:$0xff]  ;;  %s5790_s25 = sshll.u32 %s7265_s7, 6 }
  0x39   : > { %377 = vst.msk [vmem:[#allocation2 + $0x4] sm:$0xf] %vm375_vm1, %v7112_v10  ;;  %2288 = vmatpush.bf16.msra.mxu2 %v6688_v11  ;;  %v6687_v12 = vld [vmem:[%s9440_s3 + $0xb0] sm:$0xff]  ;;  %v6686_v13 = vld [vmem:[%s9440_s3 + $0xa8] sm:$0xff]  ;;  %v7341_v14 = vld [vmem:[%s9439_s2] ss:$0 sm:$0xff] }
  0x3a   : > { %665 = vmatpush.bf16.msra.mxu0 %v6663_v1  ;;  %378 = vst.msk [vmem:[#allocation2 + $0x8] sm:$0xf] %vm375_vm1, %v7112_v10  ;;  %v6655_v15 = vld [vmem:[%s7269_s17 + $0x40] sm:$0xff]  ;;  %v6685_v17 = vld [vmem:[%s9440_s3 + $0xa0] sm:$0xff]  ;;  %v6656_v26 = vld [vmem:[%s7269_s17 + $0x48] sm:$0xff]  ;;  %s9361_s22 = scalar_lea.vmem [#allocation11], %s5790_s25 }
  0x3b   : > { %379 = vst.msk [vmem:[#allocation2 + $0xc] sm:$0xf] %vm375_vm1, %v7112_v10  ;;  %v6657_v52 = vld [vmem:[%s7269_s17 + $0x50] sm:$0xff]  ;;  %vm1464_vm3 = vsmask.f32 4352  ;;  %s6809_s15 = sshll.u32 %s7187_s13, 6 }
  0x3c   : > { %381 = vst.msk [vmem:[#allocation2 + $0x110] sm:$0xf] %vm375_vm1, %v7112_v10  ;;  %vm3446_vm5 = vsmask.f32 256  ;;  %vm3447_vm6 = vsmask.f32 4368  ;;  %s5690_s21 = scalar_lea.hbm %s9446_s9, %s6809_s15 }
  0x3d   : > { %5863 = vmatmul.msk.bf16.vlgmr.msra.gmra.mxu0 %vm609_vm0, %v6647_v2  ;;  %382 = vst.msk [vmem:[#allocation2 + $0x114] sm:$0xf] %vm375_vm1, %v7112_v10  ;;  %2289 = vmatpush.bf16.msra.mxu2 %v6687_v12  ;;  %vm8728_vm7 = vmor %vm3446_vm5, %vm3447_vm6  ;;  %s5693_s13 = sshll.u32 %s5690_s21, 4  ;;  %s5679_s19 = scalar_lea.sflag [#allocation8], %s7265_s7  ;;  %s5694_s13 = int_to_ptr.hbm [resolvable:$true] %s5693_s13 }
  0x3e   : > { %383 = vst.msk [vmem:[#allocation2 + $0x118] sm:$0xf] %vm375_vm1, %v7112_v10  ;;  %v905_v25 = vld [vmem:[#allocation2 + $0x1c] sm:$0x1]  ;;  %s7033_s14 = sshra.s32 %s5694_s13, 4  ;;  %s7039_s11 = scalar_lea.hbm %s9446_s9, 128  ;;  %s7034_s14 = int_to_ptr.hbm [resolvable:$true] %s7033_s14 }
  0x3f   : > { %384 = vst.msk [vmem:[#allocation2 + $0x11c] sm:$0xf] %vm375_vm1, %v7112_v10  ;;  %v1283_v29 = vunpack.c.l.b16 %v905_v25  ;;  %s7035_s26 = scalar_lea.hbm %s7034_s14, 64  ;;  %p7040_p11 = scmp.lt.s32.totalorder %s7034_s14, %s9446_s9 }
  0x40   : > { %386 = vst.msk [vmem:[#allocation2 + $0x10] sm:$0xf] %vm375_vm1, %v7112_v10  ;;  %p7036_p1 = scmp.ne.s32.totalorder %s7034_s14, %s7035_s26  ;;  %p7041_p9 = scmp.lt.s32.totalorder %s7039_s11, %s7035_s26 }
  0x41   : > { %387 = vst.msk [vmem:[#allocation2 + $0x20] sm:$0xf] %vm375_vm1, %v7112_v10  ;;  %2290 = vmatpush.bf16.msra.mxu2 %v6686_v13  ;;  %v1301_v32 = vpack.c.b16 %v1283_v29, %v1283_v29 }
  0x42   : > { %388 = vst.msk [vmem:[#allocation2 + $0x30] sm:$0xf] %vm375_vm1, %v7112_v10  ;;  %p7037_p4 = pnand %p7036_p1, %p7235_p3  ;;  %p7042_p2 = por %p7041_p9, %p7040_p11 }
  0x43   : > { %389 = vst.msk [vmem:[#allocation2 + $0x40] sm:$0xf] %vm375_vm1, %v7112_v10  ;;  %v1323_v38 = vrot.slane %v1301_v32, 5  ;;  %v6659_v32 = vld [vmem:[%s7269_s17 + $0x60] sm:$0xff] }
  0x44   : > { %390 = vst.msk [vmem:[#allocation2 + $0x50] sm:$0xf] %vm375_vm1, %v7112_v10  ;;  %p7038_p8 = pneg %p7037_p4 }
  0x45   : > { %391 = vst.msk [vmem:[#allocation2 + $0x60] sm:$0xf] %vm375_vm1, %v7112_v10  ;;  %2291 = vmatpush.bf16.msra.mxu2 %v6685_v17 }
  0x46   : > { %392 = vst.msk [vmem:[#allocation2 + $0x70] sm:$0xf] %vm375_vm1, %v7112_v10  ;;  %p7043_p10 = pnand %p7042_p2, %p7038_p8 }
  0x47   : > { %393 = vst.msk [vmem:[#allocation2 + $0x80] sm:$0xf] %vm375_vm1, %v7112_v10 }
  0x48   : > { %394 = vst.msk [vmem:[#allocation2 + $0x90] sm:$0xf] %vm375_vm1, %v7112_v10 }
  0x49   : > { %395 = vst.msk [vmem:[#allocation2 + $0xa0] sm:$0xf] %vm375_vm1, %v7112_v10 }
  0x4a   : > { %396 = vst.msk [vmem:[#allocation2 + $0xb0] sm:$0xf] %vm375_vm1, %v7112_v10 }
  0x4b   : > { %397 = vst.msk [vmem:[#allocation2 + $0xc0] sm:$0xf] %vm375_vm1, %v7112_v10 }
  0x4c   : > { %398 = vst.msk [vmem:[#allocation2 + $0xd0] sm:$0xf] %vm375_vm1, %v7112_v10 }
  0x4d   : > { %5864 = vmatmul.msk.bf16.gmra.mxu0 %vm609_vm0, %v6648_v3  ;;  %399 = vst.msk [vmem:[#allocation2 + $0xe0] sm:$0xf] %vm375_vm1, %v7112_v10 }
  0x4e   : > { %400 = vst.msk [vmem:[#allocation2 + $0xf0] sm:$0xf] %vm375_vm1, %v7112_v10 }
  0x4f   : > { %401 = vst.msk [vmem:[#allocation2 + $0x100] sm:$0xf] %vm375_vm1, %v7112_v10 }
  0x50   : > { %405 = vst.msk [vmem:[#allocation2 + $0x2c] sm:$0xf] %vm375_vm1, %v7112_v10 }
  0x51   : > { %406 = vst.msk [vmem:[#allocation2 + $0x3c] sm:$0xf] %vm375_vm1, %v7112_v10 }
  0x52   : > { %407 = vst.msk [vmem:[#allocation2 + $0x4c] sm:$0xf] %vm375_vm1, %v7112_v10 }
  0x53   : > { %408 = vst.msk [vmem:[#allocation2 + $0x5c] sm:$0xf] %vm375_vm1, %v7112_v10 }
  0x54   : > { %409 = vst.msk [vmem:[#allocation2 + $0x6c] sm:$0xf] %vm375_vm1, %v7112_v10 }
  0x55   : > { %410 = vst.msk [vmem:[#allocation2 + $0x7c] sm:$0xf] %vm375_vm1, %v7112_v10 }
  0x56   : > { %411 = vst.msk [vmem:[#allocation2 + $0x8c] sm:$0xf] %vm375_vm1, %v7112_v10 }
  0x57   : > { %412 = vst.msk [vmem:[#allocation2 + $0x9c] sm:$0xf] %vm375_vm1, %v7112_v10  ;;  %v906_v63 = vld [vmem:[#allocation2 + $0x2c] sm:$0x1] }
  0x58   : > { %413 = vst.msk [vmem:[#allocation2 + $0xac] sm:$0xf] %vm375_vm1, %v7112_v10  ;;  %v1284_v1 = vunpack.c.l.b16 %v906_v63 }
  0x59   : > { %414 = vst.msk [vmem:[#allocation2 + $0xbc] sm:$0xf] %vm375_vm1, %v7112_v10 }
  0x5a   : > { %415 = vst.msk [vmem:[#allocation2 + $0xcc] sm:$0xf] %vm375_vm1, %v7112_v10 }
  0x5b   : > { %416 = vst.msk [vmem:[#allocation2 + $0xdc] sm:$0xf] %vm375_vm1, %v7112_v10 }
  0x5c   : > { %417 = vst.msk [vmem:[#allocation2 + $0xec] sm:$0xf] %vm375_vm1, %v7112_v10 }
  0x5d   : > { %5865 = vmatmul.msk.bf16.gmra.mxu0 %vm609_vm0, %v6649_v4  ;;  %418 = vst.msk [vmem:[#allocation2 + $0xfc] sm:$0xf] %vm375_vm1, %v7112_v10 }
  0x5e   : > { %419 = vst.msk [vmem:[#allocation2 + $0x10c] sm:$0xf] %vm375_vm1, %v7112_v10 }
  0x5f   : > { %421 = vst.msk [vmem:[#allocation3] sm:$0xf] %vm375_vm1, %v7112_v10 }
  0x60   : > { %422 = vst.msk [vmem:[#allocation3 + $0x4] sm:$0xf] %vm375_vm1, %v7112_v10 }
  0x61   : > { %423 = vst.msk [vmem:[#allocation3 + $0x8] sm:$0xf] %vm375_vm1, %v7112_v10 }
  0x62   : > { %425 = vst.msk [vmem:[#allocation3 + $0x6c] sm:$0xf] %vm375_vm1, %v7112_v10 }
  0x63   : > { %426 = vst.msk [vmem:[#allocation3 + $0x70] sm:$0xf] %vm375_vm1, %v7112_v10 }
  0x64   : > { %427 = vst.msk [vmem:[#allocation3 + $0x74] sm:$0xf] %vm375_vm1, %v7112_v10 }
  0x65   : > { %429 = vst.msk [vmem:[#allocation3 + $0xc] sm:$0xf] %vm375_vm1, %v7112_v10 }
  0x66   : > { %430 = vst.msk [vmem:[#allocation3 + $0x18] sm:$0xf] %vm375_vm1, %v7112_v10 }
  0x67   : > { %431 = vst.msk [vmem:[#allocation3 + $0x24] sm:$0xf] %vm375_vm1, %v7112_v10 }
  0x68   : > { %432 = vst.msk [vmem:[#allocation3 + $0x30] sm:$0xf] %vm375_vm1, %v7112_v10 }
  0x69   : > { %433 = vst.msk [vmem:[#allocation3 + $0x3c] sm:$0xf] %vm375_vm1, %v7112_v10 }
  0x6a   : > { %434 = vst.msk [vmem:[#allocation3 + $0x48] sm:$0xf] %vm375_vm1, %v7112_v10 }
  0x6b   : > { %435 = vst.msk [vmem:[#allocation3 + $0x54] sm:$0xf] %vm375_vm1, %v7112_v10 }
  0x6c   : > { %436 = vst.msk [vmem:[#allocation3 + $0x60] sm:$0xf] %vm375_vm1, %v7112_v10 }
  0x6d   : > { %5866 = vmatmul.msk.bf16.gmra.mxu0 %vm609_vm0, %v6650_v5  ;;  %v1302_v5 = vpack.c.b16 %v1284_v1, %v1284_v1  ;;  %439 = vst.msk [vmem:[#allocation3 + $0x14] sm:$0xf] %vm375_vm1, %v7112_v10 }
  0x6e   : > { %440 = vst.msk [vmem:[#allocation3 + $0x20] sm:$0xf] %vm375_vm1, %v7112_v10 }
  0x6f   : > { %441 = vst.msk [vmem:[#allocation3 + $0x2c] sm:$0xf] %vm375_vm1, %v7112_v10 }
  0x70   : > { %442 = vst.msk [vmem:[#allocation3 + $0x38] sm:$0xf] %vm375_vm1, %v7112_v10 }
  0x71   : > { %443 = vst.msk [vmem:[#allocation3 + $0x44] sm:$0xf] %vm375_vm1, %v7112_v10 }
  0x72   : > { %444 = vst.msk [vmem:[#allocation3 + $0x50] sm:$0xf] %vm375_vm1, %v7112_v10 }
  0x73   : > { %445 = vst.msk [vmem:[#allocation3 + $0x5c] sm:$0xf] %vm375_vm1, %v7112_v10 }
  0x74   : > { %446 = vst.msk [vmem:[#allocation3 + $0x68] sm:$0xf] %vm375_vm1, %v7112_v10 }
  0x75   : > { %448 = vst [vmem:[#allocation4] sm:$0xf] %v7112_v10 }
  0x76   : > { %449 = vst [vmem:[#allocation4 + $0x4] sm:$0xf] %v7112_v10 }
  0x77   : > { %450 = vst [vmem:[#allocation4 + $0x8] sm:$0xf] %v7112_v10 }
  0x78   : > { %452 = vst [vmem:[#allocation4 + $0x6c] sm:$0xf] %v7112_v10 }
  0x79   : > { %453 = vst [vmem:[#allocation4 + $0x70] sm:$0xf] %v7112_v10 }
  0x7a   : > { %454 = vst [vmem:[#allocation4 + $0x74] sm:$0xf] %v7112_v10 }
  0x7b   : > { %456 = vst [vmem:[#allocation4 + $0xc] sm:$0xf] %v7112_v10 }
  0x7c   : > { %457 = vst [vmem:[#allocation4 + $0x18] sm:$0xf] %v7112_v10 }
  0x7d   : > { %5867 = vmatmul.msk.bf16.gmra.mxu0 %vm609_vm0, %v6651_v6  ;;  %458 = vst [vmem:[#allocation4 + $0x24] sm:$0xf] %v7112_v10 }
  0x7e   : > { %459 = vst [vmem:[#allocation4 + $0x30] sm:$0xf] %v7112_v10 }
  0x7f   : > { %460 = vst [vmem:[#allocation4 + $0x3c] sm:$0xf] %v7112_v10 }
  0x80   : > { %461 = vst [vmem:[#allocation4 + $0x48] sm:$0xf] %v7112_v10 }
  0x81   : > { %462 = vst [vmem:[#allocation4 + $0x54] sm:$0xf] %v7112_v10 }
  0x82   : > { %463 = vst [vmem:[#allocation4 + $0x60] sm:$0xf] %v7112_v10 }
  0x83   : > { %466 = vst [vmem:[#allocation4 + $0x14] sm:$0xf] %v7112_v10 }
  0x84   : > { %467 = vst [vmem:[#allocation4 + $0x20] sm:$0xf] %v7112_v10 }
  0x85   : > { %468 = vst [vmem:[#allocation4 + $0x2c] sm:$0xf] %v7112_v10 }
  0x86   : > { %469 = vst [vmem:[#allocation4 + $0x38] sm:$0xf] %v7112_v10 }
  0x87   : > { %470 = vst [vmem:[#allocation4 + $0x44] sm:$0xf] %v7112_v10 }
  0x88   : > { %471 = vst [vmem:[#allocation4 + $0x50] sm:$0xf] %v7112_v10 }
  0x89   : > { %472 = vst [vmem:[#allocation4 + $0x5c] sm:$0xf] %v7112_v10 }
  0x8a   : > { %473 = vst [vmem:[#allocation4 + $0x68] sm:$0xf] %v7112_v10 }
  0x8b   : > { %385 = vst.msk [vmem:[#allocation2] sm:$0xf] %vm375_vm1, %v7112_v10 }
  0x8c   : > { %402 = vst.msk [vmem:[#allocation2 + $0x110] sm:$0xf] %vm375_vm1, %v7112_v10 }
  0x8d   : > { %5868 = vmatmul.msk.bf16.gmra.mxu0 %vm609_vm0, %v6652_v7  ;;  %v1326_v7 = vrot.slane %v1302_v5, 5  ;;  %403 = vst.msk [vmem:[#allocation2 + $0xc] sm:$0xf] %vm375_vm1, %v7112_v10 }
  0x8e   : > { %420 = vst.msk [vmem:[#allocation2 + $0x11c] sm:$0xf] %vm375_vm1, %v7112_v10 }
  0x8f   : > { %428 = vst.msk [vmem:[#allocation3] sm:$0xf] %vm375_vm1, %v7112_v10 }
  0x90   : > { %437 = vst.msk [vmem:[#allocation3 + $0x6c] sm:$0xf] %vm375_vm1, %v7112_v10 }
  0x91   : > { %438 = vst.msk [vmem:[#allocation3 + $0x8] sm:$0xf] %vm375_vm1, %v7112_v10 }
  0x92   : > { %447 = vst.msk [vmem:[#allocation3 + $0x74] sm:$0xf] %vm375_vm1, %v7112_v10 }
  0x93   : > { %455 = vst [vmem:[#allocation4] sm:$0xf] %v7112_v10 }
  0x94   : > { %464 = vst [vmem:[#allocation4 + $0x6c] sm:$0xf] %v7112_v10 }
  0x95   : > { %465 = vst [vmem:[#allocation4 + $0x8] sm:$0xf] %v7112_v10 }
  0x96   : > { %474 = vst [vmem:[#allocation4 + $0x74] sm:$0xf] %v7112_v10 }
  0x9d   : > { %5869 = vmatmul.msk.bf16.gmra.mxu0 %vm609_vm0, %v6653_v8 }
  0xad   : > { %5870 = vmatmul.msk.bf16.gmra.mxu0 %vm609_vm0, %v6654_v9 }
  0xba   : > { %v667_v16 = vpop.f32.mrf.mxu0 }
  0xbb   : > { %v668_v18 = vadd.f32 %v7341_v14, %v667_v16 }
  0xbd   : > { %v747_v19 = vmax.f32 %v668_v18, 0.0  ;;  %5871 = vmatmul.msk.bf16.gmra.mxu0 %vm609_vm0, %v6655_v15 }
  0xbf   : > { %v779_v20 = vpack.c.bf16 %v747_v19, %v747_v19 }
  0xc1   : > { %815 = vst.msk [vmem:[#allocation2 + $0x14] sm:$0xf] %vm375_vm1, %v779_v20 }
  0xc2   : > { %v669_v21 = vpop.f32.mrf.mxu0 }
  0xc3   : > { %v670_v22 = vadd.f32 %v7341_v14, %v669_v21  ;;  %v6658_v21 = vld [vmem:[%s7269_s17 + $0x58] sm:$0xff] }
  0xc5   : > { %v748_v23 = vmax.f32 %v670_v22, 0.0 }
  0xc7   : > { %v780_v24 = vpack.c.bf16 %v748_v23, %v748_v23 }
  0xc8   : > { %v7403_v34 = vld [vmem:[#allocation2 + $0x10] sm:$0xf0]  }
  0xc9   : > { %816 = vst.msk [vmem:[#allocation2 + $0x18] sm:$0xf] %vm375_vm1, %v780_v24 }
  0xca   : > { %v672_v27 = vpop.f32.mrf.mxu0 }
  0xcb   : > { %v673_v28 = vadd.f32 %v7341_v14, %v672_v27 }
  0xcd   : > { %v749_v30 = vmax.f32 %v673_v28, 0.0  ;;  %5872 = vmatmul.msk.bf16.gmra.mxu0 %vm609_vm0, %v6656_v26 }
  0xcf   : > { %v781_v31 = vpack.c.bf16 %v749_v30, %v749_v30 }
  0xd0   : > { %v7401_v33 = vld [vmem:[#allocation2 + $0x14] sm:$0xff]  }
  0xd1   : > { %817 = vst.msk [vmem:[#allocation2 + $0x24] sm:$0xf] %vm375_vm1, %v781_v31  ;;  %v981_v35 = vunpack.c.h.b16 %v7401_v33  ;;  %v1093_v40 = vshrl.u32 %v7401_v33, 16  ;;  %v1096_v41 = vshll.u32 %v7401_v33, 16  ;;  %v1322_v42 = vrot.slane %v7401_v33, 5 }
  0xd2   : > { %v674_v36 = vpop.f32.mrf.mxu0 }
  0xd3   : > { %v675_v37 = vadd.f32 %v7341_v14, %v674_v36  ;;  %v1095_v44 = vrot.slane %v1093_v40, 4  ;;  %v1098_v45 = vrot.slane %v1096_v41, 5  ;;  %v1324_v46 = vsel %vm1318_vm2, %v1322_v42, %v1323_v38 }
  0xd4   : > { %v1513_v47 = vshrl.u32 %v1322_v42, 16  ;;  %v1516_v48 = vshll.u32 %v1322_v42, 16  ;;  %v1521_v49 = vshrl.u32 %v1324_v46, 16  ;;  %v1524_v50 = vshll.u32 %v1324_v46, 16 }
  0xd5   : > { %v750_v39 = vmax.f32 %v675_v37, 0.0  ;;  %v1099_v51 = vor.u32 %v1098_v45, %v1095_v44 }
  0xd6   : > { %v1515_v54 = vrot.slane %v1513_v47, 3  ;;  %v1518_v55 = vrot.slane %v1516_v48, 4  ;;  %v1523_v56 = vrot.slane %v1521_v49, 3  ;;  %v1526_v57 = vrot.slane %v1524_v50, 4 }
  0xd7   : > { %v782_v43 = vpack.c.bf16 %v750_v39, %v750_v39  ;;  %1230 = vrot.lane.b32.xlu0 %v1099_v51, %s7113_s24  ;;  %v907_v39 = vld [vmem:[#allocation2 + $0x3c] sm:$0x1] }
  0xd8   : > { %v1519_v59 = vor.u32 %v1518_v55, %v1515_v54  ;;  %v1527_v60 = vor.u32 %v1526_v57, %v1523_v56  ;;  %v7454_v3 = vld [vmem:[#allocation2 + $0x20] sm:$0xf0]  }
  0xd9   : > { %818 = vst.msk [vmem:[#allocation2 + $0x28] sm:$0xf] %vm375_vm1, %v782_v43  ;;  %v1285_v43 = vunpack.c.l.b16 %v907_v39  ;;  %v6676_v39 = vld [vmem:[%s9440_s3 + $0x58] sm:$0xff] }
  0xda   : > { %v677_v53 = vpop.f32.mrf.mxu0  ;;  %v7442_v62 = vsel %vm1464_vm3, %v1519_v59, %v1527_v60  ;;  %2541 = vmatpush.bf16.msrb.mxu0 %v6676_v39 }
  0xdb   : > { %v678_v58 = vadd.f32 %v7341_v14, %v677_v53  ;;  %5951 = vmatmul.msk.bf16.vlgmr.msra.gmra.mxu2 %vm1373_vm4, %v7442_v62  ;;  %v1303_v48 = vpack.c.b16 %v1285_v43, %v1285_v43 }
  0xdd   : > { %v751_v61 = vmax.f32 %v678_v58, 0.0  ;;  %5873 = vmatmul.msk.bf16.gmra.mxu0 %vm609_vm0, %v6657_v52  ;;  %v6660_v52 = vld [vmem:[%s7269_s17 + $0x68] sm:$0xff]  ;;  %v1329_v59 = vrot.slane %v1303_v48, 5 }
  0xdf   : > { %v783_v0 = vpack.c.bf16 %v751_v61, %v751_v61 }
  0xe0   : > { %v7452_v2 = vld [vmem:[#allocation2 + $0x24] sm:$0xff]  }
  0xe1   : > { %819 = vst.msk [vmem:[#allocation2 + $0x34] sm:$0xf] %vm375_vm1, %v783_v0  ;;  %v984_v4 = vunpack.c.h.b16 %v7452_v2  ;;  %v1101_v8 = vshrl.u32 %v7452_v2, 16  ;;  %v1104_v9 = vshll.u32 %v7452_v2, 16  ;;  %v1325_v11 = vrot.slane %v7452_v2, 5 }
  0xe2   : > { %v679_v6 = vpop.f32.mrf.mxu0 }
  0xe3   : > { %v1103_v12 = vrot.slane %v1101_v8, 4  ;;  %v1106_v13 = vrot.slane %v1104_v9, 5  ;;  %v1327_v15 = vsel %vm1318_vm2, %v1325_v11, %v1326_v7  ;;  %v1545_v16 = vshrl.u32 %v1325_v11, 16  ;;  %v908_v7 = vld [vmem:[#allocation2 + $0x4c] sm:$0x1] }
  0xe4   : > { %v1548_v17 = vshll.u32 %v1325_v11, 16  ;;  %v1553_v18 = vshrl.u32 %v1327_v15, 16  ;;  %v1556_v19 = vshll.u32 %v1327_v15, 16  ;;  %v680_v31 = vadd.f32 %v7341_v14, %v679_v6 }
  0xe5   : > { %v1107_v20 = vor.u32 %v1106_v13, %v1103_v12  ;;  %v1547_v23 = vrot.slane %v1545_v16, 3 }
  0xe6   : > { %v1550_v24 = vrot.slane %v1548_v17, 4  ;;  %v1555_v25 = vrot.slane %v1553_v18, 3  ;;  %v1558_v26 = vrot.slane %v1556_v19, 4  ;;  %v752_v36 = vmax.f32 %v680_v31, 0.0 }
  0xe7   : > { %1232 = vrot.lane.b32.xlu0 %v1107_v20, %s7113_s24  ;;  %v1286_v18 = vunpack.c.l.b16 %v908_v7  ;;  %v909_v20 = vld [vmem:[#allocation2 + $0x5c] sm:$0x1] }
  0xe8   : > { %v1551_v27 = vor.u32 %v1550_v24, %v1547_v23  ;;  %v1559_v28 = vor.u32 %v1558_v26, %v1555_v25  ;;  %v784_v38 = vpack.c.bf16 %v752_v36, %v752_v36  ;;  %v7536_v51 = vld [vmem:[#allocation2 + $0x30] sm:$0xf0]  }
  0xea   : > { %v682_v22 = vpop.f32.mrf.mxu0  ;;  %v7489_v29 = vsel %vm1464_vm3, %v1551_v27, %v1559_v28  ;;  %820 = vst.msk [vmem:[#allocation2 + $0x38] sm:$0xf] %vm375_vm1, %v784_v38  ;;  %v1287_v28 = vunpack.c.l.b16 %v909_v20 }
  0xeb   : > { %5952 = vmatmul.msk.bf16.gmra.mxu2 %vm1373_vm4, %v7489_v29  ;;  %v683_v41 = vadd.f32 %v7341_v14, %v682_v22 }
  0xec   : > { %v1305_v43 = vpack.c.b16 %v1287_v28, %v1287_v28 }
  0xed   : > { %5874 = vmatmul.msk.bf16.gmra.mxu0 %vm609_vm0, %v6658_v21  ;;  %v753_v46 = vmax.f32 %v683_v41, 0.0 }
  0xef   : > { %v785_v56 = vpack.c.bf16 %v753_v46, %v753_v46 }
  0xf1   : > { %v7534_v50 = vld [vmem:[#allocation2 + $0x34] sm:$0xff]   ;;  %821 = vst.msk [vmem:[#allocation2 + $0x44] sm:$0xf] %vm375_vm1, %v785_v56 }
  0xf2   : > { %v684_v30 = vpop.f32.mrf.mxu0  ;;  %v987_v53 = vunpack.c.h.b16 %v7534_v50  ;;  %v1109_v63 = vshrl.u32 %v7534_v50, 16  ;;  %v1112_v0 = vshll.u32 %v7534_v50, 16  ;;  %v1328_v1 = vrot.slane %v7534_v50, 5 }
  0xf3   : > { %v685_v42 = vadd.f32 %v7341_v14, %v684_v30  ;;  %v1304_v30 = vpack.c.b16 %v1286_v18, %v1286_v18 }
  0xf4   : > { %v1111_v8 = vrot.slane %v1109_v63, 4  ;;  %v1114_v9 = vrot.slane %v1112_v0, 5  ;;  %v1330_v11 = vsel %vm1318_vm2, %v1328_v1, %v1329_v59  ;;  %v1577_v12 = vshrl.u32 %v1328_v1, 16 }
  0xf5   : > { %v754_v47 = vmax.f32 %v685_v42, 0.0  ;;  %v1580_v10 = vshll.u32 %v1328_v1, 16  ;;  %v1585_v13 = vshrl.u32 %v1330_v11, 16  ;;  %v1588_v15 = vshll.u32 %v1330_v11, 16  ;;  %v6661_v42 = vld [vmem:[%s7269_s17 + $0x70] sm:$0xff] }
  0xf6   : > { %v1115_v16 = vor.u32 %v1114_v9, %v1111_v8  ;;  %v1579_v17 = vrot.slane %v1577_v12, 3 }
  0xf7   : > { %v786_v58 = vpack.c.bf16 %v754_v47, %v754_v47  ;;  %v1582_v21 = vrot.slane %v1580_v10, 4  ;;  %v1587_v22 = vrot.slane %v1585_v13, 3  ;;  %v1590_v23 = vrot.slane %v1588_v15, 4 }
  0xf8   : > { %1234 = vrot.lane.b32.xlu1 %v1115_v16, %s7113_s24  ;;  %v7564_v36 = vld [vmem:[#allocation2 + $0x40] sm:$0xf0]  }
  0xf9   : > { %822 = vst.msk [vmem:[#allocation2 + $0x48] sm:$0xf] %vm375_vm1, %v786_v58  ;;  %v1583_v25 = vor.u32 %v1582_v21, %v1579_v17  ;;  %v1591_v26 = vor.u32 %v1590_v23, %v1587_v22 }
  0xfa   : > { %v687_v37 = vpop.f32.mrf.mxu0 }
  0xfb   : > { %v688_v44 = vadd.f32 %v7341_v14, %v687_v37  ;;  %v7560_v31 = vsel %vm1464_vm3, %v1583_v25, %v1591_v26  ;;  %v910_v25 = vld [vmem:[#allocation2 + $0x6c] sm:$0x1] }
  0xfc   : > { %5953 = vmatmul.msk.bf16.gmra.mxu2 %vm1373_vm4, %v7560_v31 }
  0xfd   : > { %5875 = vmatmul.msk.bf16.gmra.mxu0 %vm609_vm0, %v6659_v32  ;;  %v755_v49 = vmax.f32 %v688_v44, 0.0  ;;  %v1332_v44 = vrot.slane %v1304_v30, 5 }
  0xff   : > { %v787_v60 = vpack.c.bf16 %v755_v49, %v755_v49 }
 0x100   : > { %v7562_v32 = vld [vmem:[#allocation2 + $0x44] sm:$0xff]  }
 0x101   : > { %823 = vst.msk [vmem:[#allocation2 + $0x54] sm:$0xf] %vm375_vm1, %v787_v60  ;;  %v1117_v48 = vshrl.u32 %v7562_v32, 16  ;;  %v1120_v49 = vshll.u32 %v7562_v32, 16 }
 0x102   : > { %v689_v40 = vpop.f32.mrf.mxu0 }
 0x103   : > { %v690_v45 = vadd.f32 %v7341_v14, %v689_v40  ;;  %v1119_v56 = vrot.slane %v1117_v48, 4 }
 0x105   : > { %v756_v54 = vmax.f32 %v690_v45, 0.0 }
 0x107   : > { %v788_v5 = vpack.c.bf16 %v756_v54, %v756_v54 }
 0x108   : > { %v7575_v41 = vld [vmem:[#allocation2 + $0x50] sm:$0xf0]  }
 0x109   : > { %824 = vst.msk [vmem:[#allocation2 + $0x58] sm:$0xf] %vm375_vm1, %v788_v5 }
 0x10a   : > { %v692_v55 = vpop.f32.mrf.mxu0 }
 0x10b   : > { %v693_v57 = vadd.f32 %v7341_v14, %v692_v55  ;;  %v1335_v55 = vrot.slane %v1305_v43, 5  ;;  %v6675_v43 = vld [vmem:[%s9440_s3 + $0x50] sm:$0xff] }
 0x10c   : > { %2542 = vmatpush.bf16.msrb.mxu0 %v6675_v43 }
 0x10d   : > { %v757_v61 = vmax.f32 %v693_v57, 0.0  ;;  %5876 = vmatmul.msk.bf16.gmra.mxu0 %vm609_vm0, %v6660_v52  ;;  %v1331_v52 = vrot.slane %v7562_v32, 5  ;;  %v1122_v57 = vrot.slane %v1120_v49, 5 }
 0x10f   : > { %v789_v6 = vpack.c.bf16 %v757_v61, %v757_v61  ;;  %v1333_v58 = vsel %vm1318_vm2, %v1331_v52, %v1332_v44  ;;  %v1609_v59 = vshrl.u32 %v1331_v52, 16  ;;  %v1612_v60 = vshll.u32 %v1331_v52, 16  ;;  %v6684_v44 = vld [vmem:[%s9440_s3 + $0x98] sm:$0xff]  ;;  %v6662_v52 = vld [vmem:[%s7269_s17 + $0x78] sm:$0xff] }
 0x110   : > { %v7573_v40 = vld [vmem:[#allocation2 + $0x54] sm:$0xff]   ;;  %v1617_v61 = vshrl.u32 %v1333_v58, 16  ;;  %v1620_v63 = vshll.u32 %v1333_v58, 16  ;;  %v1123_v1 = vor.u32 %v1122_v57, %v1119_v56  ;;  %v6674_v57 = vld [vmem:[%s9440_s3 + $0x48] sm:$0xff]  ;;  %2195 = vmatpush.bf16.msra.mxu1 %v6684_v44 }
 0x111   : > { %825 = vst.msk [vmem:[#allocation2 + $0x64] sm:$0xf] %vm375_vm1, %v789_v6  ;;  %v993_v46 = vunpack.c.h.b16 %v7573_v40  ;;  %v1611_v5 = vrot.slane %v1609_v59, 3  ;;  %v1125_v6 = vshrl.u32 %v7573_v40, 16  ;;  %v1128_v7 = vshll.u32 %v7573_v40, 16  ;;  %2543 = vmatpush.bf16.msrb.mxu0 %v6674_v57 }
 0x112   : > { %v694_v19 = vpop.f32.mrf.mxu0  ;;  %v1614_v11 = vrot.slane %v1612_v60, 4  ;;  %v1619_v12 = vrot.slane %v1617_v61, 3  ;;  %v1622_v10 = vrot.slane %v1620_v63, 4  ;;  %v1334_v13 = vrot.slane %v7573_v40, 5  ;;  %1236 = vrot.lane.b32.xlu1 %v1123_v1, %s7113_s24  ;;  %v904_v58 = vld [vmem:[#allocation2 + $0xc] sm:$0x1] }
 0x113   : > { %v695_v24 = vadd.f32 %v7341_v14, %v694_v19  ;;  %v1127_v15 = vrot.slane %v1125_v6, 4  ;;  %v1130_v16 = vrot.slane %v1128_v7, 5  ;;  %v6683_v61 = vld [vmem:[%s9440_s3 + $0x90] sm:$0xff] }
 0x114   : > { %v1615_v19 = vor.u32 %v1614_v11, %v1611_v5  ;;  %v1623_v20 = vor.u32 %v1622_v10, %v1619_v12  ;;  %v1336_v23 = vsel %vm1318_vm2, %v1334_v13, %v1335_v55  ;;  %v1641_v30 = vshrl.u32 %v1334_v13, 16  ;;  %v7614_v55 = vld [vmem:[#allocation2] sm:$0xf0]   ;;  %2196 = vmatpush.bf16.msra.mxu1 %v6683_v61 }
 0x115   : > { %v758_v27 = vmax.f32 %v695_v24, 0.0  ;;  %v1131_v21 = vor.u32 %v1130_v16, %v1127_v15  ;;  %v1649_v39 = vshrl.u32 %v1336_v23, 16  ;;  %v1282_v12 = vunpack.c.l.b16 %v904_v58  ;;  %v6673_v10 = vld [vmem:[%s9440_s3 + $0x40] sm:$0xff]  ;;  %v6682_v16 = vld [vmem:[%s9440_s3 + $0x88] sm:$0xff] }
 0x116   : > { %v7596_v22 = vsel %vm1464_vm3, %v1615_v19, %v1623_v20  ;;  %v1643_v63 = vrot.slane %v1641_v30, 3  ;;  %2544 = vmatpush.bf16.msrb.mxu0 %v6673_v10 }
 0x117   : > { %v790_v37 = vpack.c.bf16 %v758_v27, %v758_v27  ;;  %1238 = vrot.lane.b32.xlu2 %v1131_v21, %s7113_s24  ;;  %5954 = vmatmul.msk.bf16.gmra.mxu2 %vm1373_vm4, %v7596_v22  ;;  %v1651_v6 = vrot.slane %v1649_v39, 3  ;;  %v1300_v15 = vpack.c.b16 %v1282_v12, %v1282_v12  ;;  %v6681_v12 = vld [vmem:[%s9440_s3 + $0x80] sm:$0xff] }
 0x118   : > { %v7589_v9 = vld [vmem:[#allocation2 + $0x60] sm:$0xf0]   ;;  %2197 = vmatpush.bf16.msra.mxu1 %v6682_v16 }
 0x119   : > { %826 = vst.msk [vmem:[#allocation2 + $0x68] sm:$0xf] %vm375_vm1, %v790_v37  ;;  %v1644_v37 = vshll.u32 %v1334_v13, 16 }
 0x11a   : > { %v697_v45 = vpop.f32.mrf.mxu0 }
 0x11b   : > { %v698_v47 = vadd.f32 %v7341_v14, %v697_v45  ;;  %v1652_v45 = vshll.u32 %v1336_v23, 16 }
 0x11c   : > { %2198 = vmatpush.bf16.msra.mxu1 %v6681_v12 }
 0x11d   : > { %v759_v54 = vmax.f32 %v698_v47, 0.0  ;;  %5877 = vmatmul.msk.bf16.gmra.mxu0 %vm609_vm0, %v6661_v42  ;;  %v1288_v42 = vunpack.c.l.b16 %v910_v25  ;;  %v1654_v7 = vrot.slane %v1652_v45, 4 }
 0x11f   : > { %v791_v0 = vpack.c.bf16 %v759_v54, %v759_v54  ;;  %v7612_v54 = vld [vmem:[#allocation2 + $0x4] sm:$0xff]   ;;  %v1306_v1 = vpack.c.b16 %v1288_v42, %v1288_v42  ;;  %v1655_v21 = vor.u32 %v1654_v7, %v1651_v6 }
 0x120   : > { %v7587_v8 = vld [vmem:[#allocation2 + $0x64] sm:$0xff]   ;;  %v1319_v19 = vrot.slane %v7612_v54, 5 }
 0x121   : > { %827 = vst.msk [vmem:[#allocation2 + $0x74] sm:$0xf] %vm375_vm1, %v791_v0  ;;  %v996_v18 = vunpack.c.h.b16 %v7587_v8  ;;  %v1133_v27 = vshrl.u32 %v7587_v8, 16  ;;  %v1136_v28 = vshll.u32 %v7587_v8, 16  ;;  %v1646_v0 = vrot.slane %v1644_v37, 4 }
 0x122   : > { %v699_v17 = vpop.f32.mrf.mxu0  ;;  %v1337_v23 = vrot.slane %v7587_v8, 5  ;;  %v1484_v30 = vshll.u32 %v1319_v19, 16 }
 0x123   : > { %v700_v24 = vadd.f32 %v7341_v14, %v699_v17  ;;  %v1135_v48 = vrot.slane %v1133_v27, 4  ;;  %v1138_v49 = vrot.slane %v1136_v28, 5  ;;  %v1338_v17 = vrot.slane %v1306_v1, 5 }
 0x124   : > { %v1647_v20 = vor.u32 %v1646_v0, %v1643_v63  ;;  %v1481_v28 = vshrl.u32 %v1319_v19, 16  ;;  %v1486_v44 = vrot.slane %v1484_v30, 4  ;;  %v1676_v1 = vshll.u32 %v1337_v23, 16 }
 0x125   : > { %v760_v26 = vmax.f32 %v700_v24, 0.0  ;;  %v1139_v60 = vor.u32 %v1138_v49, %v1135_v48  ;;  %v1320_v24 = vrot.slane %v1300_v15, 5  ;;  %v1339_v49 = vsel %vm1318_vm2, %v1337_v23, %v1338_v17 }
 0x126   : > { %v1483_v43 = vrot.slane %v1481_v28, 3  ;;  %v7644_v48 = vsel %vm1464_vm3, %v1647_v20, %v1655_v21  ;;  %v1681_v6 = vshrl.u32 %v1339_v49, 16  ;;  %v1684_v7 = vshll.u32 %v1339_v49, 16 }
 0x127   : > { %v792_v47 = vpack.c.bf16 %v760_v26, %v760_v26  ;;  %1240 = vrot.lane.b32.xlu2 %v1139_v60, %s7113_s24  ;;  %v1321_v42 = vsel %vm1318_vm2, %v1319_v19, %v1320_v24  ;;  %v1673_v60 = vshrl.u32 %v1337_v23, 16  ;;  %5955 = vmatmul.msk.bf16.gmra.mxu2 %vm1373_vm4, %v7644_v48  ;;  %v6680_v19 = vld [vmem:[%s9440_s3 + $0x78] sm:$0xff]  ;;  %v1678_v24 = vrot.slane %v1676_v1, 4 }
 0x128   : > { %v7638_v27 = vld [vmem:[#allocation2 + $0x70] sm:$0xf0]   ;;  %v1489_v45 = vshrl.u32 %v1321_v42, 16  ;;  %v1686_v28 = vrot.slane %v1684_v7, 4  ;;  %2199 = vmatpush.bf16.msra.mxu1 %v6680_v19 }
 0x129   : > { %828 = vst.msk [vmem:[#allocation2 + $0x78] sm:$0xf] %vm375_vm1, %v792_v47  ;;  %v1492_v47 = vshll.u32 %v1321_v42, 16  ;;  %v1675_v23 = vrot.slane %v1673_v60, 3  ;;  %v6679_v42 = vld [vmem:[%s9440_s3 + $0x70] sm:$0xff] }
 0x12a   : > { %v702_v56 = vpop.f32.mrf.mxu0  ;;  %v1491_v57 = vrot.slane %v1489_v45, 3 }
 0x12b   : > { %v703_v59 = vadd.f32 %v7341_v14, %v702_v56  ;;  %v1487_v56 = vor.u32 %v1486_v44, %v1483_v43  ;;  %v1494_v58 = vrot.slane %v1492_v47, 4  ;;  %v1679_v44 = vor.u32 %v1678_v24, %v1675_v23  ;;  %v6677_v23 = vld [vmem:[%s9440_s3 + $0x60] sm:$0xff] }
 0x12c   : > { %2200 = vmatpush.bf16.msra.mxu1 %v6679_v42 }
 0x12d   : > { %v761_v11 = vmax.f32 %v703_v59, 0.0  ;;  %5878 = vmatmul.msk.bf16.gmra.mxu0 %vm609_vm0, %v6662_v52  ;;  %v911_v59 = vld [vmem:[#allocation2 + $0x7c] sm:$0x1] }
 0x12e   : > { %v1289_v15 = vunpack.c.l.b16 %v911_v59  ;;  %v6678_v59 = vld [vmem:[%s9440_s3 + $0x68] sm:$0xff] }
 0x12f   : > { %v793_v13 = vpack.c.bf16 %v761_v11, %v761_v11  ;;  %v1495_v11 = vor.u32 %v1494_v58, %v1491_v57 }
 0x130   : > { %v7636_v26 = vld [vmem:[#allocation2 + $0x74] sm:$0xff]   ;;  %2201 = vmatpush.bf16.msra.mxu1 %v6678_v59 }
 0x131   : > { %829 = vst.msk [vmem:[#allocation2 + $0x84] sm:$0xf] %vm375_vm1, %v793_v13  ;;  %v1141_v63 = vshrl.u32 %v7636_v26, 16  ;;  %v1144_v0 = vshll.u32 %v7636_v26, 16  ;;  %v1496_v17 = vsel %vm1464_vm3, %v1487_v56, %v1495_v11  ;;  %v912_v11 = vld [vmem:[#allocation2 + $0x8c] sm:$0x1] }
 0x132   : > { %v704_v25 = vpop.f32.mrf.mxu0 }
 0x133   : > { %v705_v37 = vadd.f32 %v7341_v14, %v704_v25  ;;  %v1143_v10 = vrot.slane %v1141_v63, 4  ;;  %v1146_v13 = vrot.slane %v1144_v0, 5  ;;  %v1683_v25 = vrot.slane %v1681_v6, 3  ;;  %v6889_v63 = vld [vmem:[#allocation2 + $0x10] sm:$0x8] }
 0x134   : > { %2202 = vmatpush.bf16.msra.mxu1 %v6677_v23 }
 0x135   : > { %v762_v52 = vmax.f32 %v705_v37, 0.0  ;;  %v1147_v21 = vor.u32 %v1146_v13, %v1143_v10  ;;  %v1307_v37 = vpack.c.b16 %v1289_v15, %v1289_v15  ;;  %v1687_v45 = vor.u32 %v1686_v28, %v1683_v25  ;;  %v6700_v25 = vld [vmem:[%s9440_s3 + $0x118] sm:$0xff] }
 0x137   : > { %v794_v61 = vpack.c.bf16 %v762_v52, %v762_v52  ;;  %1242 = vrot.lane.b32.xlu0 %v1147_v21, %s7113_s24  ;;  %v1340_v52 = vrot.slane %v7636_v26, 5  ;;  %v1341_v56 = vrot.slane %v1307_v37, 5  ;;  %v6696_v21 = vld [vmem:[%s9440_s3 + $0xf8] sm:$0xff] }
 0x138   : > { %v7667_v49 = vld [vmem:[#allocation2 + $0x80] sm:$0xf0]   ;;  %2759 = vmatpush.bf16.msrb.mxu2 %v6696_v21  ;;  %2852 = vmatpush.bf16.msrb.mxu1 %v6700_v25 }
 0x139   : > { %830 = vst.msk [vmem:[#allocation2 + $0x88] sm:$0xf] %vm375_vm1, %v794_v61  ;;  %v7677_v61 = vsel %vm1464_vm3, %v1679_v44, %v1687_v45  ;;  %v1342_v0 = vsel %vm1318_vm2, %v1340_v52, %v1341_v56  ;;  %v1705_v12 = vshrl.u32 %v1340_v52, 16  ;;  %v1708_v10 = vshll.u32 %v1340_v52, 16 }
 0x13a   : > { %v707_v16 = vpop.f32.mrf.mxu0  ;;  %5956 = vmatmul.msk.bf16.gmra.mxu2 %vm1373_vm4, %v7677_v61  ;;  %v1716_v19 = vshll.u32 %v1342_v0, 16  ;;  %v6890_v52 = vor.u32 %v7403_v34, %v6889_v63 }
 0x13b   : > { %v708_v20 = vadd.f32 %v7341_v14, %v707_v16  ;;  %v1707_v28 = vrot.slane %v1705_v12, 3 }
 0x13c   : > { %v1718_v45 = vrot.slane %v1716_v19, 4 }
 0x13d   : > { %v763_v30 = vmax.f32 %v708_v20, 0.0  ;;  %6015 = vmatmul.msk.bf16.vlgmr.msrb.gmra.mxu0 %vm1373_vm4, %v1496_v17  ;;  %v1713_v17 = vshrl.u32 %v1342_v0, 16  ;;  %v1290_v20 = vunpack.c.l.b16 %v912_v11 }
 0x13f   : > { %v795_v43 = vpack.c.bf16 %v763_v30, %v763_v30  ;;  %v1710_v30 = vrot.slane %v1708_v10, 4  ;;  %v1715_v44 = vrot.slane %v1713_v17, 3  ;;  %v1308_v56 = vpack.c.b16 %v1290_v20, %v1290_v20 }
 0x140   : > { %v7665_v47 = vld [vmem:[#allocation2 + $0x84] sm:$0xff]  }
 0x141   : > { %831 = vst.msk [vmem:[#allocation2 + $0x94] sm:$0xf] %vm375_vm1, %v795_v43  ;;  %v1149_v6 = vshrl.u32 %v7665_v47, 16  ;;  %v1152_v7 = vshll.u32 %v7665_v47, 16  ;;  %v1033_v43 = vpack.c.b16 %v981_v35, %v981_v35  ;;  %v1719_v11 = vor.u32 %v1718_v45, %v1715_v44 }
 0x142   : > { %v709_v58 = vpop.f32.mrf.mxu0  ;;  %v1343_v10 = vrot.slane %v7665_v47, 5  ;;  %v1344_v34 = vrot.slane %v1308_v56, 5 }
 0x143   : > { %v710_v60 = vadd.f32 %v7341_v14, %v709_v58  ;;  %v1151_v15 = vrot.slane %v1149_v6, 4  ;;  %v1154_v16 = vrot.slane %v1152_v7, 5 }
 0x144   : > { %v1740_v44 = vshll.u32 %v1343_v10, 16 }
 0x145   : > { %v764_v1 = vmax.f32 %v710_v60, 0.0  ;;  %v1155_v24 = vor.u32 %v1154_v16, %v1151_v15  ;;  %v1711_v60 = vor.u32 %v1710_v30, %v1707_v28  ;;  %v6893_v28 = vld [vmem:[#allocation2 + $0x20] sm:$0x8] }
 0x147   : > { %v796_v13 = vpack.c.bf16 %v764_v1, %v764_v1  ;;  %1244 = vrot.lane.b32.xlu1 %v1155_v24, %s7113_s24  ;;  %v1345_v24 = vsel %vm1318_vm2, %v1343_v10, %v1344_v34  ;;  %v7714_v30 = vsel %vm1464_vm3, %v1711_v60, %v1719_v11 }
 0x148   : > { %v1748_v60 = vshll.u32 %v1345_v24, 16 }
 0x149   : > { %832 = vst.msk [vmem:[#allocation2 + $0x98] sm:$0xf] %vm375_vm1, %v796_v13  ;;  %v1231_v59 = vpop.permute.xlu0 %1230  ;;  %v7707_v13 = vld [vmem:[#allocation2 + $0x90] sm:$0xf0]  }
 0x14a   : > { %v712_v37 = vpop.f32.mrf.mxu0  ;;  %v1381_v0 = vsel %vm1373_vm4, %v6890_v52, %v1231_v59  ;;  %v1383_v1 = vsel %vm1373_vm4, %v1033_v43, %v1231_v59  ;;  %v913_v43 = vld [vmem:[#allocation2 + $0x9c] sm:$0x1]  ;;  %5957 = vmatmul.msk.bf16.gmra.mxu2 %vm1373_vm4, %v7714_v30 }
 0x14b   : > { %v713_v42 = vadd.f32 %v7341_v14, %v712_v37  ;;  %v1497_v33 = vshrl.u32 %v1381_v0, 16  ;;  %v1500_v7 = vshll.u32 %v1381_v0, 16  ;;  %v1504_v35 = vshrl.u32 %v1383_v1, 16 }
 0x14c   : > { %v1507_v12 = vshll.u32 %v1383_v1, 16  ;;  %v1737_v37 = vshrl.u32 %v1343_v10, 16  ;;  %v6894_v10 = vor.u32 %v7454_v3, %v6893_v28 }
 0x14d   : > { %v765_v58 = vmax.f32 %v713_v42, 0.0  ;;  %6016 = vmatmul.msk.bf16.gmra.mxu0 %vm1373_vm4, %v7442_v62  ;;  %v1499_v62 = vrot.slane %v1497_v33, 3  ;;  %v1502_v15 = vrot.slane %v1500_v7, 4  ;;  %v1506_v16 = vrot.slane %v1504_v35, 3 }
 0x14e   : > { %v1509_v17 = vrot.slane %v1507_v12, 4  ;;  %v1739_v33 = vrot.slane %v1737_v37, 3  ;;  %v1742_v7 = vrot.slane %v1740_v44, 4 }
 0x14f   : > { %v797_v6 = vpack.c.bf16 %v765_v58, %v765_v58  ;;  %v1503_v23 = vor.u32 %v1502_v15, %v1499_v62  ;;  %v1745_v58 = vshrl.u32 %v1345_v24, 16  ;;  %v1750_v62 = vrot.slane %v1748_v60, 4 }
 0x150   : > { %v7705_v63 = vld [vmem:[#allocation2 + $0x94] sm:$0xff]   ;;  %v1510_v25 = vor.u32 %v1509_v17, %v1506_v16  ;;  %v1035_v15 = vpack.c.b16 %v984_v4, %v984_v4 }
 0x151   : > { %833 = vst.msk [vmem:[#allocation2 + $0xa4] sm:$0xf] %vm375_vm1, %v797_v6  ;;  %v1157_v52 = vshrl.u32 %v7705_v63, 16  ;;  %v1160_v56 = vshll.u32 %v7705_v63, 16  ;;  %v1291_v6 = vunpack.c.l.b16 %v913_v43  ;;  %v1747_v34 = vrot.slane %v1745_v58, 3 }
 0x152   : > { %v714_v19 = vpop.f32.mrf.mxu0  ;;  %v7717_v45 = vsel %vm1464_vm3, %v1503_v23, %v1510_v25  ;;  %v1346_v2 = vrot.slane %v7705_v63, 5 }
 0x153   : > { %v715_v21 = vadd.f32 %v7341_v14, %v714_v19  ;;  %2203 = vmatmul.bf16.vlgmr.msra.gmra.mxu1 %v7717_v45  ;;  %v1159_v0 = vrot.slane %v1157_v52, 4  ;;  %v1162_v1 = vrot.slane %v1160_v56, 5  ;;  %v1309_v16 = vpack.c.b16 %v1291_v6, %v1291_v6  ;;  %v7745_v6 = vld [vmem:[%s9439_s2] ss:$0 sm:$0xff] }
 0x154   : > { %v1751_v37 = vor.u32 %v1750_v62, %v1747_v34 }
 0x155   : > { %v766_v42 = vmax.f32 %v715_v21, 0.0  ;;  %v1163_v11 = vor.u32 %v1162_v1, %v1159_v0  ;;  %v1743_v21 = vor.u32 %v1742_v7, %v1739_v33  ;;  %v1347_v4 = vrot.slane %v1309_v16, 5 }
 0x156   : > { %v1769_v16 = vshrl.u32 %v1346_v2, 16 }
 0x157   : > { %v798_v59 = vpack.c.bf16 %v766_v42, %v766_v42  ;;  %1246 = vrot.lane.b32.xlu2 %v1163_v11, %s7113_s24  ;;  %v7749_v11 = vsel %vm1464_vm3, %v1743_v21, %v1751_v37 }
 0x158   : > { %v7738_v44 = vld [vmem:[#allocation2 + $0xa0] sm:$0xf0]  }
 0x159   : > { %834 = vst.msk [vmem:[#allocation2 + $0xa8] sm:$0xf] %vm375_vm1, %v798_v59  ;;  %v1233_v19 = vpop.permute.xlu0 %1232 }
 0x15a   : > { %v717_v35 = vpop.f32.mrf.mxu0  ;;  %v1386_v23 = vsel %vm1373_vm4, %v6894_v10, %v1233_v19  ;;  %5958 = vmatmul.msk.bf16.gmra.mxu2 %vm1373_vm4, %v7749_v11 }
 0x15b   : > { %v718_v12 = vadd.f32 %v7341_v14, %v717_v35  ;;  %v1388_v14 = vsel %vm1373_vm4, %v1035_v15, %v1233_v19  ;;  %v1529_v24 = vshrl.u32 %v1386_v23, 16  ;;  %v1532_v25 = vshll.u32 %v1386_v23, 16  ;;  %v914_v35 = vld [vmem:[#allocation2 + $0xac] sm:$0x1] }
 0x15c   : > { %v1536_v28 = vshrl.u32 %v1388_v14, 16  ;;  %v1539_v42 = vshll.u32 %v1388_v14, 16  ;;  %v1292_v23 = vunpack.c.l.b16 %v914_v35 }
 0x15d   : > { %v767_v17 = vmax.f32 %v718_v12, 0.0  ;;  %6017 = vmatmul.msk.bf16.gmra.mxu0 %vm1373_vm4, %v7489_v29  ;;  %v1531_v52 = vrot.slane %v1529_v24, 3  ;;  %v1534_v56 = vrot.slane %v1532_v25, 4  ;;  %v1348_v12 = vsel %vm1318_vm2, %v1346_v2, %v1347_v4 }
 0x15e   : > { %v1538_v58 = vrot.slane %v1536_v28, 3  ;;  %v1541_v59 = vrot.slane %v1539_v42, 4  ;;  %v1777_v21 = vshrl.u32 %v1348_v12, 16  ;;  %v1780_v14 = vshll.u32 %v1348_v12, 16 }
 0x15f   : > { %v799_v3 = vpack.c.bf16 %v767_v17, %v767_v17  ;;  %v1535_v1 = vor.u32 %v1534_v56, %v1531_v52  ;;  %v1772_v17 = vshll.u32 %v1346_v2, 16  ;;  %v1310_v42 = vpack.c.b16 %v1292_v23, %v1292_v23 }
 0x160   : > { %v7736_v43 = vld [vmem:[#allocation2 + $0xa4] sm:$0xff]   ;;  %v1542_v7 = vor.u32 %v1541_v59, %v1538_v58  ;;  %v1771_v4 = vrot.slane %v1769_v16, 3  ;;  %v1779_v52 = vrot.slane %v1777_v21, 3  ;;  %v1782_v56 = vrot.slane %v1780_v14, 4  ;;  %v6695_v58 = vld [vmem:[%s9440_s3 + $0xf0] sm:$0xff] }
 0x161   : > { %835 = vst.msk [vmem:[#allocation2 + $0xb4] sm:$0xf] %vm375_vm1, %v799_v3  ;;  %v1165_v62 = vshrl.u32 %v7736_v43, 16  ;;  %v1168_v15 = vshll.u32 %v7736_v43, 16  ;;  %v1774_v2 = vrot.slane %v1772_v17, 4  ;;  %2760 = vmatpush.bf16.msrb.mxu2 %v6695_v58 }
 0x162   : > { %v719_v60 = vpop.f32.mrf.mxu0  ;;  %v7753_v34 = vsel %vm1464_vm3, %v1535_v1, %v1542_v7  ;;  %v1350_v7 = vrot.slane %v1310_v42, 5  ;;  %v1783_v12 = vor.u32 %v1782_v56, %v1779_v52  ;;  %v6901_v52 = vld [vmem:[#allocation2 + $0x50] sm:$0x8] }
 0x163   : > { %v720_v33 = vadd.f32 %v7745_v6, %v719_v60  ;;  %2208 = vmatmul.bf16.gmra.mxu1 %v7753_v34  ;;  %v1167_v3 = vrot.slane %v1165_v62, 4  ;;  %v1170_v24 = vrot.slane %v1168_v15, 5  ;;  %v915_v60 = vld [vmem:[#allocation2 + $0xbc] sm:$0x1]  ;;  %v1775_v35 = vor.u32 %v1774_v2, %v1771_v4 }
 0x164   : > { %v1293_v16 = vunpack.c.l.b16 %v915_v60 }
 0x165   : > { %v768_v10 = vmax.f32 %v720_v33, 0.0  ;;  %v1171_v28 = vor.u32 %v1170_v24, %v1167_v3  ;;  %v1349_v33 = vrot.slane %v7736_v43, 5  ;;  %v7780_v14 = vsel %vm1464_vm3, %v1775_v35, %v1783_v12  ;;  %v7782_v3 = vld [vmem:[#allocation2 + $0x30] sm:$0x8] }
 0x167   : > { %v800_v19 = vpack.c.bf16 %v768_v10, %v768_v10  ;;  %1248 = vrot.lane.b32.xlu0 %v1171_v28, %s7113_s24  ;;  %v1351_v23 = vsel %vm1318_vm2, %v1349_v33, %v1350_v7  ;;  %v1801_v42 = vshrl.u32 %v1349_v33, 16  ;;  %v1804_v4 = vshll.u32 %v1349_v33, 16 }
 0x168   : > { %v7771_v62 = vld [vmem:[#allocation2 + $0xb0] sm:$0xf0]   ;;  %v1809_v2 = vshrl.u32 %v1351_v23, 16  ;;  %v1812_v56 = vshll.u32 %v1351_v23, 16 }
 0x169   : > { %836 = vst.msk [vmem:[#allocation2 + $0xb8] sm:$0xf] %vm375_vm1, %v800_v19  ;;  %v7775_v19 = vpop.f32.mrf.mxu2  ;;  %v1806_v33 = vrot.slane %v1804_v4, 4  ;;  %v6902_v4 = vor.u32 %v7575_v41, %v6901_v52 }
 0x16a   : > { %v722_v25 = vpop.f32.mrf.mxu0  ;;  %5959 = vmatmul.msk.bf16.gmra.mxu2 %vm1373_vm4, %v7780_v14  ;;  %v1814_v5 = vrot.slane %v1812_v56, 4 }
 0x16b   : > { %v723_v37 = vadd.f32 %v7745_v6, %v722_v25 }
 0x16d   : > { %v769_v59 = vmax.f32 %v723_v37, 0.0  ;;  %6018 = vmatmul.msk.bf16.gmra.mxu0 %vm1373_vm4, %v7560_v31  ;;  %v1311_v37 = vpack.c.b16 %v1293_v16, %v1293_v16  ;;  %v1803_v16 = vrot.slane %v1801_v42, 3  ;;  %v1041_v42 = vpack.c.b16 %v993_v46, %v993_v46 }
 0x16f   : > { %v801_v1 = vpack.c.bf16 %v769_v59, %v769_v59  ;;  %v1353_v12 = vrot.slane %v1311_v37, 5 }
 0x170   : > { %v7769_v10 = vld [vmem:[#allocation2 + $0xb4] sm:$0xff]  }
 0x171   : > { %837 = vst.msk [vmem:[#allocation2 + $0xc4] sm:$0xf] %vm375_vm1, %v801_v1  ;;  %v1173_v25 = vshrl.u32 %v7769_v10, 16  ;;  %v1176_v28 = vshll.u32 %v7769_v10, 16  ;;  %v7786_v1 = vld [vmem:[#allocation2 + $0x60] sm:$0x8] }
 0x172   : > { %v724_v17 = vpop.f32.mrf.mxu0  ;;  %v1352_v35 = vrot.slane %v7769_v10, 5  ;;  %v6906_v50 = vor.u32 %v7589_v9, %v7786_v1 }
 0x173   : > { %v725_v21 = vadd.f32 %v7745_v6, %v724_v17  ;;  %v1175_v59 = vrot.slane %v1173_v25, 4  ;;  %v1178_v60 = vrot.slane %v1176_v28, 5  ;;  %v1037_v25 = vpack.c.b16 %v987_v53, %v987_v53 }
 0x174   : > { %v6898_v28 = vor.u32 %v7536_v51, %v7782_v3  ;;  %v1354_v37 = vsel %vm1318_vm2, %v1352_v35, %v1353_v12  ;;  %v1043_v53 = vpack.c.b16 %v996_v18, %v996_v18  ;;  %v916_v51 = vld [vmem:[#allocation2 + $0xcc] sm:$0x1]  ;;  %v1807_v3 = vor.u32 %v1806_v33, %v1803_v16 }
 0x175   : > { %v770_v24 = vmax.f32 %v725_v21, 0.0  ;;  %v1179_v7 = vor.u32 %v1178_v60, %v1175_v59  ;;  %v1811_v21 = vrot.slane %v1809_v2, 3  ;;  %v1833_v59 = vshrl.u32 %v1352_v35, 16  ;;  %v1239_v60 = vpop.permute.xlu2 %1238 }
 0x176   : > { %v1841_v12 = vshrl.u32 %v1354_v37, 16  ;;  %v1844_v40 = vshll.u32 %v1354_v37, 16  ;;  %v1294_v41 = vunpack.c.l.b16 %v916_v51  ;;  %v1401_v9 = vsel %vm1373_vm4, %v6902_v4, %v1239_v60 }
 0x177   : > { %v802_v58 = vpack.c.bf16 %v770_v24, %v770_v24  ;;  %1250 = vrot.lane.b32.xlu1 %v1179_v7, %s7113_s24  ;;  %v7794_v24 = vpop.f32.mrf.mxu2  ;;  %v1815_v2 = vor.u32 %v1814_v5, %v1811_v21  ;;  %v1836_v7 = vshll.u32 %v1352_v35, 16  ;;  %v1403_v8 = vsel %vm1373_vm4, %v1041_v42, %v1239_v60 }
 0x178   : > { %9464 = vst [vmem:[#allocation17_spill] sm:$0xff] %v7794_v24  ;;  %v7815_v46 = vld [vmem:[#allocation2 + $0xc0] sm:$0xf0]   ;;  %v1625_v5 = vshrl.u32 %v1401_v9, 16  ;;  %v1628_v52 = vshll.u32 %v1401_v9, 16  ;;  %v1632_v1 = vshrl.u32 %v1403_v8, 16 }
 0x179   : > { %838 = vst.msk [vmem:[#allocation2 + $0xc8] sm:$0xf] %vm375_vm1, %v802_v58  ;;  %v1635_v16 = vshll.u32 %v1403_v8, 16  ;;  %v7822_v33 = vsel %vm1464_vm3, %v1807_v3, %v1815_v2  ;;  %v7824_v21 = vrot.slane %v1833_v59, 3  ;;  %v7831_v4 = vrot.slane %v1836_v7, 4  ;;  %v1235_v8 = vpop.permute.xlu1 %1234 }
 0x17a   : > { %v727_v17 = vpop.f32.mrf.mxu0  ;;  %v7829_v37 = vrot.slane %v1628_v52, 4  ;;  %v1634_v42 = vrot.slane %v1632_v1, 3  ;;  %v7837_v2 = vrot.slane %v1841_v12, 3  ;;  %v7839_v59 = vrot.slane %v1844_v40, 4  ;;  %5960 = vmatmul.msk.bf16.gmra.mxu2 %vm1373_vm4, %v7822_v33  ;;  %v6694_v40 = vld [vmem:[%s9440_s3 + $0xe8] sm:$0xff] }
 0x17b   : > { %v728_v23 = vadd.f32 %v7745_v6, %v727_v17  ;;  %v1637_v51 = vrot.slane %v1635_v16, 4  ;;  %v1391_v52 = vsel %vm1373_vm4, %v6898_v28, %v1235_v8  ;;  %v1393_v7 = vsel %vm1373_vm4, %v1037_v25, %v1235_v8  ;;  %2761 = vmatpush.bf16.msrb.mxu2 %v6694_v40 }
 0x17c   : > { %v1564_v15 = vshll.u32 %v1391_v52, 16  ;;  %v1568_v18 = vshrl.u32 %v1393_v7, 16  ;;  %v1571_v0 = vshll.u32 %v1393_v7, 16 }
 0x17d   : > { %v771_v58 = vmax.f32 %v728_v23, 0.0  ;;  %6019 = vmatmul.msk.bf16.gmra.mxu0 %vm1373_vm4, %v7596_v22 }
 0x17e   : > { %v1573_v8 = vrot.slane %v1571_v0, 4 }
 0x17f   : > { %v803_v56 = vpack.c.bf16 %v771_v58, %v771_v58  ;;  %v7827_v58 = vrot.slane %v1625_v5, 3  ;;  %v1312_v5 = vpack.c.b16 %v1294_v41, %v1294_v41  ;;  %v7843_v1 = vpop.f32.mrf.mxu2  ;;  %v1638_v41 = vor.u32 %v1637_v51, %v1634_v42  ;;  %v6909_v42 = vld [vmem:[#allocation2 + $0x40] sm:$0x8] }
 0x180   : > { %v7813_v17 = vld [vmem:[#allocation2 + $0xc4] sm:$0xff]   ;;  %9465 = vst [vmem:[#allocation18_spill] sm:$0xff] %v7843_v1 }
 0x181   : > { %839 = vst.msk [vmem:[#allocation2 + $0xd4] sm:$0xf] %vm375_vm1, %v803_v56  ;;  %v1181_v60 = vshrl.u32 %v7813_v17, 16  ;;  %v1184_v9 = vshll.u32 %v7813_v17, 16  ;;  %v1631_v3 = vor.u32 %v7829_v37, %v7827_v58  ;;  %v1241_v12 = vpop.permute.xlu2 %1240 }
 0x182   : > { %v729_v35 = vpop.f32.mrf.mxu0  ;;  %v1406_v25 = vsel %vm1373_vm4, %v6906_v50, %v1241_v12  ;;  %v1408_v28 = vsel %vm1373_vm4, %v1043_v53, %v1241_v12 }
 0x183   : > { %v730_v23 = vadd.f32 %v7745_v6, %v729_v35  ;;  %v1183_v35 = vrot.slane %v1181_v60, 4  ;;  %v1186_v58 = vrot.slane %v1184_v9, 5  ;;  %v1570_v60 = vrot.slane %v1568_v18, 3 }
 0x184   : > { %v1657_v7 = vshrl.u32 %v1406_v25, 16  ;;  %v1660_v57 = vshll.u32 %v1406_v25, 16  ;;  %v1664_v20 = vshrl.u32 %v1408_v28, 16  ;;  %v1667_v39 = vshll.u32 %v1408_v28, 16 }
 0x185   : > { %v772_v56 = vmax.f32 %v730_v23, 0.0  ;;  %v1561_v23 = vshrl.u32 %v1391_v52, 16  ;;  %v1574_v24 = vor.u32 %v1573_v8, %v1570_v60  ;;  %v1355_v18 = vrot.slane %v7813_v17, 5 }
 0x186   : > { %v1659_v50 = vrot.slane %v1657_v7, 3  ;;  %v1662_v1 = vrot.slane %v1660_v57, 4  ;;  %v1666_v53 = vrot.slane %v1664_v20, 3  ;;  %v1669_v9 = vrot.slane %v1667_v39, 4  ;;  %v6699_v39 = vld [vmem:[%s9440_s3 + $0x110] sm:$0xff] }
 0x187   : > { %v804_v16 = vpack.c.bf16 %v772_v56, %v772_v56  ;;  %v1563_v37 = vrot.slane %v1561_v23, 3  ;;  %v1566_v56 = vrot.slane %v1564_v15, 4  ;;  %v1356_v23 = vrot.slane %v1312_v5, 5  ;;  %2853 = vmatpush.bf16.msrb.mxu1 %v6699_v39 }
 0x188   : > { %v1663_v12 = vor.u32 %v1662_v1, %v1659_v50  ;;  %v1839_v57 = vor.u32 %v7831_v4, %v7824_v21  ;;  %v7874_v5 = vld [vmem:[#allocation2 + $0xd0] sm:$0xf0]   ;;  %v7876_v1 = vpop.f32.mrf.mxu2  ;;  %v1868_v60 = vshll.u32 %v1355_v18, 16  ;;  %v917_v50 = vld [vmem:[#allocation2 + $0xdc] sm:$0x1] }
 0x189   : > { %840 = vst.msk [vmem:[#allocation2 + $0xd8] sm:$0xf] %vm375_vm1, %v804_v16  ;;  %v1567_v38 = vor.u32 %v1566_v56, %v1563_v37  ;;  %v1187_v16 = vor.u32 %v1186_v58, %v1183_v35  ;;  %v1670_v35 = vor.u32 %v1669_v9, %v1666_v53  ;;  %v1357_v21 = vsel %vm1318_vm2, %v1355_v18, %v1356_v23  ;;  %v1237_v58 = vpop.permute.xlu1 %1236 }
 0x18a   : > { %v732_v52 = vpop.f32.mrf.mxu0  ;;  %9466 = vst [vmem:[#allocation19_spill] sm:$0xff] %v7876_v1  ;;  %v1865_v56 = vshrl.u32 %v1355_v18, 16  ;;  %v1873_v7 = vshrl.u32 %v1357_v21, 16  ;;  %v1876_v53 = vshll.u32 %v1357_v21, 16 }
 0x18b   : > { %v733_v51 = vadd.f32 %v7745_v6, %v732_v52  ;;  %v7857_v0 = vsel %vm1464_vm3, %v1567_v38, %v1574_v24  ;;  %1252 = vrot.lane.b32.xlu2 %v1187_v16, %s7113_s24  ;;  %v1847_v38 = vor.u32 %v7839_v59, %v7837_v2  ;;  %v7870_v24 = vsel %vm1464_vm3, %v1631_v3, %v1638_v41 }
 0x18c   : > { %2213 = vmatmul.bf16.gmra.mxu1 %v7857_v0  ;;  %v7882_v2 = vsel %vm1464_vm3, %v1663_v12, %v1670_v35  ;;  %v6910_v3 = vor.u32 %v7564_v36, %v6909_v42  ;;  %v9467_v59 = vunpack.c.h.b16 %v7562_v32 }
 0x18d   : > { %6020 = vmatmul.msk.bf16.gmra.mxu0 %vm1373_vm4, %v7644_v48  ;;  %v773_v15 = vmax.f32 %v733_v51, 0.0  ;;  %v7890_v37 = vsel %vm1464_vm3, %v1839_v57, %v1847_v38 }
 0x18e   : > { %v1039_v41 = vpack.c.b16 %v9467_v59, %v9467_v59  ;;  %v1396_v8 = vsel %vm1373_vm4, %v6910_v3, %v1237_v58  ;;  %5961 = vmatmul.msk.bf16.gmra.mxu2 %vm1373_vm4, %v7890_v37 }
 0x18f   : > { %v805_v20 = vpack.c.bf16 %v773_v15, %v773_v15  ;;  %v1593_v16 = vshrl.u32 %v1396_v8, 16  ;;  %v1596_v36 = vshll.u32 %v1396_v8, 16 }
 0x190   : > { %v7872_v40 = vld [vmem:[#allocation2 + $0xd4] sm:$0xff]   ;;  %v1398_v52 = vsel %vm1373_vm4, %v1039_v41, %v1237_v58  ;;  %v7899_v59 = vpop.f32.mrf.mxu2  ;;  %v1867_v41 = vrot.slane %v1865_v56, 3 }
 0x191   : > { %841 = vst.msk [vmem:[#allocation2 + $0xe4] sm:$0xf] %vm375_vm1, %v805_v20  ;;  %v1600_v42 = vshrl.u32 %v1398_v52, 16  ;;  %v1603_v32 = vshll.u32 %v1398_v52, 16  ;;  %v1189_v15 = vshrl.u32 %v7872_v40, 16  ;;  %v1192_v23 = vshll.u32 %v7872_v40, 16 }
 0x192   : > { %v734_v4 = vpop.f32.mrf.mxu0  ;;  %v1595_v12 = vrot.slane %v1593_v16, 3  ;;  %v1598_v35 = vrot.slane %v1596_v36, 4  ;;  %v1295_v20 = vunpack.c.l.b16 %v917_v50  ;;  %9468 = vst [vmem:[#allocation20_spill] sm:$0xff] %v7899_v59  ;;  %v1870_v52 = vrot.slane %v1868_v60, 4 }
 0x193   : > { %v735_v28 = vadd.f32 %v7745_v6, %v734_v4  ;;  %v1602_v18 = vrot.slane %v1600_v42, 3  ;;  %v1605_v39 = vrot.slane %v1603_v32, 4  ;;  %v1191_v57 = vrot.slane %v1189_v15, 4 }
 0x194   : > { %v1194_v38 = vrot.slane %v1192_v23, 5  ;;  %v1599_v4 = vor.u32 %v1598_v35, %v1595_v12  ;;  %v1878_v16 = vrot.slane %v1876_v53, 4  ;;  %v1313_v42 = vpack.c.b16 %v1295_v20, %v1295_v20 }
 0x195   : > { %v774_v51 = vmax.f32 %v735_v28, 0.0  ;;  %v1606_v3 = vor.u32 %v1605_v39, %v1602_v18  ;;  %v1871_v56 = vor.u32 %v1870_v52, %v1867_v41  ;;  %v1358_v60 = vrot.slane %v7872_v40, 5  ;;  %v918_v18 = vld [vmem:[#allocation2 + $0xec] sm:$0x1] }
 0x196   : > { %v1195_v58 = vor.u32 %v1194_v38, %v1191_v57 }
 0x197   : > { %v806_v9 = vpack.c.bf16 %v774_v51, %v774_v51  ;;  %v7903_v8 = vsel %vm1464_vm3, %v1599_v4, %v1606_v3  ;;  %v1875_v51 = vrot.slane %v1873_v7, 3  ;;  %v1359_v7 = vrot.slane %v1313_v42, 5  ;;  %v6913_v3 = vld [vmem:[#allocation2 + $0x70] sm:$0x8]  ;;  %v6693_v42 = vld [vmem:[%s9440_s3 + $0xe0] sm:$0xff] }
 0x198   : > { %1254 = vrot.lane.b32.xlu0 %v1195_v58, %s7113_s24  ;;  %v7911_v15 = vld [vmem:[#allocation2 + $0xe0] sm:$0xf0]   ;;  %v7916_v12 = vpop.f32.mrf.mxu2  ;;  %v1897_v52 = vshrl.u32 %v1358_v60, 16  ;;  %2762 = vmatpush.bf16.msrb.mxu2 %v6693_v42 }
 0x199   : > { %842 = vst.msk [vmem:[#allocation2 + $0xe8] sm:$0xf] %vm375_vm1, %v806_v9  ;;  %v1879_v50 = vor.u32 %v1878_v16, %v1875_v51  ;;  %v1360_v57 = vsel %vm1318_vm2, %v1358_v60, %v1359_v7  ;;  %v1900_v51 = vshll.u32 %v1358_v60, 16  ;;  %v1085_v60 = vshrl.u32 %v7612_v54, 16 }
 0x19a   : > { %v737_v21 = vpop.f32.mrf.mxu0  ;;  %9469 = vst [vmem:[#allocation21_spill] sm:$0xff] %v7916_v12  ;;  %v1905_v16 = vshrl.u32 %v1360_v57, 16 }
 0x19b   : > { %v738_v28 = vadd.f32 %v7745_v6, %v737_v21  ;;  %v7920_v39 = vsel %vm1464_vm3, %v1871_v56, %v1879_v50  ;;  %v1296_v21 = vunpack.c.l.b16 %v918_v18  ;;  %v6917_v18 = vld [vmem:[#allocation2 + $0x90] sm:$0x8] }
 0x19c   : > { %2218 = vmatmul.bf16.gmra.mxu1 %v7903_v8 }
 0x19d   : > { %v775_v36 = vmax.f32 %v738_v28, 0.0  ;;  %6021 = vmatmul.msk.bf16.gmra.mxu0 %vm1373_vm4, %v7677_v61  ;;  %v1314_v50 = vpack.c.b16 %v1296_v21, %v1296_v21  ;;  %v6914_v21 = vor.u32 %v7638_v27, %v6913_v3 }
 0x19e   : > { %5962 = vmatmul.msk.bf16.gmra.mxu2 %vm1373_vm4, %v7920_v39 }
 0x19f   : > { %v807_v32 = vpack.c.bf16 %v775_v36, %v775_v36  ;;  %v1908_v36 = vshll.u32 %v1360_v57, 16  ;;  %v1899_v57 = vrot.slane %v1897_v52, 3  ;;  %v1362_v52 = vrot.slane %v1314_v50, 5 }
 0x1a0   : > { %v7909_v9 = vld [vmem:[#allocation2 + $0xe4] sm:$0xff]   ;;  %v7931_v7 = vpop.f32.mrf.mxu2 }
 0x1a1   : > { %843 = vst.msk [vmem:[#allocation2 + $0xf4] sm:$0xf] %vm375_vm1, %v807_v32  ;;  %v1197_v20 = vshrl.u32 %v7909_v9, 16  ;;  %v1200_v4 = vshll.u32 %v7909_v9, 16  ;;  %v7946_v53 = vrot.slane %v7909_v9, 5 }
 0x1a2   : > { %v739_v23 = vpop.f32.mrf.mxu0  ;;  %9470 = vst [vmem:[#allocation22_spill] sm:$0xff] %v7931_v7 }
 0x1a3   : > { %v740_v35 = vadd.f32 %v7745_v6, %v739_v23  ;;  %v1199_v28 = vrot.slane %v1197_v20, 4  ;;  %v1202_v58 = vrot.slane %v1200_v4, 5  ;;  %v1907_v20 = vrot.slane %v1905_v16, 3 }
 0x1a4   : > { %v1910_v4 = vrot.slane %v1908_v36, 4 }
 0x1a5   : > { %v776_v38 = vmax.f32 %v740_v35, 0.0  ;;  %v1203_v32 = vor.u32 %v1202_v58, %v1199_v28  ;;  %v1088_v35 = vshll.u32 %v7612_v54, 16  ;;  %v1087_v58 = vrot.slane %v1085_v60, 4 }
 0x1a6   : > { %v1911_v25 = vor.u32 %v1910_v4, %v1907_v20 }
 0x1a7   : > { %v808_v41 = vpack.c.bf16 %v776_v38, %v776_v38  ;;  %1256 = vrot.lane.b32.xlu1 %v1203_v32, %s7113_s24  ;;  %v1902_v38 = vrot.slane %v1900_v51, 4  ;;  %v1090_v42 = vrot.slane %v1088_v35, 5  ;;  %v9471_v32 = vunpack.c.h.b16 %v7636_v26 }
 0x1a8   : > { %v7953_v26 = vld [vmem:[#allocation2 + $0xf0] sm:$0xf0]   ;;  %v7960_v20 = vpop.f32.mrf.mxu2 }
 0x1a9   : > { %844 = vst.msk [vmem:[#allocation2 + $0xf8] sm:$0xf] %vm375_vm1, %v808_v41  ;;  %v7937_v41 = vld [vmem:[#allocation2 + $0x80] sm:$0x8]  ;;  %v1243_v16 = vpop.permute.xlu0 %1242  ;;  %v1091_v36 = vor.u32 %v1090_v42, %v1087_v58 }
 0x1aa   : > { %v742_v56 = vpop.f32.mrf.mxu0  ;;  %v1411_v12 = vsel %vm1373_vm4, %v6914_v21, %v1243_v16  ;;  %9472 = vst [vmem:[#allocation23_spill] sm:$0xff] %v7960_v20 }
 0x1ab   : > { %v743_v23 = vadd.f32 %v7745_v6, %v742_v56  ;;  %v1045_v56 = vpack.c.b16 %v9471_v32, %v9471_v32  ;;  %v1689_v60 = vshrl.u32 %v1411_v12, 16  ;;  %v1692_v35 = vshll.u32 %v1411_v12, 16 }
 0x1ac   : > { %2223 = vmatmul.bf16.gmra.mxu1 %v7870_v24 }
 0x1ad   : > { %v777_v28 = vmax.f32 %v743_v23, 0.0  ;;  %6022 = vmatmul.msk.bf16.gmra.mxu0 %vm1373_vm4, %v7714_v30  ;;  %v1903_v23 = vor.u32 %v1902_v38, %v1899_v57  ;;  %v1413_v27 = vsel %vm1373_vm4, %v1045_v56, %v1243_v16  ;;  %v6918_v57 = vor.u32 %v7707_v13, %v6917_v18 }
 0x1ae   : > { %v1696_v50 = vshrl.u32 %v1413_v27, 16  ;;  %v1699_v32 = vshll.u32 %v1413_v27, 16  ;;  %v1691_v4 = vrot.slane %v1689_v60, 3  ;;  %v1694_v21 = vrot.slane %v1692_v35, 4 }
 0x1af   : > { %v809_v51 = vpack.c.bf16 %v777_v28, %v777_v28  ;;  %v1363_v28 = vsel %vm1318_vm2, %v7946_v53, %v1362_v52  ;;  %1228 = vrot.lane.b32.xlu1 %v1091_v36, %s7113_s24  ;;  %v7964_v12 = vsel %vm1464_vm3, %v1903_v23, %v1911_v25  ;;  %v9474_v52 = vunpack.c.h.b16 %v7705_v63 }
 0x1b0   : > { %v7951_v3 = vld [vmem:[#allocation2 + $0xf4] sm:$0xff]   ;;  %v1698_v42 = vrot.slane %v1696_v50, 3  ;;  %v1701_v56 = vrot.slane %v1699_v32, 4  ;;  %9473 = vst [vmem:[#allocation24_spill] sm:$0xff] %v7964_v12  ;;  %v1695_v13 = vor.u32 %v1694_v21, %v1691_v4  ;;  %v1929_v27 = vshrl.u32 %v7946_v53, 16  ;;  %5963 = vmatmul.msk.bf16.gmra.mxu2 %vm1373_vm4, %v7964_v12 }
 0x1b1   : > { %845 = vst.msk [vmem:[#allocation2 + $0x104] sm:$0xf] %vm375_vm1, %v809_v51  ;;  %v1049_v16 = vpack.c.b16 %v9474_v52, %v9474_v52  ;;  %v1932_v60 = vshll.u32 %v7946_v53, 16  ;;  %v1937_v35 = vshrl.u32 %v1363_v28, 16  ;;  %v1247_v32 = vpop.permute.xlu2 %1246  ;;  %v1205_v36 = vshrl.u32 %v7951_v3, 16 }
 0x1b2   : > { %v744_v58 = vpop.f32.mrf.mxu0  ;;  %v1702_v18 = vor.u32 %v1701_v56, %v1698_v42  ;;  %v1208_v25 = vshll.u32 %v7951_v3, 16  ;;  %v1940_v23 = vshll.u32 %v1363_v28, 16  ;;  %v919_v4 = vld [vmem:[#allocation2 + $0xfc] sm:$0x1]  ;;  %v6922_v28 = vor.u32 %v7667_v49, %v7937_v41 }
 0x1b3   : > { %v745_v51 = vadd.f32 %v7745_v6, %v744_v58  ;;  %v1421_v6 = vsel %vm1373_vm4, %v6918_v57, %v1247_v32  ;;  %v1423_v63 = vsel %vm1373_vm4, %v1049_v16, %v1247_v32  ;;  %v1207_v52 = vrot.slane %v1205_v36, 4  ;;  %v7984_v32 = vpop.f32.mrf.mxu2 }
 0x1b4   : > { %v7977_v58 = vsel %vm1464_vm3, %v1695_v13, %v1702_v18  ;;  %v1753_v21 = vshrl.u32 %v1421_v6, 16  ;;  %v1756_v42 = vshll.u32 %v1421_v6, 16  ;;  %v1760_v56 = vshrl.u32 %v1423_v63, 16  ;;  %9475 = vst [vmem:[#allocation25_spill] sm:$0xff] %v7984_v32 }
 0x1b5   : > { %v778_v50 = vmax.f32 %v745_v51, 0.0  ;;  %v1763_v51 = vshll.u32 %v1423_v63, 16  ;;  %v1210_v38 = vrot.slane %v1208_v25, 5  ;;  %v1297_v18 = vunpack.c.l.b16 %v919_v4 }
 0x1b6   : > { %v1755_v57 = vrot.slane %v1753_v21, 3  ;;  %v1758_v16 = vrot.slane %v1756_v42, 4  ;;  %v1762_v13 = vrot.slane %v1760_v56, 3  ;;  %v1931_v20 = vrot.slane %v1929_v27, 3 }
 0x1b7   : > { %v810_v53 = vpack.c.bf16 %v778_v50, %v778_v50  ;;  %v1765_v7 = vrot.slane %v1763_v51, 4  ;;  %v1211_v50 = vor.u32 %v1210_v38, %v1207_v52  ;;  %v9476_v6 = vunpack.c.h.b16 %v7665_v47 }
 0x1b8   : > { %v1934_v36 = vrot.slane %v1932_v60, 4  ;;  %v1939_v25 = vrot.slane %v1937_v35, 3  ;;  %v1942_v59 = vrot.slane %v1940_v23, 4  ;;  %v1759_v1 = vor.u32 %v1758_v16, %v1755_v57 }
 0x1b9   : > { %846 = vst.msk [vmem:[#allocation2 + $0x108] sm:$0xf] %vm375_vm1, %v810_v53  ;;  %v1047_v63 = vpack.c.b16 %v9476_v6, %v9476_v6  ;;  %v1766_v49 = vor.u32 %v1765_v7, %v1762_v13  ;;  %1258 = vrot.lane.b32.xlu2 %v1211_v50, %s7113_s24  ;;  %v1245_v41 = vpop.permute.xlu1 %1244  ;;  %v1315_v38 = vpack.c.b16 %v1297_v18, %v1297_v18  ;;  %v1364_v16 = vrot.slane %v7951_v3, 5 }
 0x1ba   : > { %v1416_v4 = vsel %vm1373_vm4, %v6922_v28, %v1245_v41  ;;  %v1935_v23 = vor.u32 %v1934_v36, %v1931_v20  ;;  %v1943_v21 = vor.u32 %v1942_v59, %v1939_v25  ;;  %v8000_v28 = vld [vmem:[#allocation2 + $0x100] sm:$0xf0]  }
 0x1bb   : > { %v1418_v27 = vsel %vm1373_vm4, %v1047_v63, %v1245_v41  ;;  %v1721_v47 = vshrl.u32 %v1416_v4, 16  ;;  %v1724_v53 = vshll.u32 %v1416_v4, 16  ;;  %v7996_v7 = vsel %vm1464_vm3, %v1759_v1, %v1766_v49  ;;  %v8004_v50 = vpop.f32.mrf.mxu2  ;;  %v920_v49 = vld [vmem:[#allocation2 + $0x10c] sm:$0x1] }
 0x1bc   : > { %2228 = vmatmul.bf16.gmra.mxu1 %v7882_v2  ;;  %v1728_v60 = vshrl.u32 %v1418_v27, 16  ;;  %v1731_v35 = vshll.u32 %v1418_v27, 16  ;;  %v1365_v13 = vrot.slane %v1315_v38, 5  ;;  %9477 = vst [vmem:[#allocation26_spill] sm:$0xff] %v8004_v50  ;;  %v8007_v1 = vsel %vm1464_vm3, %v1935_v23, %v1943_v21  ;;  %v6692_v27 = vld [vmem:[%s9440_s3 + $0xd8] sm:$0xff] }
 0x1bd   : > { %6023 = vmatmul.msk.bf16.gmra.mxu0 %vm1373_vm4, %v7749_v11  ;;  %v1723_v42 = vrot.slane %v1721_v47, 3  ;;  %v1726_v56 = vrot.slane %v1724_v53, 4  ;;  %9478 = vst [vmem:[#allocation27_spill] sm:$0xff] %v8007_v1  ;;  %v1961_v38 = vshrl.u32 %v1364_v16, 16  ;;  %v1964_v47 = vshll.u32 %v1364_v16, 16  ;;  %2763 = vmatpush.bf16.msrb.mxu2 %v6692_v27 }
 0x1be   : > { %v1730_v51 = vrot.slane %v1728_v60, 3  ;;  %v1733_v52 = vrot.slane %v1731_v35, 4  ;;  %v1366_v63 = vsel %vm1318_vm2, %v1364_v16, %v1365_v13  ;;  %v1298_v23 = vunpack.c.l.b16 %v920_v49  ;;  %v6933_v50 = vld [vmem:[#allocation2 + $0xb0] sm:$0x8] }
 0x1bf   : > { %v1727_v20 = vor.u32 %v1726_v56, %v1723_v42  ;;  %v1969_v53 = vshrl.u32 %v1366_v63, 16  ;;  %v1972_v60 = vshll.u32 %v1366_v63, 16  ;;  %v6691_v42 = vld [vmem:[%s9440_s3 + $0xd0] sm:$0xff]  ;;  %v1963_v56 = vrot.slane %v1961_v38, 3  ;;  %v6925_v38 = vld [vmem:[#allocation2 + $0xa0] sm:$0x8] }
 0x1c0   : > { %v7998_v57 = vld [vmem:[#allocation2 + $0x104] sm:$0xff]   ;;  %v1734_v59 = vor.u32 %v1733_v52, %v1730_v51  ;;  %5964 = vmatmul.msk.bf16.gmra.mxu2 %vm1373_vm4, %v8007_v1  ;;  %v1966_v51 = vrot.slane %v1964_v47, 4  ;;  %v1316_v16 = vpack.c.b16 %v1298_v23, %v1298_v23 }
 0x1c1   : > { %v1213_v36 = vshrl.u32 %v7998_v57, 16  ;;  %v1216_v25 = vshll.u32 %v7998_v57, 16  ;;  %v1971_v52 = vrot.slane %v1969_v53, 3  ;;  %v1974_v13 = vrot.slane %v1972_v60, 4  ;;  %2764 = vmatpush.bf16.msrb.mxu2 %v6691_v42 }
 0x1c2   : > { %v8010_v6 = vsel %vm1464_vm3, %v1727_v20, %v1734_v59  ;;  %v6698_v20 = vld [vmem:[%s9440_s3 + $0x108] sm:$0xff]  ;;  %v1967_v63 = vor.u32 %v1966_v51, %v1963_v56  ;;  %v1368_v49 = vrot.slane %v1316_v16, 5  ;;  %v6926_v42 = vor.u32 %v7738_v44, %v6925_v38  ;;  %v6929_v38 = vld [vmem:[#allocation2 + $0xc0] sm:$0x8] }
 0x1c3   : > { %v1215_v41 = vrot.slane %v1213_v36, 4  ;;  %v1218_v4 = vrot.slane %v1216_v25, 5  ;;  %v8020_v21 = vpop.f32.mrf.mxu2  ;;  %v6690_v59 = vld [vmem:[%s9440_s3 + $0xc8] sm:$0xff]  ;;  %v1975_v36 = vor.u32 %v1974_v13, %v1971_v52  ;;  %2854 = vmatpush.bf16.msrb.mxu1 %v6698_v20  ;;  %v1367_v25 = vrot.slane %v7998_v57, 5 }
 0x1c4   : > { %9479 = vst [vmem:[#allocation28_spill] sm:$0xff] %v8020_v21  ;;  %v9481_v56 = vunpack.c.h.b16 %v7736_v43 }
 0x1c5   : > { %v1219_v35 = vor.u32 %v1218_v4, %v1215_v41  ;;  %2765 = vmatpush.bf16.msrb.mxu2 %v6690_v59  ;;  %v6689_v41 = vld [vmem:[%s9440_s3 + $0xc0] sm:$0xff]  ;;  %v8042_v27 = vsel %vm1464_vm3, %v1967_v63, %v1975_v36  ;;  %v1369_v47 = vsel %vm1318_vm2, %v1367_v25, %v1368_v49  ;;  %v2033_v53 = vshrl.u32 %v1367_v25, 16 }
 0x1c6   : > { %v2036_v60 = vshll.u32 %v1367_v25, 16  ;;  %v2044_v23 = vshll.u32 %v1369_v47, 16  ;;  %v1051_v51 = vpack.c.b16 %v9481_v56, %v9481_v56 }
 0x1c7   : > { %1260 = vrot.lane.b32.xlu0 %v1219_v35, %s7113_s24  ;;  %v2041_v35 = vshrl.u32 %v1369_v47, 16  ;;  %v2035_v52 = vrot.slane %v2033_v53, 3 }
 0x1c8   : > { %v2038_v13 = vrot.slane %v2036_v60, 4  ;;  %v2046_v20 = vrot.slane %v2044_v23, 4 }
 0x1c9   : > { %2766 = vmatpush.bf16.msrb.mxu2 %v6689_v41  ;;  %v2043_v16 = vrot.slane %v2041_v35, 3 }
 0x1ca   : > { %v2039_v47 = vor.u32 %v2038_v13, %v2035_v52  ;;  %v6930_v52 = vor.u32 %v7815_v46, %v6929_v38  ;;  %v9484_v13 = vunpack.c.h.b16 %v7813_v17  ;;  %v6934_v46 = vor.u32 %v7771_v62, %v6933_v50 }
 0x1cb   : > { %v8039_v4 = vpop.f32.mrf.mxu2  ;;  %v2047_v53 = vor.u32 %v2046_v20, %v2043_v16  ;;  %v9486_v17 = vunpack.c.h.b16 %v7769_v10 }
 0x1cc   : > { %2233 = vmatmul.bf16.gmra.mxu1 %v7977_v58  ;;  %9480 = vst [vmem:[#allocation29_spill] sm:$0xff] %v8039_v4  ;;  %v1055_v16 = vpack.c.b16 %v9484_v13, %v9484_v13 }
 0x1cd   : > { %6024 = vmatmul.msk.bf16.gmra.mxu0 %vm1373_vm4, %v7780_v14 }
 0x1d0   : > { %5965 = vmatmul.msk.bf16.gmra.mxu2 %vm1373_vm4, %v8042_v27  ;;  %v8058_v18 = vpop.f32.mrf.mxu1 }
 0x1d3   : > { %v8053_v59 = vpop.f32.mrf.mxu2 }
 0x1d4   : > { %9482 = vst [vmem:[#allocation30_spill] sm:$0xff] %v8053_v59 }
 0x1d9   : > { %v1249_v63 = vpop.permute.xlu0 %1248 }
 0x1da   : > { %v1426_v36 = vsel %vm1373_vm4, %v6926_v42, %v1249_v63  ;;  %v1428_v44 = vsel %vm1373_vm4, %v1051_v51, %v1249_v63  ;;  %v8061_v42 = vsel %vm1464_vm3, %v2039_v47, %v2047_v53  ;;  %v8066_v63 = vpop.f32.mrf.mxu0 }
 0x1db   : > { %v1785_v25 = vshrl.u32 %v1426_v36, 16  ;;  %v1788_v43 = vshll.u32 %v1426_v36, 16  ;;  %v1792_v49 = vshrl.u32 %v1428_v44, 16  ;;  %v1795_v41 = vshll.u32 %v1428_v44, 16  ;;  %9483 = vst [vmem:[#allocation31_spill] sm:$0xff] %v8061_v42  ;;  %v8072_v20 = vpop.f32.mrf.mxu2 }
 0x1dc   : > { %2238 = vmatmul.bf16.gmra.mxu1 %v8010_v6  ;;  %9485 = vst [vmem:[#allocation32_spill] sm:$0xff] %v8072_v20 }
 0x1dd   : > { %6025 = vmatmul.msk.bf16.gmra.mxu0 %vm1373_vm4, %v7822_v33  ;;  %v1787_v60 = vrot.slane %v1785_v25, 3  ;;  %v1790_v35 = vrot.slane %v1788_v43, 4  ;;  %v1794_v23 = vrot.slane %v1792_v49, 3  ;;  %v1797_v56 = vrot.slane %v1795_v41, 4 }
 0x1de   : > { %v1053_v41 = vpack.c.b16 %v9486_v17, %v9486_v17 }
 0x1df   : > { %v1791_v59 = vor.u32 %v1790_v35, %v1787_v60  ;;  %v1798_v4 = vor.u32 %v1797_v56, %v1794_v23  ;;  %v8084_v23 = vpop.f32.mrf.mxu1 }
 0x1e0   : > { %5966 = vmatmul.msk.bf16.gmra.mxu2 %vm1373_vm4, %v8061_v42 }
 0x1e1   : > { %v8064_v51 = vsel %vm1464_vm3, %v1791_v59, %v1798_v4 }
 0x1e3   : > { %v8094_v17 = vpop.f32.mrf.mxu2 }
 0x1e4   : > { %9487 = vst [vmem:[#allocation33_spill] sm:$0xff] %v8094_v17 }
 0x1e5   : > { %v1253_v36 = vpop.permute.xlu2 %1252 }
 0x1e6   : > { %v1436_v44 = vsel %vm1373_vm4, %v6930_v52, %v1253_v36  ;;  %v1438_v25 = vsel %vm1373_vm4, %v1055_v16, %v1253_v36 }
 0x1e7   : > { %v1849_v4 = vshrl.u32 %v1436_v44, 16  ;;  %v1852_v59 = vshll.u32 %v1436_v44, 16  ;;  %v1856_v43 = vshrl.u32 %v1438_v25, 16  ;;  %v1859_v49 = vshll.u32 %v1438_v25, 16  ;;  %v8092_v25 = vpop.f32.mrf.mxu0 }
 0x1e9   : > { %v1851_v38 = vrot.slane %v1849_v4, 3  ;;  %v1854_v47 = vrot.slane %v1852_v59, 4  ;;  %v1858_v53 = vrot.slane %v1856_v43, 3  ;;  %v1861_v60 = vrot.slane %v1859_v49, 4  ;;  %v1251_v35 = vpop.permute.xlu1 %1250 }
 0x1ea   : > { %v1431_v13 = vsel %vm1373_vm4, %v6934_v46, %v1251_v35  ;;  %v1433_v62 = vsel %vm1373_vm4, %v1053_v41, %v1251_v35 }
 0x1eb   : > { %v1855_v56 = vor.u32 %v1854_v47, %v1851_v38  ;;  %v1862_v52 = vor.u32 %v1861_v60, %v1858_v53  ;;  %v1817_v10 = vshrl.u32 %v1431_v13, 16  ;;  %v1820_v50 = vshll.u32 %v1431_v13, 16  ;;  %v8100_v47 = vpop.f32.mrf.mxu1  ;;  %v8104_v60 = vpop.f32.mrf.mxu2 }
 0x1ec   : > { %2243 = vmatmul.bf16.gmra.mxu1 %v7996_v7  ;;  %v1824_v16 = vshrl.u32 %v1433_v62, 16  ;;  %v1827_v36 = vshll.u32 %v1433_v62, 16  ;;  %9488 = vst [vmem:[#allocation34_spill] sm:$0xff] %v8104_v60  ;;  %v6937_v62 = vld [vmem:[#allocation2 + $0xd0] sm:$0x8] }
 0x1ed   : > { %6026 = vmatmul.msk.bf16.gmra.mxu0 %vm1373_vm4, %v7890_v37  ;;  %v8090_v44 = vsel %vm1464_vm3, %v1855_v56, %v1862_v52  ;;  %v1819_v4 = vrot.slane %v1817_v10, 3  ;;  %v1822_v59 = vrot.slane %v1820_v50, 4  ;;  %v6672_v52 = vld [vmem:[%s9440_s3 + $0x38] sm:$0xff]  ;;  %v6671_v50 = vld [vmem:[%s9440_s3 + $0x30] sm:$0xff] }
 0x1ee   : > { %v1826_v43 = vrot.slane %v1824_v16, 3  ;;  %v1829_v49 = vrot.slane %v1827_v36, 4  ;;  %2448 = vmatpush.bf16.msra.mxu3 %v6672_v52  ;;  %v6938_v16 = vor.u32 %v7874_v5, %v6937_v62  ;;  %v9490_v36 = vunpack.c.h.b16 %v7872_v40 }
 0x1ef   : > { %v1823_v46 = vor.u32 %v1822_v59, %v1819_v4  ;;  %v8102_v53 = vpop.f32.mrf.mxu0 }
 0x1f0   : > { %v1830_v38 = vor.u32 %v1829_v49, %v1826_v43  ;;  %2767 = vmatmul.bf16.vlgmr.msrb.gmra.mxu2 %v7753_v34  ;;  %v1057_v4 = vpack.c.b16 %v9490_v36, %v9490_v36  ;;  %v6941_v49 = vld [vmem:[#allocation2 + $0xf0] sm:$0x8] }
 0x1f2   : > { %v8097_v41 = vsel %vm1464_vm3, %v1823_v46, %v1830_v38  ;;  %2449 = vmatpush.bf16.msra.mxu3 %v6671_v50  ;;  %v6697_v46 = vld [vmem:[%s9440_s3 + $0x100] sm:$0xff]  ;;  %v6670_v38 = vld [vmem:[%s9440_s3 + $0x28] sm:$0xff] }
 0x1f3   : > { %v8109_v35 = vpop.f32.mrf.mxu1  ;;  %v8116_v13 = vpop.f32.mrf.mxu2  ;;  %2855 = vmatpush.bf16.msrb.mxu1 %v6697_v46 }
 0x1f4   : > { %9489 = vst [vmem:[#allocation35_spill] sm:$0xff] %v8116_v13 }
 0x1f6   : > { %2450 = vmatpush.bf16.msra.mxu3 %v6670_v38 }
 0x1f7   : > { %v8111_v56 = vpop.f32.mrf.mxu0 }
 0x1fb   : > { %v8139_v5 = vpop.f32.mrf.mxu2 }
 0x1fc   : > { %2248 = vmatmul.bf16.gmra.mxu1 %v8064_v51  ;;  %9491 = vst [vmem:[#allocation36_spill] sm:$0xff] %v8139_v5  ;;  %v6945_v5 = vld [vmem:[#allocation2 + $0xe0] sm:$0x8] }
 0x1fd   : > { %6027 = vmatmul.msk.bf16.gmra.mxu0 %vm1373_vm4, %v7920_v39 }
 0x1ff   : > { %v8130_v59 = vpop.f32.mrf.mxu0 }
 0x200   : > { %2772 = vmatmul.bf16.gmra.mxu2 %v7857_v0 }
 0x209   : > { %v8119_v10 = vpop.f32.mrf.mxu1 }
 0x20a   : > { %v1255_v43 = vpop.permute.xlu0 %1254 }
 0x20b   : > { %v1441_v40 = vsel %vm1373_vm4, %v6938_v16, %v1255_v43  ;;  %v1443_v52 = vsel %vm1373_vm4, %v1057_v4, %v1255_v43  ;;  %v6669_v16 = vld [vmem:[%s9440_s3 + $0x20] sm:$0xff]  ;;  %v6942_v4 = vor.u32 %v7953_v26, %v6941_v49  ;;  %v9492_v43 = vunpack.c.h.b16 %v7951_v3  ;;  %v8161_v26 = vpop.f32.mrf.mxu0 }
 0x20c   : > { %2253 = vmatmul.bf16.gmra.mxu1 %v8097_v41  ;;  %v1881_v62 = vshrl.u32 %v1441_v40, 16  ;;  %v1884_v36 = vshll.u32 %v1441_v40, 16  ;;  %v1888_v13 = vshrl.u32 %v1443_v52, 16  ;;  %v1891_v60 = vshll.u32 %v1443_v52, 16  ;;  %2451 = vmatpush.bf16.msra.mxu3 %v6669_v16  ;;  %v8163_v52 = vpop.f32.mrf.mxu2 }
 0x20d   : > { %6028 = vmatmul.msk.bf16.gmra.mxu0 %vm1373_vm4, %v7964_v12  ;;  %v1061_v46 = vpack.c.b16 %v9492_v43, %v9492_v43  ;;  %9493 = vst [vmem:[#allocation37_spill] sm:$0xff] %v8163_v52  ;;  %v6946_v16 = vor.u32 %v7911_v15, %v6945_v5 }
 0x20e   : > { %v1883_v50 = vrot.slane %v1881_v62, 3  ;;  %v1886_v20 = vrot.slane %v1884_v36, 4  ;;  %v1890_v17 = vrot.slane %v1888_v13, 3  ;;  %v1893_v42 = vrot.slane %v1891_v60, 4 }
 0x210   : > { %v1887_v32 = vor.u32 %v1886_v20, %v1883_v50  ;;  %v1894_v12 = vor.u32 %v1893_v42, %v1890_v17  ;;  %v6668_v42 = vld [vmem:[%s9440_s3 + $0x18] sm:$0xff]  ;;  %2777 = vmatmul.bf16.gmra.mxu2 %v7903_v8 }
 0x211   : > { %v8143_v21 = vpop.f32.mrf.mxu1  ;;  %2452 = vmatpush.bf16.msra.mxu3 %v6668_v42 }
 0x212   : > { %v8153_v13 = vsel %vm1464_vm3, %v1887_v32, %v1894_v12 }
 0x213   : > { %v1259_v40 = vpop.permute.xlu2 %1258 }
 0x214   : > { %v1451_v20 = vsel %vm1373_vm4, %v6942_v4, %v1259_v40  ;;  %v1453_v17 = vsel %vm1373_vm4, %v1061_v46, %v1259_v40  ;;  %v9494_v4 = vunpack.c.h.b16 %v7909_v9  ;;  %v8191_v52 = vpop.f32.mrf.mxu2 }
 0x215   : > { %v1945_v3 = vshrl.u32 %v1451_v20, 16  ;;  %v1948_v60 = vshll.u32 %v1451_v20, 16  ;;  %v1952_v49 = vshrl.u32 %v1453_v17, 16  ;;  %v1955_v38 = vshll.u32 %v1453_v17, 16  ;;  %v6667_v17 = vld [vmem:[%s9440_s3 + $0x10] sm:$0xff]  ;;  %9496 = vst [vmem:[#allocation38_spill] sm:$0xff] %v8191_v52 }
 0x216   : > { %v1059_v43 = vpack.c.b16 %v9494_v4, %v9494_v4  ;;  %2453 = vmatpush.bf16.msra.mxu3 %v6667_v17 }
 0x217   : > { %v1947_v12 = vrot.slane %v1945_v3, 3  ;;  %v1950_v32 = vrot.slane %v1948_v60, 4  ;;  %v1954_v62 = vrot.slane %v1952_v49, 3  ;;  %v1957_v36 = vrot.slane %v1955_v38, 4  ;;  %v6949_v3 = vld [vmem:[#allocation2] sm:$0x8] }
 0x218   : > { %v6666_v38 = vld [vmem:[%s9440_s3 + $0x8] sm:$0xff]  ;;  %v6950_v4 = vor.u32 %v7614_v55, %v6949_v3  ;;  %v6665_v55 = vld [vmem:[%s9440_s3] sm:$0xff] }
 0x219   : > { %v8165_v50 = vpop.f32.mrf.mxu1  ;;  %v1951_v46 = vor.u32 %v1950_v32, %v1947_v12  ;;  %v1958_v40 = vor.u32 %v1957_v36, %v1954_v62  ;;  %v1257_v20 = vpop.permute.xlu1 %1256 }
 0x21a   : > { %v1446_v42 = vsel %vm1373_vm4, %v6946_v16, %v1257_v20  ;;  %v1448_v60 = vsel %vm1373_vm4, %v1059_v43, %v1257_v20  ;;  %v9495_v43 = vunpack.c.h.b16 %v7612_v54  ;;  %2454 = vmatpush.bf16.msra.mxu3 %v6666_v38 }
 0x21b   : > { %v1913_v9 = vshrl.u32 %v1446_v42, 16  ;;  %v1916_v15 = vshll.u32 %v1446_v42, 16  ;;  %v1920_v5 = vshrl.u32 %v1448_v60, 16  ;;  %v1923_v49 = vshll.u32 %v1448_v60, 16  ;;  %v8189_v42 = vpop.f32.mrf.mxu0 }
 0x21c   : > { %2258 = vmatmul.bf16.gmra.mxu1 %v8090_v44  ;;  %v8183_v12 = vsel %vm1464_vm3, %v1951_v46, %v1958_v40  ;;  %v1031_v20 = vpack.c.b16 %v9495_v43, %v9495_v43 }
 0x21d   : > { %6029 = vmatmul.msk.bf16.gmra.mxu0 %vm1373_vm4, %v8007_v1  ;;  %v1915_v32 = vrot.slane %v1913_v9, 3  ;;  %v1918_v62 = vrot.slane %v1916_v15, 4  ;;  %v1922_v36 = vrot.slane %v1920_v5, 3  ;;  %v1925_v16 = vrot.slane %v1923_v49, 4 }
 0x21e   : > { %2455 = vmatpush.bf16.msra.mxu3 %v6665_v55  ;;  %v6953_v55 = vld [vmem:[#allocation2 + $0x100] sm:$0x8] }
 0x21f   : > { %v1919_v17 = vor.u32 %v1918_v62, %v1915_v32  ;;  %v1926_v60 = vor.u32 %v1925_v16, %v1922_v36 }
 0x220   : > { %2782 = vmatmul.bf16.gmra.mxu2 %v7870_v24 }
 0x221   : > { %v8193_v1 = vpop.f32.mrf.mxu1  ;;  %v1229_v46 = vpop.permute.xlu1 %1228  ;;  %v8196_v40 = vsel %vm1464_vm3, %v1919_v17, %v1926_v60 }
 0x222   : > { %v1376_v54 = vsel %vm1373_vm4, %v6950_v4, %v1229_v46  ;;  %v1378_v3 = vsel %vm1373_vm4, %v1031_v20, %v1229_v46  ;;  %v8211_v20 = vpop.f32.mrf.mxu2 }
 0x223   : > { %v1465_v9 = vshrl.u32 %v1376_v54, 16  ;;  %v1468_v15 = vshll.u32 %v1376_v54, 16  ;;  %v1472_v5 = vshrl.u32 %v1378_v3, 16  ;;  %v1475_v49 = vshll.u32 %v1378_v3, 16  ;;  %v8206_v60 = vpop.f32.mrf.mxu0  ;;  %9497 = vst [vmem:[#allocation39_spill] sm:$0xff] %v8211_v20 }
 0x225   : > { %v1467_v38 = vrot.slane %v1465_v9, 3  ;;  %v1470_v32 = vrot.slane %v1468_v15, 4  ;;  %v1474_v62 = vrot.slane %v1472_v5, 3  ;;  %v1477_v36 = vrot.slane %v1475_v49, 4 }
 0x226   : > { %v6954_v9 = vor.u32 %v8000_v28, %v6953_v55  ;;  %v9499_v15 = vunpack.c.h.b16 %v7998_v57 }
 0x227   : > { %v1471_v16 = vor.u32 %v1470_v32, %v1467_v38  ;;  %v1478_v43 = vor.u32 %v1477_v36, %v1474_v62 }
 0x228   : > { %v1063_v5 = vpack.c.b16 %v9499_v15, %v9499_v15 }
 0x229   : > { %v8204_v17 = vpop.f32.mrf.mxu1  ;;  %v1479_v4 = vsel %vm1464_vm3, %v1471_v16, %v1478_v43 }
 0x22a   : > { %2456 = vmatmul.bf16.vlgmr.msra.gmra.mxu3 %v1479_v4  ;;  %v8216_v54 = vpop.f32.mrf.mxu2 }
 0x22b   : > { %9498 = vst [vmem:[#allocation40_spill] sm:$0xff] %v8216_v54 }
 0x22c   : > { %2263 = vmatmul.bf16.gmra.mxu1 %v8153_v13 }
 0x22d   : > { %6030 = vmatmul.msk.bf16.gmra.mxu0 %vm1373_vm4, %v8042_v27 }
 0x230   : > { %2787 = vmatmul.bf16.gmra.mxu2 %v7882_v2 }
 0x231   : > { %v8214_v46 = vpop.f32.mrf.mxu1 }
 0x232   : > { %v8229_v4 = vpop.f32.mrf.mxu2 }
 0x233   : > { %9500 = vst [vmem:[#allocation41_spill] sm:$0xff] %v8229_v4 }
 0x239   : > { %v8219_v3 = vpop.f32.mrf.mxu1  ;;  %v1261_v49 = vpop.permute.xlu0 %1260 }
 0x23a   : > { %2461 = vmatmul.bf16.gmra.mxu3 %v7717_v45  ;;  %v1456_v38 = vsel %vm1373_vm4, %v6954_v9, %v1261_v49  ;;  %v1458_v32 = vsel %vm1373_vm4, %v1063_v5, %v1261_v49  ;;  %v8237_v9 = vpop.f32.mrf.mxu2 }
 0x23b   : > { %v2017_v62 = vshrl.u32 %v1456_v38, 16  ;;  %v2020_v36 = vshll.u32 %v1456_v38, 16  ;;  %v2024_v16 = vshrl.u32 %v1458_v32, 16  ;;  %v2027_v43 = vshll.u32 %v1458_v32, 16  ;;  %9501 = vst [vmem:[#allocation42_spill] sm:$0xff] %v8237_v9 }
 0x23c   : > { %2268 = vmatmul.bf16.gmra.mxu1 %v8196_v40 }
 0x23d   : > { %v2019_v28 = vrot.slane %v2017_v62, 3  ;;  %v2022_v55 = vrot.slane %v2020_v36, 4  ;;  %v2026_v57 = vrot.slane %v2024_v16, 3  ;;  %v2029_v54 = vrot.slane %v2027_v43, 4 }
 0x23f   : > { %v2023_v20 = vor.u32 %v2022_v55, %v2019_v28  ;;  %v2030_v45 = vor.u32 %v2029_v54, %v2026_v57 }
 0x240   : > { %2792 = vmatmul.bf16.gmra.mxu2 %v7977_v58 }
 0x241   : > { %v8231_v15 = vpop.f32.mrf.mxu1  ;;  %v8234_v52 = vsel %vm1464_vm3, %v2023_v20, %v2030_v45 }
 0x242   : > { %v8245_v38 = vpop.f32.mrf.mxu2 }
 0x243   : > { %9502 = vst [vmem:[#allocation43_spill] sm:$0xff] %v8245_v38 }
 0x249   : > { %v8239_v5 = vpop.f32.mrf.mxu1 }
 0x24a   : > { %2466 = vmatmul.bf16.gmra.mxu3 %v7753_v34  ;;  %v8252_v20 = vpop.f32.mrf.mxu2 }
 0x24b   : > { %9503 = vst [vmem:[#allocation44_spill] sm:$0xff] %v8252_v20 }
 0x24c   : > { %2273 = vmatmul.bf16.gmra.mxu1 %v8183_v12 }
 0x250   : > { %2797 = vmatmul.bf16.gmra.mxu2 %v8010_v6 }
 0x251   : > { %v8243_v49 = vpop.f32.mrf.mxu1 }
 0x252   : > { %v8257_v34 = vpop.f32.mrf.mxu2 }
 0x253   : > { %9504 = vst [vmem:[#allocation45_spill] sm:$0xff] %v8257_v34 }
 0x259   : > { %v8248_v54 = vpop.f32.mrf.mxu1 }
 0x25a   : > { %2471 = vmatmul.bf16.gmra.mxu3 %v7857_v0  ;;  %v8264_v36 = vpop.f32.mrf.mxu2 }
 0x25b   : > { %9505 = vst [vmem:[#allocation46_spill] sm:$0xff] %v8264_v36 }
 0x25c   : > { %2278 = vmatmul.bf16.gmra.mxu1 %v8234_v52 }
 0x260   : > { %2802 = vmatmul.bf16.gmra.mxu2 %v7996_v7 }
 0x261   : > { %v8254_v32 = vpop.f32.mrf.mxu1 }
 0x262   : > { %v8271_v43 = vpop.f32.mrf.mxu2 }
 0x263   : > { %9507 = vst [vmem:[#allocation48_spill] sm:$0xff] %v8271_v43 }
 0x269   : > { %v8259_v62 = vpop.f32.mrf.mxu1 }
 0x26a   : > { %2476 = vmatmul.bf16.gmra.mxu3 %v7903_v8  ;;  %v8278_v8 = vpop.f32.mrf.mxu2 }
 0x26b   : > { %9509 = vst [vmem:[#allocation50_spill] sm:$0xff] %v8278_v8 }
 0x26c   : > { %6103 = vmatmul.msk.bf16.vlgmr.msrb.gmra.mxu1 %vm1373_vm4, %v7489_v29 }
 0x270   : > { %2807 = vmatmul.bf16.gmra.mxu2 %v8064_v51 }
 0x271   : > { %v8266_v0 = vpop.f32.mrf.mxu1 }
 0x272   : > { %9506 = vst [vmem:[#allocation47_spill] sm:$0xff] %v8266_v0  ;;  %v8286_v55 = vpop.f32.mrf.mxu2 }
 0x273   : > { %9511 = vst [vmem:[#allocation52_spill] sm:$0xff] %v8286_v55 }
 0x279   : > { %v8269_v16 = vpop.f32.mrf.mxu1 }
 0x27a   : > { %2481 = vmatmul.bf16.gmra.mxu3 %v7870_v24 }
 0x27c   : > { %6104 = vmatmul.msk.bf16.gmra.mxu1 %vm1373_vm4, %v7560_v31  ;;  %v8291_v31 = vpop.f32.mrf.mxu2 }
 0x27d   : > { %9513 = vst [vmem:[#allocation54_spill] sm:$0xff] %v8291_v31 }
 0x280   : > { %2812 = vmatmul.bf16.gmra.mxu2 %v8097_v41 }
 0x281   : > { %v8276_v28 = vpop.f32.mrf.mxu1 }
 0x282   : > { %9508 = vst [vmem:[#allocation49_spill] sm:$0xff] %v8276_v28 }
 0x289   : > { %v8281_v29 = vpop.f32.mrf.mxu1 }
 0x28a   : > { %9510 = vst [vmem:[#allocation51_spill] sm:$0xff] %v8281_v29  ;;  %2486 = vmatmul.bf16.gmra.mxu3 %v7882_v2  ;;  %v2768_v2 = vpop.f32.mrf.mxu2 }
 0x28c   : > { %6105 = vmatmul.msk.bf16.gmra.mxu1 %vm1373_vm4, %v7596_v22 }
 0x290   : > { %2817 = vmatmul.bf16.gmra.mxu2 %v8090_v44 }
 0x291   : > { %v8288_v57 = vpop.f32.mrf.mxu1 }
 0x292   : > { %9512 = vst [vmem:[#allocation53_spill] sm:$0xff] %v8288_v57  ;;  %v2770_v31 = vpop.f32.mrf.mxu2 }
 0x299   : > { %v8293_v24 = vpop.f32.mrf.mxu1 }
 0x29a   : > { %9514 = vst [vmem:[#allocation55_spill] sm:$0xff] %v8293_v24  ;;  %2491 = vmatmul.bf16.gmra.mxu3 %v7977_v58 }
 0x29c   : > { %6106 = vmatmul.msk.bf16.gmra.mxu1 %vm1373_vm4, %v7644_v48  ;;  %v2773_v48 = vpop.f32.mrf.mxu2 }
 0x2a0   : > { %2822 = vmatmul.bf16.gmra.mxu2 %v8153_v13 }
 0x2a1   : > { %v8298_v45 = vpop.f32.mrf.mxu1 }
 0x2a2   : > { %9515 = vst [vmem:[#allocation56_spill] sm:$0xff] %v8298_v45 }
 0x2a9   : > { %v8301_v22 = vpop.f32.mrf.mxu1 }
 0x2aa   : > { %9516 = vst [vmem:[#allocation57_spill] sm:$0xff] %v8301_v22  ;;  %2496 = vmatmul.bf16.gmra.mxu3 %v8010_v6  ;;  %v8314_v6 = vpop.f32.mrf.mxu2 }
 0x2ac   : > { %6107 = vmatmul.msk.bf16.gmra.mxu1 %vm1373_vm4, %v7677_v61  ;;  %v8319_v61 = vld [vmem:[#allocation2 + $0x114] sm:$0xff]  }
 0x2ad   : > { %v2457_v8 = vpop.f32.mrf.mxu3 }
 0x2b0   : > { %2827 = vmatmul.bf16.gmra.mxu2 %v8196_v40 }
 0x2b1   : > { %v8306_v55 = vpop.f32.mrf.mxu1 }
 0x2b2   : > { %9517 = vst [vmem:[#allocation58_spill] sm:$0xff] %v8306_v55  ;;  %v8321_v55 = vld [vmem:[#allocation2 + $0x110] sm:$0xf0]   ;;  %v8328_v22 = vpop.f32.mrf.mxu2 }
 0x2b5   : > { %v2459_v58 = vpop.f32.mrf.mxu3 }
 0x2b9   : > { %v8309_v43 = vpop.f32.mrf.mxu1 }
 0x2ba   : > { %9518 = vst [vmem:[#allocation59_spill] sm:$0xff] %v8309_v43  ;;  %2501 = vmatmul.bf16.gmra.mxu3 %v7996_v7  ;;  %v1221_v7 = vshrl.u32 %v8319_v61, 16 }
 0x2bc   : > { %6108 = vmatmul.msk.bf16.gmra.mxu1 %vm1373_vm4, %v7714_v30  ;;  %v1224_v30 = vshll.u32 %v8319_v61, 16 }
 0x2bd   : > { %v2462_v36 = vpop.f32.mrf.mxu3 }
 0x2be   : > { %v1226_v9 = vrot.slane %v1224_v30, 5  ;;  %v9524_v30 = vld [vmem:[#allocation18_spill] sm:$0xff] }
 0x2c0   : > { %2832 = vmatmul.bf16.gmra.mxu2 %v8183_v12 }
 0x2c1   : > { %v8316_v20 = vpop.f32.mrf.mxu1 }
 0x2c2   : > { %9519 = vst [vmem:[#allocation60_spill] sm:$0xff] %v8316_v20  ;;  %v1223_v20 = vrot.slane %v1221_v7, 4 }
 0x2c4   : > { %v1227_v57 = vor.u32 %v1226_v9, %v1223_v20 }
 0x2c5   : > { %v2464_v34 = vpop.f32.mrf.mxu3 }
 0x2c6   : > { %1262 = vrot.lane.b32.xlu2 %v1227_v57, %s7113_s24 }
 0x2c9   : > { %v8324_v43 = vpop.f32.mrf.mxu1 }
 0x2ca   : > { %9520 = vst [vmem:[#allocation61_spill] sm:$0xff] %v8324_v43  ;;  %2506 = vmatmul.bf16.gmra.mxu3 %v8064_v51  ;;  %v8338_v43 = vpop.f32.mrf.mxu2 }
 0x2cc   : > { %6109 = vmatmul.msk.bf16.gmra.mxu1 %vm1373_vm4, %v7749_v11 }
 0x2cd   : > { %v8333_v45 = vpop.f32.mrf.mxu3 }
 0x2d0   : > { %2837 = vmatmul.bf16.gmra.mxu2 %v8234_v52 }
 0x2d1   : > { %v8336_v38 = vpop.f32.mrf.mxu1 }
 0x2d2   : > { %9521 = vst [vmem:[#allocation62_spill] sm:$0xff] %v8336_v38  ;;  %v8352_v9 = vpop.f32.mrf.mxu2 }
 0x2d5   : > { %v8341_v4 = vpop.f32.mrf.mxu3 }
 0x2d9   : > { %v8343_v24 = vpop.f32.mrf.mxu1 }
 0x2da   : > { %9522 = vst [vmem:[#allocation63_spill] sm:$0xff] %v8343_v24  ;;  %2511 = vmatmul.bf16.gmra.mxu3 %v8097_v41  ;;  %v2294_v41 = vadd.f32 %v7775_v19, %v8058_v18  ;;  %v8373_v19 = vld [vmem:[%s9441_s4] ss:$0 sm:$0xff] }
 0x2dc   : > { %6110 = vmatmul.msk.bf16.gmra.mxu1 %vm1373_vm4, %v7780_v14  ;;  %v2458_v7 = vadd.f32 %v2457_v8, %v2294_v41  ;;  %v8361_v14 = vpop.f32.mrf.mxu2  ;;  %v8375_v8 = vpop.f32.mrf.mxu0 }
 0x2dd   : > { %v8348_v11 = vpop.f32.mrf.mxu3 }
 0x2de   : > { %v2547_v29 = vadd.f32 %v8066_v63, %v2458_v7  ;;  %v9526_v63 = vld [vmem:[#allocation19_spill] sm:$0xff] }
 0x2e1   : > { %v8350_v51 = vpop.f32.mrf.mxu1 }
 0x2e2   : > { %9523 = vst [vmem:[#allocation64_spill] sm:$0xff] %v8350_v51  ;;  %v2299_v51 = vadd.f32 %v9524_v30, %v8100_v47 }
 0x2e4   : > { %v2463_v28 = vadd.f32 %v2462_v36, %v2299_v51  ;;  %v2301_v36 = vadd.f32 %v9526_v63, %v8109_v35  ;;  %v8384_v51 = vpop.f32.mrf.mxu2  ;;  %v8392_v30 = vpop.f32.mrf.mxu0 }
 0x2e5   : > { %v8354_v57 = vpop.f32.mrf.mxu3 }
 0x2e6   : > { %v2552_v47 = vadd.f32 %v8102_v53, %v2463_v28 }
 0x2e9   : > { %v2857_v20 = vpop.f32.mrf.mxu1 }
 0x2ea   : > { %2516 = vmatmul.bf16.gmra.mxu3 %v8090_v44  ;;  %v2858_v38 = vadd.f32 %v2857_v20, %v2768_v2  ;;  %v9525_v44 = vld [vmem:[#allocation17_spill] sm:$0xff] }
 0x2eb   : > { %v2296_v0 = vadd.f32 %v9525_v44, %v8084_v23 }
 0x2ec   : > { %6111 = vmatmul.msk.bf16.gmra.mxu1 %vm1373_vm4, %v7822_v33  ;;  %v2937_v33 = vadd.f32 %v2858_v38, %v2547_v29  ;;  %v8397_v44 = vpop.f32.mrf.mxu2 }
 0x2ed   : > { %v8365_v24 = vpop.f32.mrf.mxu3  ;;  %v2460_v41 = vadd.f32 %v2459_v58, %v2296_v0  ;;  %v2465_v0 = vadd.f32 %v2464_v34, %v2301_v36 }
 0x2ee   : > { %v2972_v23 = vadd.f32 %v8373_v19, %v2937_v33 }
 0x2ef   : > { %v2549_v20 = vadd.f32 %v8092_v25, %v2460_v41  ;;  %v2554_v7 = vadd.f32 %v8111_v56, %v2465_v0 }
 0x2f1   : > { %v2859_v52 = vpop.f32.mrf.mxu1 }
 0x2f2   : > { %v2860_v38 = vadd.f32 %v2859_v52, %v2770_v31 }
 0x2f4   : > { %v2938_v58 = vadd.f32 %v2860_v38, %v2549_v20  ;;  %v8409_v36 = vpop.f32.mrf.mxu2 }
 0x2f5   : > { %v8388_v28 = vpop.f32.mrf.mxu3 }
 0x2f9   : > { %v2862_v18 = vpop.f32.mrf.mxu1 }
 0x2fa   : > { %v2863_v2 = vadd.f32 %v2862_v18, %v2773_v48  ;;  %2521 = vmatmul.bf16.gmra.mxu3 %v8153_v13  ;;  %v3004_v13 = vmax.f32 %v2972_v23, 0.0 }
 0x2fc   : > { %v2939_v29 = vadd.f32 %v2863_v2, %v2552_v47  ;;  %6112 = vmatmul.msk.bf16.gmra.mxu1 %vm1373_vm4, %v7890_v37  ;;  %v2973_v37 = vadd.f32 %v8373_v19, %v2938_v58  ;;  %v9527_v2 = vld [vmem:[#allocation20_spill] sm:$0xff] }
 0x2fd   : > { %v8399_v41 = vpop.f32.mrf.mxu3  ;;  %v2304_v63 = vadd.f32 %v9527_v2, %v8119_v10 }
 0x2fe   : > { %v2974_v53 = vadd.f32 %v8373_v19, %v2939_v29  ;;  %v3005_v33 = vmax.f32 %v2973_v37, 0.0 }
 0x2ff   : > { %v2468_v38 = vadd.f32 %v8333_v45, %v2304_v63 }
 0x300   : > { %v3006_v48 = vmax.f32 %v2974_v53, 0.0 }
 0x301   : > { %v2864_v35 = vpop.f32.mrf.mxu1  ;;  %v2557_v58 = vadd.f32 %v8130_v59, %v2468_v38  ;;  %v9530_v59 = vld [vmem:[#allocation23_spill] sm:$0xff] }
 0x302   : > { %v3036_v31 = vmax.f32 %v3004_v13, %v3006_v48  ;;  %v2865_v52 = vadd.f32 %v2864_v35, %v8314_v6  ;;  %v8405_v6 = vpop.f32.mrf.mxu0  ;;  %v9529_v35 = vld [vmem:[#allocation21_spill] sm:$0xff] }
 0x304   : > { %3052 = vst.msk [vmem:[#allocation5] sm:$0xff] %vm1373_vm4, %v3036_v31  ;;  %v2940_v25 = vadd.f32 %v2865_v52, %v2554_v7  ;;  %v2306_v7 = vadd.f32 %v9529_v35, %v8143_v21  ;;  %v6957_v35 = vld [vmem:[#allocation2 + $0x110] sm:$0x8] }
 0x305   : > { %v8412_v29 = vpop.f32.mrf.mxu3 }
 0x306   : > { %v2975_v34 = vadd.f32 %v8373_v19, %v2940_v25  ;;  %v2470_v37 = vadd.f32 %v8341_v4, %v2306_v7  ;;  %v8427_v25 = vpop.f32.mrf.mxu2 }
 0x308   : > { %v3007_v18 = vmax.f32 %v2975_v34, 0.0 }
 0x309   : > { %v2867_v47 = vpop.f32.mrf.mxu1 }
 0x30a   : > { %v3037_v56 = vmax.f32 %v3005_v33, %v3007_v18  ;;  %2526 = vmatmul.bf16.gmra.mxu3 %v8196_v40  ;;  %v9528_v40 = vld [vmem:[#allocation22_spill] sm:$0xff]  ;;  %v8421_v31 = vpop.f32.mrf.mxu0  ;;  %v9531_v18 = vld [vmem:[#allocation24_spill] sm:$0xff] }
 0x30b   : > { %v2309_v53 = vadd.f32 %v9528_v40, %v8165_v50 }
 0x30c   : > { %3053 = vst.msk [vmem:[#allocation5 + $0x8] sm:$0xff] %vm1373_vm4, %v3037_v56  ;;  %6113 = vmatmul.msk.bf16.gmra.mxu1 %vm1373_vm4, %v7920_v39  ;;  %v2868_v39 = vadd.f32 %v2867_v47, %v8328_v22 }
 0x30d   : > { %v2473_v48 = vadd.f32 %v8348_v11, %v2309_v53  ;;  %v2311_v11 = vadd.f32 %v9530_v59, %v8193_v1  ;;  %v8436_v4 = vpop.f32.mrf.mxu3 }
 0x30e   : > { %v2941_v45 = vadd.f32 %v2868_v39, %v2557_v58  ;;  %v8451_v39 = vpop.f32.mrf.mxu2 }
 0x30f   : > { %v2562_v50 = vadd.f32 %v8189_v42, %v2473_v48  ;;  %v2559_v42 = vadd.f32 %v8161_v26, %v2470_v37  ;;  %v6958_v37 = vor.u32 %v8321_v55, %v6957_v35 }
 0x310   : > { %v2976_v21 = vadd.f32 %v8373_v19, %v2941_v45 }
 0x311   : > { %v2869_v23 = vpop.f32.mrf.mxu1 }
 0x312   : > { %v2870_v34 = vadd.f32 %v2869_v23, %v8338_v43  ;;  %v3008_v56 = vmax.f32 %v2976_v21, 0.0  ;;  %v8443_v43 = vpop.f32.mrf.mxu0 }
 0x313   : > { %v3068_v20 = vld [vmem:[#allocation5] ss:$2 sm:$0xff]  ;;  %v3084_v0 = vld [vmem:[#allocation5 + $0x1] ss:$2 sm:$0xff] }
 0x314   : > { %v3099_v13 = vmax.f32 %v3068_v20, %v3084_v0  ;;  %v2942_v2 = vadd.f32 %v2870_v34, %v2559_v42 }
 0x316   : > { %v3107_v10 = vpack.c.bf16 %v3099_v13, %v3099_v13 }
 0x318   : > { %3119 = vst.msk [vmem:[#allocation3 + $0x10] sm:$0xf] %vm375_vm1, %v3107_v10 }
 0x319   : > { %v2872_v52 = vpop.f32.mrf.mxu1 }
 0x31a   : > { %v2873_v22 = vadd.f32 %v2872_v52, %v8352_v9  ;;  %2531 = vmatmul.bf16.gmra.mxu3 %v8183_v12  ;;  %v2475_v9 = vadd.f32 %v8354_v57, %v2311_v11  ;;  %v2977_v57 = vadd.f32 %v8373_v19, %v2942_v2 }
 0x31c   : > { %v2943_v33 = vadd.f32 %v2873_v22, %v2562_v50  ;;  %6114 = vmatmul.msk.bf16.gmra.mxu1 %vm1373_vm4, %v9531_v18  ;;  %v2564_v23 = vadd.f32 %v8206_v60, %v2475_v9  ;;  %v8454_v60 = vpop.f32.mrf.mxu3  ;;  %v9532_v50 = vunpack.c.h.b16 %v8319_v61  ;;  %v9533_v18 = vld [vmem:[#allocation27_spill] sm:$0xff] }
 0x31e   : > { %v2978_v47 = vadd.f32 %v8373_v19, %v2943_v33  ;;  %v1065_v22 = vpack.c.b16 %v9532_v50, %v9532_v50  ;;  %v8463_v33 = vpop.f32.mrf.mxu0 }
 0x31f   : > { %v3133_v12 = vld [vmem:[#allocation3 + $0x10] sm:$0xf] }
 0x320   : > { %v3010_v1 = vmax.f32 %v2978_v47, 0.0  ;;  %v8441_v63 = vunpack.c.l.b16 %v3133_v12  ;;  %v1263_v11 = vpop.permute.xlu2 %1262 }
 0x321   : > { %v2874_v38 = vpop.f32.mrf.mxu1  ;;  %v1461_v21 = vsel %vm1373_vm4, %v6958_v37, %v1263_v11  ;;  %v1463_v34 = vsel %vm1373_vm4, %v1065_v22, %v1263_v11 }
 0x322   : > { %v3038_v20 = vmax.f32 %v3008_v56, %v3010_v1  ;;  %v2875_v0 = vadd.f32 %v2874_v38, %v8361_v14  ;;  %v3211_v26 = vpack.c.b16 %v8441_v63, %v8441_v63  ;;  %v3009_v14 = vmax.f32 %v2977_v57, 0.0  ;;  %v8468_v1 = vpop.f32.mrf.mxu2 }
 0x323   : > { %v2626_v55 = vshrl.u32 %v1461_v21, 16  ;;  %v2629_v42 = vshll.u32 %v1461_v21, 16  ;;  %v2633_v9 = vshrl.u32 %v1463_v34, 16  ;;  %v2636_v47 = vshll.u32 %v1463_v34, 16 }
 0x324   : > { %3054 = vst.msk [vmem:[#allocation5 + $0x10] sm:$0xff] %vm1373_vm4, %v3038_v20  ;;  %v2944_v40 = vadd.f32 %v2875_v0, %v2564_v23  ;;  %v3229_v53 = vshrl.u32 %v3211_v26, 16  ;;  %v3232_v13 = vshll.u32 %v3211_v26, 16  ;;  %v9534_v23 = vld [vmem:[#allocation25_spill] sm:$0xff]  ;;  %v8472_v0 = vpop.f32.mrf.mxu3 }
 0x325   : > { %v2628_v12 = vrot.slane %v2626_v55, 3  ;;  %v2631_v56 = vrot.slane %v2629_v42, 4  ;;  %v2635_v2 = vrot.slane %v2633_v9, 3  ;;  %v2638_v38 = vrot.slane %v2636_v47, 4 }
 0x326   : > { %v2979_v58 = vadd.f32 %v8373_v19, %v2944_v40  ;;  %v3231_v48 = vrot.slane %v3229_v53, 4  ;;  %v3234_v10 = vrot.slane %v3232_v13, 5  ;;  %v2314_v20 = vadd.f32 %v9534_v23, %v8204_v17 }
 0x327   : > { %v2632_v26 = vor.u32 %v2631_v56, %v2628_v12  ;;  %v2639_v40 = vor.u32 %v2638_v38, %v2635_v2 }
 0x328   : > { %v3011_v7 = vmax.f32 %v2979_v58, 0.0  ;;  %v3235_v45 = vor.u32 %v3234_v10, %v3231_v48  ;;  %v2478_v53 = vadd.f32 %v8365_v24, %v2314_v20  ;;  %v9535_v10 = vld [vmem:[#allocation28_spill] sm:$0xff]  ;;  %v9536_v24 = vld [vmem:[#allocation26_spill] sm:$0xff] }
 0x329   : > { %v2877_v52 = vpop.f32.mrf.mxu1  ;;  %v2640_v48 = vsel %vm1464_vm3, %v2632_v26, %v2639_v40  ;;  %v2319_v35 = vadd.f32 %v9535_v10, %v8219_v3  ;;  %v2316_v22 = vadd.f32 %v9536_v24, %v8214_v46 }
 0x32a   : > { %v3039_v59 = vmax.f32 %v3009_v14, %v3011_v7  ;;  %3302 = vrot.lane.b32.xlu0 %v3235_v45, %s7113_s24  ;;  %v2878_v7 = vadd.f32 %v2877_v52, %v8384_v51  ;;  %2842 = vmatmul.bf16.gmra.mxu2 %v2640_v48  ;;  %v8479_v45 = vpop.f32.mrf.mxu0  ;;  %v2567_v17 = vadd.f32 %v8375_v8, %v2478_v53  ;;  %v8486_v11 = vpop.f32.mrf.mxu2  ;;  %v9537_v8 = vld [vmem:[#allocation29_spill] sm:$0xff] }
 0x32b   : > { %v2483_v37 = vadd.f32 %v8399_v41, %v2319_v35  ;;  %v2480_v21 = vadd.f32 %v8388_v28, %v2316_v22  ;;  %v2321_v41 = vadd.f32 %v9537_v8, %v8231_v15 }
 0x32c   : > { %3055 = vst.msk [vmem:[#allocation5 + $0x18] sm:$0xff] %vm1373_vm4, %v3039_v59  ;;  %6115 = vmatmul.msk.bf16.gmra.mxu1 %vm1373_vm4, %v9533_v18  ;;  %v2945_v59 = vadd.f32 %v2878_v7, %v2567_v17  ;;  %v8491_v34 = vpop.f32.mrf.mxu3  ;;  %v921_v18 = vld [vmem:[#allocation2 + $0x11c] sm:$0x1] }
 0x32d   : > { %v2572_v51 = vadd.f32 %v8405_v6, %v2483_v37  ;;  %v2485_v28 = vadd.f32 %v8412_v29, %v2321_v41  ;;  %v2569_v6 = vadd.f32 %v8392_v30, %v2480_v21  ;;  %v1299_v9 = vunpack.c.l.b16 %v921_v18  ;;  %v9539_v18 = vld [vmem:[#allocation30_spill] sm:$0xff] }
 0x32e   : > { %v2980_v46 = vadd.f32 %v8373_v19, %v2945_v59 }
 0x32f   : > { %v1317_v29 = vpack.c.b16 %v1299_v9, %v1299_v9 }
 0x330   : > { %v3012_v15 = vmax.f32 %v2980_v46, 0.0  ;;  %v2324_v46 = vadd.f32 %v9539_v18, %v8239_v5 }
 0x331   : > { %v2879_v57 = vpop.f32.mrf.mxu1 }
 0x332   : > { %v2880_v55 = vadd.f32 %v2879_v57, %v8397_v44  ;;  %v8502_v12 = vpop.f32.mrf.mxu0  ;;  %v2574_v44 = vadd.f32 %v8421_v31, %v2485_v28  ;;  %v8510_v26 = vpop.f32.mrf.mxu2  ;;  %v6720_v31 = vld [vmem:[%s9442_s5 + $0x98] sm:$0xff]  ;;  %v2488_v9 = vadd.f32 %v8436_v4, %v2324_v46  ;;  %v9541_v4 = vld [vmem:[#allocation32_spill] sm:$0xff] }
 0x333   : > { %v3070_v13 = vld [vmem:[#allocation5 + $0x10] ss:$2 sm:$0xff]  ;;  %v3086_v58 = vld [vmem:[#allocation5 + $0x11] ss:$2 sm:$0xff]  ;;  %3734 = vmatpush.bf16.msrb.mxu3 %v6720_v31 }
 0x334   : > { %v3100_v14 = vmax.f32 %v3070_v13, %v3086_v58  ;;  %v2946_v56 = vadd.f32 %v2880_v55, %v2569_v6  ;;  %v8514_v53 = vpop.f32.mrf.mxu3  ;;  %v2577_v5 = vadd.f32 %v8443_v43, %v2488_v9 }
 0x336   : > { %v3108_v50 = vpack.c.bf16 %v3100_v14, %v3100_v14  ;;  %v2981_v57 = vadd.f32 %v8373_v19, %v2946_v56  ;;  %v1371_v14 = vrot.slane %v1317_v29, 5 }
 0x338   : > { %3120 = vst.msk [vmem:[#allocation3 + $0x1c] sm:$0xf] %vm375_vm1, %v3108_v50  ;;  %v3013_v7 = vmax.f32 %v2981_v57, 0.0 }
 0x339   : > { %v2882_v3 = vpop.f32.mrf.mxu1 }
 0x33a   : > { %v2883_v52 = vadd.f32 %v2882_v3, %v8409_v36  ;;  %v8521_v24 = vpop.f32.mrf.mxu0  ;;  %v8528_v3 = vpop.f32.mrf.mxu2 }
 0x33c   : > { %v2947_v42 = vadd.f32 %v2883_v52, %v2572_v51  ;;  %6116 = vmatmul.msk.bf16.gmra.mxu1 %vm1373_vm4, %v8042_v27  ;;  %v8530_v41 = vpop.f32.mrf.mxu3 }
 0x33e   : > { %v2982_v36 = vadd.f32 %v8373_v19, %v2947_v42 }
 0x33f   : > { %v3135_v47 = vld [vmem:[#allocation3 + $0x1c] sm:$0xf] }
 0x340   : > { %v3014_v2 = vmax.f32 %v2982_v36, 0.0  ;;  %v8504_v38 = vunpack.c.l.b16 %v3135_v47 }
 0x341   : > { %v2884_v23 = vpop.f32.mrf.mxu1 }
 0x342   : > { %v3040_v20 = vmax.f32 %v3012_v15, %v3014_v2  ;;  %v2885_v27 = vadd.f32 %v2884_v23, %v8427_v25  ;;  %v3212_v30 = vpack.c.b16 %v8504_v38, %v8504_v38  ;;  %v1370_v25 = vrot.slane %v8319_v61, 5  ;;  %v9538_v61 = vld [vmem:[#allocation31_spill] sm:$0xff]  ;;  %v8535_v56 = vpop.f32.mrf.mxu0  ;;  %v9540_v2 = vld [vmem:[#allocation33_spill] sm:$0xff] }
 0x344   : > { %3056 = vst.msk [vmem:[#allocation5 + $0x20] sm:$0xff] %vm1373_vm4, %v3040_v20  ;;  %v2948_v40 = vadd.f32 %v2885_v27, %v2574_v44  ;;  %v3237_v13 = vshrl.u32 %v3212_v30, 16  ;;  %v3240_v58 = vshll.u32 %v3212_v30, 16  ;;  %v1372_v59 = vsel %vm1318_vm2, %v1370_v25, %v1371_v14  ;;  %v2502_v31 = vpop.f32.mrf.mxu3 }
 0x345   : > { %v2642_v21 = vshrl.u32 %v1370_v25, 16  ;;  %v2645_v51 = vshll.u32 %v1370_v25, 16  ;;  %v2650_v52 = vshrl.u32 %v1372_v59, 16  ;;  %v2653_v8 = vshll.u32 %v1372_v59, 16 }
 0x346   : > { %v2983_v48 = vadd.f32 %v8373_v19, %v2948_v40  ;;  %v3239_v10 = vrot.slane %v3237_v13, 4  ;;  %v3242_v35 = vrot.slane %v3240_v58, 5  ;;  %v2329_v44 = vadd.f32 %v9540_v2, %v8248_v54  ;;  %v8542_v40 = vpop.f32.mrf.mxu2 }
 0x347   : > { %v2644_v42 = vrot.slane %v2642_v21, 3  ;;  %v2647_v28 = vrot.slane %v2645_v51, 4  ;;  %v2652_v6 = vrot.slane %v2650_v52, 3  ;;  %v2655_v36 = vrot.slane %v2653_v8, 4 }
 0x348   : > { %v3015_v17 = vmax.f32 %v2983_v48, 0.0  ;;  %v3243_v37 = vor.u32 %v3242_v35, %v3239_v10  ;;  %v2493_v29 = vadd.f32 %v8472_v0, %v2329_v44  ;;  %v2326_v13 = vadd.f32 %v9541_v4, %v8243_v49  ;;  %v9542_v0 = vld [vmem:[#allocation34_spill] sm:$0xff]  ;;  %v9544_v4 = vld [vmem:[#allocation37_spill] sm:$0xff] }
 0x349   : > { %v2887_v50 = vpop.f32.mrf.mxu1  ;;  %v2648_v27 = vor.u32 %v2647_v28, %v2644_v42  ;;  %v2656_v30 = vor.u32 %v2655_v36, %v2652_v6  ;;  %v2331_v10 = vadd.f32 %v9542_v0, %v8254_v32 }
 0x34a   : > { %v3041_v22 = vmax.f32 %v3013_v7, %v3015_v17  ;;  %3304 = vrot.lane.b32.xlu1 %v3243_v37, %s7113_s24  ;;  %v2888_v20 = vadd.f32 %v2887_v50, %v8451_v39  ;;  %v2490_v39 = vadd.f32 %v8454_v60, %v2326_v13  ;;  %v2582_v48 = vadd.f32 %v8479_v45, %v2493_v29  ;;  %v2591_v7 = vpop.f32.mrf.mxu0 }
 0x34b   : > { %v2657_v25 = vsel %vm1464_vm3, %v2648_v27, %v2656_v30  ;;  %v2495_v37 = vadd.f32 %v8491_v34, %v2331_v10  ;;  %v2339_v13 = vadd.f32 %v9544_v4, %v8269_v16  ;;  %v9546_v10 = vld [vmem:[#allocation36_spill] sm:$0xff] }
 0x34c   : > { %3057 = vst.msk [vmem:[#allocation5 + $0x28] sm:$0xff] %vm1373_vm4, %v3041_v22  ;;  %6117 = vmatmul.msk.bf16.gmra.mxu1 %vm1373_vm4, %v9538_v61  ;;  %v2949_v58 = vadd.f32 %v2888_v20, %v2577_v5  ;;  %v2579_v17 = vadd.f32 %v8463_v33, %v2490_v39  ;;  %v2504_v51 = vpop.f32.mrf.mxu3 }
 0x34e   : > { %v2984_v35 = vadd.f32 %v8373_v19, %v2949_v58  ;;  %v2813_v32 = vpop.f32.mrf.mxu2 }
 0x350   : > { %v3016_v50 = vmax.f32 %v2984_v35, 0.0 }
 0x351   : > { %v2889_v55 = vpop.f32.mrf.mxu1 }
 0x352   : > { %v2890_v49 = vadd.f32 %v2889_v55, %v8468_v1  ;;  %v2584_v1 = vadd.f32 %v8502_v12, %v2495_v37  ;;  %v6719_v55 = vld [vmem:[%s9442_s5 + $0x90] sm:$0xff] }
 0x353   : > { %v3072_v47 = vld [vmem:[#allocation5 + $0x20] ss:$2 sm:$0xff]  ;;  %v3088_v15 = vld [vmem:[#allocation5 + $0x21] ss:$2 sm:$0xff]  ;;  %3735 = vmatpush.bf16.msrb.mxu3 %v6719_v55 }
 0x354   : > { %v3101_v23 = vmax.f32 %v3072_v47, %v3088_v15  ;;  %v8573_v44 = vpop.f32.mrf.mxu3 }
 0x356   : > { %v3109_v57 = vpack.c.bf16 %v3101_v23, %v3101_v23  ;;  %v2815_v2 = vpop.f32.mrf.mxu2  ;;  %v9543_v23 = vld [vmem:[#allocation35_spill] sm:$0xff] }
 0x357   : > { %v2334_v20 = vadd.f32 %v9543_v23, %v8259_v62  ;;  %v9545_v62 = vld [vmem:[#allocation47_spill] sm:$0xff]  ;;  %v6718_v23 = vld [vmem:[%s9442_s5 + $0x88] sm:$0xff] }
 0x358   : > { %3121 = vst.msk [vmem:[#allocation3 + $0x28] sm:$0xf] %vm375_vm1, %v3109_v57  ;;  %v2336_v35 = vadd.f32 %v9546_v10, %v9545_v62  ;;  %3736 = vmatpush.bf16.msrb.mxu3 %v6718_v23  ;;  %v9552_v62 = vld [vmem:[#allocation41_spill] sm:$0xff] }
 0x359   : > { %v2892_v54 = vpop.f32.mrf.mxu1  ;;  %v2498_v5 = vadd.f32 %v8514_v53, %v2334_v20 }
 0x35a   : > { %v2893_v43 = vadd.f32 %v2892_v54, %v8486_v11  ;;  %v2950_v11 = vadd.f32 %v2890_v49, %v2579_v17 }
 0x35b   : > { %v2587_v39 = vadd.f32 %v8521_v24, %v2498_v5 }
 0x35c   : > { %v2951_v14 = vadd.f32 %v2893_v43, %v2582_v48  ;;  %6118 = vmatmul.msk.bf16.gmra.mxu1 %vm1373_vm4, %v2657_v25  ;;  %v2985_v34 = vadd.f32 %v8373_v19, %v2950_v11  ;;  %v2503_v48 = vadd.f32 %v2502_v31, %v2339_v13  ;;  %v8584_v0 = vpop.f32.mrf.mxu3 }
 0x35e   : > { %v2986_v60 = vadd.f32 %v8373_v19, %v2951_v14  ;;  %v3017_v6 = vmax.f32 %v2985_v34, 0.0  ;;  %v2818_v25 = vpop.f32.mrf.mxu2  ;;  %v2500_v14 = vadd.f32 %v8530_v41, %v2336_v35  ;;  %v2592_v16 = vadd.f32 %v2591_v7, %v2503_v48 }
 0x35f   : > { %v3137_v45 = vld [vmem:[#allocation3 + $0x28] sm:$0xf] }
 0x360   : > { %v3018_v22 = vmax.f32 %v2986_v60, 0.0  ;;  %v8559_v59 = vunpack.c.l.b16 %v3137_v45  ;;  %v9548_v60 = vld [vmem:[#allocation38_spill] sm:$0xff]  ;;  %v2589_v11 = vadd.f32 %v8535_v56, %v2500_v14 }
 0x361   : > { %v2894_v61 = vpop.f32.mrf.mxu1 }
 0x362   : > { %v3042_v21 = vmax.f32 %v3016_v50, %v3018_v22  ;;  %v2895_v52 = vadd.f32 %v2894_v61, %v8510_v26  ;;  %v3213_v33 = vpack.c.b16 %v8559_v59, %v8559_v59  ;;  %v2593_v26 = vpop.f32.mrf.mxu0 }
 0x364   : > { %3058 = vst.msk [vmem:[#allocation5 + $0x30] sm:$0xff] %vm1373_vm4, %v3042_v21  ;;  %v2952_v8 = vadd.f32 %v2895_v52, %v2584_v1  ;;  %v3245_v18 = vshrl.u32 %v3213_v33, 16  ;;  %v3248_v46 = vshll.u32 %v3213_v33, 16 }
 0x366   : > { %v2987_v12 = vadd.f32 %v8373_v19, %v2952_v8  ;;  %v3247_v42 = vrot.slane %v3245_v18, 4  ;;  %v3250_v28 = vrot.slane %v3248_v46, 5  ;;  %v2820_v1 = vpop.f32.mrf.mxu2 }
 0x368   : > { %v3019_v36 = vmax.f32 %v2987_v12, 0.0  ;;  %v3251_v9 = vor.u32 %v3250_v28, %v3247_v42 }
 0x369   : > { %v2897_v47 = vpop.f32.mrf.mxu1 }
 0x36a   : > { %v3043_v15 = vmax.f32 %v3017_v6, %v3019_v36  ;;  %3306 = vrot.lane.b32.xlu2 %v3251_v9, %s7113_s24  ;;  %v8577_v30 = vpop.f32.mrf.mxu0  ;;  %v2898_v54 = vadd.f32 %v2897_v47, %v8528_v3  ;;  %v9547_v3 = vld [vmem:[#allocation49_spill] sm:$0xff] }
 0x36b   : > { %v2341_v24 = vadd.f32 %v9548_v60, %v9547_v3  ;;  %v9553_v60 = vld [vmem:[#allocation53_spill] sm:$0xff] }
 0x36c   : > { %3059 = vst.msk [vmem:[#allocation5 + $0x38] sm:$0xff] %vm1373_vm4, %v3043_v15  ;;  %v2953_v53 = vadd.f32 %v2898_v54, %v2587_v39 }
 0x36d   : > { %v2505_v22 = vadd.f32 %v2504_v51, %v2341_v24  ;;  %v9554_v24 = vld [vmem:[#allocation40_spill] sm:$0xff] }
 0x36e   : > { %v2988_v31 = vadd.f32 %v8373_v19, %v2953_v53  ;;  %v2823_v15 = vpop.f32.mrf.mxu2 }
 0x36f   : > { %v2594_v8 = vadd.f32 %v2593_v26, %v2505_v22 }
 0x370   : > { %v3020_v41 = vmax.f32 %v2988_v31, 0.0 }
 0x371   : > { %v2899_v27 = vpop.f32.mrf.mxu1 }
 0x372   : > { %v8590_v37 = vpop.f32.mrf.mxu0  ;;  %v2900_v45 = vadd.f32 %v2899_v27, %v8542_v40 }
 0x373   : > { %v3074_v29 = vld [vmem:[#allocation5 + $0x30] ss:$2 sm:$0xff]  ;;  %v3090_v57 = vld [vmem:[#allocation5 + $0x31] ss:$2 sm:$0xff] }
 0x374   : > { %v3102_v58 = vmax.f32 %v3074_v29, %v3090_v57  ;;  %v2954_v7 = vadd.f32 %v2900_v45, %v2589_v11  ;;  %v9549_v29 = vld [vmem:[#allocation51_spill] sm:$0xff]  ;;  %v6732_v45 = vld [vmem:[%s9442_s5 + $0xf8] sm:$0xff] }
 0x375   : > { %v9550_v57 = vld [vmem:[#allocation39_spill] sm:$0xff]  ;;  %4073 = vmatpush.bf16.msra.mxu0 %v6732_v45 }
 0x376   : > { %v3110_v43 = vpack.c.bf16 %v3102_v58, %v3102_v58  ;;  %v2989_v56 = vadd.f32 %v8373_v19, %v2954_v7  ;;  %v2344_v4 = vadd.f32 %v9550_v57, %v9549_v29  ;;  %v2825_v54 = vpop.f32.mrf.mxu2 }
 0x378   : > { %3122 = vst.msk [vmem:[#allocation3 + $0x34] sm:$0xf] %vm375_vm1, %v3110_v43  ;;  %v3021_v9 = vmax.f32 %v2989_v56, 0.0  ;;  %v2508_v58 = vadd.f32 %v8573_v44, %v2344_v4  ;;  %v9551_v43 = vld [vmem:[#allocation55_spill] sm:$0xff]  ;;  %v2346_v44 = vadd.f32 %v9554_v24, %v9553_v60  ;;  %v6736_v60 = vld [vmem:[%s9442_s5 + $0x118] sm:$0xff] }
 0x379   : > { %v2902_v49 = vpop.f32.mrf.mxu1  ;;  %v2349_v10 = vadd.f32 %v9552_v62, %v9551_v43  ;;  %v6729_v4 = vld [vmem:[%s9442_s5 + $0xe0] sm:$0xff]  ;;  %4106 = vmatpush.bf16.msra.mxu2 %v6736_v60 }
 0x37a   : > { %v2903_v17 = vadd.f32 %v2902_v49, %v2813_v32  ;;  %v2512_v32 = vpop.f32.mrf.mxu3  ;;  %v2601_v42 = vpop.f32.mrf.mxu0  ;;  %v2597_v14 = vadd.f32 %v8577_v30, %v2508_v58 }
 0x37c   : > { %v2955_v50 = vadd.f32 %v2903_v17, %v2592_v16  ;;  %v2513_v16 = vadd.f32 %v2512_v32, %v2349_v10 }
 0x37e   : > { %v2990_v61 = vadd.f32 %v8373_v19, %v2955_v50  ;;  %v2602_v11 = vadd.f32 %v2601_v42, %v2513_v16  ;;  %v8630_v32 = vpop.f32.mrf.mxu2  ;;  %v3151_v42 = vld [vmem:[#allocation3 + $0x14] sm:$0x1] }
 0x37f   : > { %v3139_v21 = vld [vmem:[#allocation3 + $0x34] sm:$0xf]  ;;  %v3331_v23 = vunpack.c.l.b16 %v3151_v42 }
 0x380   : > { %v3022_v52 = vmax.f32 %v2990_v61, 0.0  ;;  %v8598_v33 = vunpack.c.l.b16 %v3139_v21  ;;  %v9555_v21 = vld [vmem:[#allocation56_spill] sm:$0xff] }
 0x381   : > { %v2904_v34 = vpop.f32.mrf.mxu1  ;;  %v3341_v10 = vpack.c.b16 %v3331_v23, %v8441_v63 }
 0x382   : > { %v3044_v18 = vmax.f32 %v3020_v41, %v3022_v52  ;;  %v2905_v46 = vadd.f32 %v2904_v34, %v2815_v2  ;;  %v3214_v40 = vpack.c.b16 %v8598_v33, %v8598_v33  ;;  %v2514_v20 = vpop.f32.mrf.mxu3  ;;  %v2603_v5 = vpop.f32.mrf.mxu0  ;;  %v9556_v41 = vld [vmem:[#allocation42_spill] sm:$0xff]  ;;  %v6717_v34 = vld [vmem:[%s9442_s5 + $0x80] sm:$0xff] }
 0x383   : > { %v2351_v7 = vadd.f32 %v9556_v41, %v9555_v21  ;;  %3737 = vmatpush.bf16.msrb.mxu3 %v6717_v34  ;;  %v9557_v21 = vld [vmem:[#allocation57_spill] sm:$0xff]  ;;  %v9558_v41 = vld [vmem:[#allocation43_spill] sm:$0xff]  ;;  %v3134_v34 = vld [vmem:[#allocation3 + $0x18] sm:$0x8] }
 0x384   : > { %3060 = vst.msk [vmem:[#allocation5 + $0x40] sm:$0xff] %vm1373_vm4, %v3044_v18  ;;  %v2956_v51 = vadd.f32 %v2905_v46, %v2594_v8  ;;  %v3253_v55 = vshrl.u32 %v3214_v40, 16  ;;  %v3256_v12 = vshll.u32 %v3214_v40, 16  ;;  %v6731_v8 = vld [vmem:[%s9442_s5 + $0xf0] sm:$0xff] }
 0x385   : > { %v2515_v40 = vadd.f32 %v2514_v20, %v2351_v7  ;;  %4074 = vmatpush.bf16.msra.mxu0 %v6731_v8  ;;  %v2354_v7 = vadd.f32 %v9558_v41, %v9557_v21 }
 0x386   : > { %v2991_v28 = vadd.f32 %v8373_v19, %v2956_v51  ;;  %v3255_v6 = vrot.slane %v3253_v55, 4  ;;  %v3258_v36 = vrot.slane %v3256_v12, 5  ;;  %v8662_v58 = vpop.f32.mrf.mxu2 }
 0x388   : > { %v3023_v47 = vmax.f32 %v2991_v28, 0.0  ;;  %v3259_v26 = vor.u32 %v3258_v36, %v3255_v6  ;;  %v6716_v6 = vld [vmem:[%s9442_s5 + $0x78] sm:$0xff]  ;;  %v6730_v36 = vld [vmem:[%s9442_s5 + $0xe8] sm:$0xff] }
 0x389   : > { %v2907_v2 = vpop.f32.mrf.mxu1  ;;  %3738 = vmatpush.bf16.msrb.mxu3 %v6716_v6  ;;  %4075 = vmatpush.bf16.msra.mxu0 %v6730_v36  ;;  %v9559_v36 = vld [vmem:[#allocation59_spill] sm:$0xff] }
 0x38a   : > { %v3045_v27 = vmax.f32 %v3021_v9, %v3023_v47  ;;  %3308 = vrot.lane.b32.xlu0 %v3259_v26, %s7113_s24  ;;  %v8615_v53 = vpop.f32.mrf.mxu3  ;;  %v2908_v49 = vadd.f32 %v2907_v2, %v2818_v25  ;;  %v8624_v50 = vpop.f32.mrf.mxu0  ;;  %v2510_v25 = vadd.f32 %v8584_v0, %v2346_v44  ;;  %v2604_v9 = vadd.f32 %v2603_v5, %v2515_v40  ;;  %v3132_v47 = vld [vmem:[#allocation3 + $0xc] sm:$0x8]  ;;  %v6715_v5 = vld [vmem:[%s9442_s5 + $0x70] sm:$0xff]  ;;  %v3152_v44 = vld [vmem:[#allocation3 + $0x20] sm:$0x1] }
 0x38c   : > { %3061 = vst.msk [vmem:[#allocation5 + $0x48] sm:$0xff] %vm1373_vm4, %v3045_v27  ;;  %v2957_v3 = vadd.f32 %v2908_v49, %v2597_v14  ;;  %v2599_v46 = vadd.f32 %v8590_v37, %v2510_v25  ;;  %v6713_v25 = vld [vmem:[%s9442_s5 + $0x60] sm:$0xff] }
 0x38d   : > { %3739 = vmatpush.bf16.msrb.mxu3 %v6715_v5  ;;  %4076 = vmatpush.bf16.msra.mxu0 %v6729_v4 }
 0x38e   : > { %v2992_v30 = vadd.f32 %v8373_v19, %v2957_v3  ;;  %v6728_v3 = vld [vmem:[%s9442_s5 + $0xd8] sm:$0xff]  ;;  %v2833_v8 = vpop.f32.mrf.mxu2 }
 0x390   : > { %v3024_v51 = vmax.f32 %v2992_v30, 0.0  ;;  %v6735_v30 = vld [vmem:[%s9442_s5 + $0x110] sm:$0xff] }
 0x391   : > { %v2909_v13 = vpop.f32.mrf.mxu1  ;;  %4077 = vmatpush.bf16.msra.mxu0 %v6728_v3  ;;  %4107 = vmatpush.bf16.msra.mxu2 %v6735_v30 }
 0x392   : > { %v2910_v52 = vadd.f32 %v2909_v13, %v2820_v1  ;;  %v8638_v18 = vpop.f32.mrf.mxu3  ;;  %v8652_v2 = vpop.f32.mrf.mxu0  ;;  %v3182_v13 = vunpack.c.l.b16 %v3132_v47 }
 0x393   : > { %v3076_v39 = vld [vmem:[#allocation5 + $0x40] ss:$2 sm:$0xff]  ;;  %v3092_v48 = vld [vmem:[#allocation5 + $0x41] ss:$2 sm:$0xff] }
 0x394   : > { %v3103_v35 = vmax.f32 %v3076_v39, %v3092_v48  ;;  %v2958_v12 = vadd.f32 %v2910_v52, %v2599_v46  ;;  %v3201_v24 = vpack.c.b16 %v8441_v63, %v3182_v13  ;;  %v6727_v63 = vld [vmem:[%s9442_s5 + $0xd0] sm:$0xff] }
 0x395   : > { %4078 = vmatpush.bf16.msra.mxu0 %v6727_v63 }
 0x396   : > { %v3111_v17 = vpack.c.bf16 %v3103_v35, %v3103_v35  ;;  %v2993_v20 = vadd.f32 %v8373_v19, %v2958_v12  ;;  %v6734_v12 = vld [vmem:[%s9442_s5 + $0x108] sm:$0xff] }
 0x397   : > { %4108 = vmatpush.bf16.msra.mxu2 %v6734_v12 }
 0x398   : > { %3123 = vst.msk [vmem:[#allocation3 + $0x40] sm:$0xf] %vm375_vm1, %v3111_v17  ;;  %v3025_v62 = vmax.f32 %v2993_v20, 0.0  ;;  %v6714_v17 = vld [vmem:[%s9442_s5 + $0x68] sm:$0xff] }
 0x399   : > { %v2912_v31 = vpop.f32.mrf.mxu1  ;;  %3740 = vmatpush.bf16.msrb.mxu3 %v6714_v17  ;;  %v9564_v17 = vld [vmem:[#allocation46_spill] sm:$0xff] }
 0x39a   : > { %v2913_v22 = vadd.f32 %v2912_v31, %v2823_v15  ;;  %v2522_v43 = vpop.f32.mrf.mxu3 }
 0x39c   : > { %v2959_v61 = vadd.f32 %v2913_v22, %v2602_v11  ;;  %v3303_v35 = vpop.permute.xlu0 %3302  ;;  %v3351_v11 = vrot.slane %v3341_v10, 5  ;;  %v3332_v22 = vunpack.c.l.b16 %v3152_v44  ;;  %v9562_v10 = vld [vmem:[#allocation44_spill] sm:$0xff] }
 0x39d   : > { %v3365_v45 = vsel %vm1373_vm4, %v3201_v24, %v3303_v35  ;;  %3741 = vmatpush.bf16.msrb.mxu3 %v6713_v25  ;;  %v3136_v35 = vld [vmem:[#allocation3 + $0x24] sm:$0x8]  ;;  %v2835_v25 = vpop.f32.mrf.mxu2 }
 0x39e   : > { %v2994_v0 = vadd.f32 %v8373_v19, %v2959_v61  ;;  %v2611_v61 = vpop.f32.mrf.mxu0  ;;  %v3404_v52 = vunpack.c.h.b16 %v3365_v45  ;;  %v3405_v46 = vunpack.c.h.b16 %v3351_v11  ;;  %v3402_v20 = vunpack.c.l.b16 %v3365_v45 }
 0x39f   : > { %v3141_v56 = vld [vmem:[#allocation3 + $0x40] sm:$0xf]  ;;  %v3403_v4 = vunpack.c.l.b16 %v3351_v11  ;;  %v3186_v21 = vunpack.c.l.b16 %v3136_v35 }
 0x3a0   : > { %v3026_v1 = vmax.f32 %v2994_v0, 0.0  ;;  %v8642_v55 = vunpack.c.l.b16 %v3141_v56  ;;  %v2518_v0 = vadd.f32 %v8615_v53, %v2354_v7  ;;  %v3342_v56 = vpack.c.b16 %v3332_v22, %v8504_v38 }
 0x3a1   : > { %v2914_v28 = vpop.f32.mrf.mxu1  ;;  %v3433_v42 = vpack.c.b16 %v3405_v46, %v3404_v52  ;;  %v3432_v60 = vpack.c.b16 %v3403_v4, %v3402_v20 }
 0x3a2   : > { %v3046_v37 = vmax.f32 %v3024_v51, %v3026_v1  ;;  %v2915_v26 = vadd.f32 %v2914_v28, %v2825_v54  ;;  %v3215_v15 = vpack.c.b16 %v8642_v55, %v8642_v55  ;;  %v3153_v51 = vld [vmem:[#allocation3 + $0x2c] sm:$0x1]  ;;  %v2524_v28 = vpop.f32.mrf.mxu3  ;;  %v2607_v23 = vadd.f32 %v8624_v50, %v2518_v0 }
 0x3a3   : > { %v6726_v1 = vld [vmem:[%s9442_s5 + $0xc8] sm:$0xff]  ;;  %v3468_v13 = vshrl.u32 %v3433_v42, 16  ;;  %v3471_v46 = vshll.u32 %v3433_v42, 16 }
 0x3a4   : > { %3062 = vst.msk [vmem:[#allocation5 + $0x50] sm:$0xff] %vm1373_vm4, %v3046_v37  ;;  %v2960_v27 = vadd.f32 %v2915_v26, %v2604_v9  ;;  %v3261_v29 = vshrl.u32 %v3215_v15, 16  ;;  %v3264_v57 = vshll.u32 %v3215_v15, 16  ;;  %v9560_v37 = vld [vmem:[#allocation45_spill] sm:$0xff]  ;;  %v3184_v26 = vunpack.c.l.b16 %v3134_v34  ;;  %4079 = vmatpush.bf16.msra.mxu0 %v6726_v1 }
 0x3a5   : > { %v2359_v53 = vadd.f32 %v9560_v37, %v9559_v36  ;;  %v3333_v15 = vunpack.c.l.b16 %v3153_v51  ;;  %v3470_v63 = vrot.slane %v3468_v13, 7  ;;  %v2838_v35 = vpop.f32.mrf.mxu2 }
 0x3a6   : > { %v2995_v54 = vadd.f32 %v8373_v19, %v2960_v27  ;;  %v3263_v39 = vrot.slane %v3261_v29, 4  ;;  %v3266_v48 = vrot.slane %v3264_v57, 5  ;;  %v3352_v29 = vrot.slane %v3342_v56, 5  ;;  %v6725_v57 = vld [vmem:[%s9442_s5 + $0xc0] sm:$0xff] }
 0x3a7   : > { %v2523_v5 = vadd.f32 %v2522_v43, %v2359_v53  ;;  %v3202_v44 = vpack.c.b16 %v8504_v38, %v3184_v26  ;;  %v3463_v38 = vshrl.u32 %v3432_v60, 16  ;;  %v3473_v12 = vor.u32 %v3471_v46, %v3470_v63 }
 0x3a8   : > { %v3027_v49 = vmax.f32 %v2995_v54, 0.0  ;;  %v3267_v16 = vor.u32 %v3266_v48, %v3263_v39  ;;  %v2613_v48 = vpop.f32.mrf.mxu0  ;;  %4080 = vmatpush.bf16.msra.mxu0 %v6725_v57  ;;  %v3407_v24 = vunpack.c.l.b16 %v3352_v29  ;;  %v3409_v22 = vunpack.c.h.b16 %v3352_v29 }
 0x3a9   : > { %v2917_v14 = vpop.f32.mrf.mxu1  ;;  %v2612_v45 = vadd.f32 %v2611_v61, %v2523_v5 }
 0x3aa   : > { %v3047_v31 = vmax.f32 %v3025_v62, %v3027_v49  ;;  %3310 = vrot.lane.b32.xlu1 %v3267_v16, %s7113_s24  ;;  %v2918_v6 = vadd.f32 %v2917_v14, %v8630_v32  ;;  %v6733_v32 = vld [vmem:[%s9442_s5 + $0x100] sm:$0xff]  ;;  %v9561_v62 = vld [vmem:[#allocation58_spill] sm:$0xff]  ;;  %v3343_v49 = vpack.c.b16 %v3333_v15, %v8559_v59  ;;  %v9563_v16 = vld [vmem:[#allocation60_spill] sm:$0xff]  ;;  %v3203_v15 = vpack.c.b16 %v8559_v59, %v3186_v21 }
 0x3ab   : > { %v2356_v50 = vadd.f32 %v9562_v10, %v9561_v62  ;;  %4109 = vmatpush.bf16.msra.mxu2 %v6733_v32  ;;  %v3131_v14 = vld [vmem:[#allocation3 + $0x4] sm:$0xf]  ;;  %v2361_v3 = vadd.f32 %v9564_v17, %v9563_v16  ;;  %v8746_v59 = vld [vmem:[%s9441_s4] ss:$0 sm:$0xff] }
 0x3ac   : > { %3063 = vst.msk [vmem:[#allocation5 + $0x58] sm:$0xff] %vm1373_vm4, %v3047_v31  ;;  %v2961_v39 = vadd.f32 %v2918_v6, %v2607_v23  ;;  %v8717_v41 = vunpack.c.l.b16 %v3131_v14  ;;  %v3353_v0 = vrot.slane %v3343_v49, 5 }
 0x3ad   : > { %v2520_v31 = vadd.f32 %v8638_v18, %v2356_v50  ;;  %v8720_v18 = vpop.f32.mrf.mxu3  ;;  %v2525_v6 = vadd.f32 %v2524_v28, %v2361_v3 }
 0x3ae   : > { %v2996_v30 = vadd.f32 %v8373_v19, %v2961_v39  ;;  %v3411_v26 = vunpack.c.l.b16 %v3353_v0  ;;  %v3413_v57 = vunpack.c.h.b16 %v3353_v0 }
 0x3af   : > { %v2614_v5 = vadd.f32 %v2613_v48, %v2525_v6 }
 0x3b0   : > { %v3028_v36 = vmax.f32 %v2996_v30, 0.0  ;;  %v8735_v23 = vpop.f32.mrf.mxu0 }
 0x3b1   : > { %v2919_v40 = vpop.f32.mrf.mxu1 }
 0x3b2   : > { %v2920_v7 = vadd.f32 %v2919_v40, %v8662_v58  ;;  %v3210_v58 = vpack.c.b16 %v8717_v41, %v8717_v41 }
 0x3b3   : > { %v3078_v9 = vld [vmem:[#allocation5 + $0x50] ss:$2 sm:$0xff]  ;;  %v3094_v47 = vld [vmem:[#allocation5 + $0x51] ss:$2 sm:$0xff] }
 0x3b4   : > { %v3104_v27 = vmax.f32 %v3078_v9, %v3094_v47  ;;  %v6120_v47 = vrot.slane %v3463_v38, 11  ;;  %v3221_v50 = vshrl.u32 %v3210_v58, 16 }
 0x3b6   : > { %v3112_v54 = vpack.c.bf16 %v3104_v27, %v3104_v27  ;;  %v8739_v32 = vsel %vm8728_vm7, %v6120_v47, %v3473_v12 }
 0x3b7   : > { %v3622_v30 = vunpack.c.l.b16 %v8739_v32 }
 0x3b8   : > { %3124 = vst.msk [vmem:[#allocation3 + $0x4c] sm:$0xf] %vm375_vm1, %v3112_v54 }
 0x3b9   : > { %v2922_v43 = vpop.f32.mrf.mxu1 }
 0x3ba   : > { %v2923_v11 = vadd.f32 %v2922_v43, %v2833_v8  ;;  %v2609_v8 = vadd.f32 %v8652_v2, %v2520_v31 }
 0x3bc   : > { %v2963_v52 = vadd.f32 %v2923_v11, %v2612_v45  ;;  %v3305_v34 = vpop.permute.xlu1 %3304  ;;  %v2962_v42 = vadd.f32 %v2920_v7, %v2609_v8  ;;  %v3224_v11 = vshll.u32 %v3210_v58, 16 }
 0x3bd   : > { %v3368_v61 = vsel %vm1373_vm4, %v3202_v44, %v3305_v34 }
 0x3be   : > { %v2998_v56 = vadd.f32 %v8373_v19, %v2963_v52  ;;  %v3406_v51 = vunpack.c.l.b16 %v3368_v61  ;;  %v3408_v1 = vunpack.c.h.b16 %v3368_v61  ;;  %v2997_v54 = vadd.f32 %v8746_v59, %v2962_v42  ;;  %v2840_v42 = vpop.f32.mrf.mxu2 }
 0x3bf   : > { %v3143_v2 = vld [vmem:[#allocation3 + $0x4c] sm:$0xf] }
 0x3c0   : > { %v3030_v37 = vmax.f32 %v2998_v56, 0.0  ;;  %v3434_v53 = vpack.c.b16 %v3407_v24, %v3406_v51  ;;  %v3435_v9 = vpack.c.b16 %v3409_v22, %v3408_v1  ;;  %v8733_v28 = vunpack.c.l.b16 %v3143_v2  ;;  %v2529_v24 = vpop.f32.mrf.mxu3  ;;  %v2618_v1 = vpop.f32.mrf.mxu0 }
 0x3c1   : > { %v2924_v19 = vpop.f32.mrf.mxu1  ;;  %v3029_v21 = vmax.f32 %v2997_v54, 0.0  ;;  %v3223_v56 = vrot.slane %v3221_v50, 4  ;;  %v3226_v51 = vrot.slane %v3224_v11, 5 }
 0x3c2   : > { %v3048_v20 = vmax.f32 %v3028_v36, %v3030_v37  ;;  %v3476_v27 = vshrl.u32 %v3434_v53, 16  ;;  %v3481_v29 = vshrl.u32 %v3435_v9, 16  ;;  %v2925_v4 = vadd.f32 %v2924_v19, %v2835_v25  ;;  %v9567_v53 = vld [vmem:[#allocation61_spill] sm:$0xff] }
 0x3c3   : > { %v3216_v13 = vpack.c.b16 %v8733_v28, %v8733_v28  ;;  %v3484_v62 = vshll.u32 %v3435_v9, 16  ;;  %v3227_v37 = vor.u32 %v3226_v51, %v3223_v56  ;;  %v9568_v9 = vld [vmem:[#allocation48_spill] sm:$0xff] }
 0x3c4   : > { %3064 = vst.msk [vmem:[#allocation5 + $0x60] sm:$0xff] %vm1373_vm4, %v3048_v20  ;;  %v3483_v39 = vrot.slane %v3481_v29, 7  ;;  %v3307_v10 = vpop.permute.xlu2 %3306  ;;  %v2964_v49 = vadd.f32 %v2925_v4, %v2614_v5  ;;  %v6121_v17 = vrot.slane %v3476_v27, 11  ;;  %v2364_v2 = vadd.f32 %v9568_v9, %v9567_v53  ;;  %v9569_v4 = vld [vmem:[#allocation63_spill] sm:$0xff]  ;;  %v3149_v9 = vld [vmem:[#allocation3 + $0x70] sm:$0xf] }
 0x3c5   : > { %v3371_v48 = vsel %vm1373_vm4, %v3203_v15, %v3307_v10  ;;  %v3269_v14 = vshrl.u32 %v3216_v13, 16  ;;  %v3272_v16 = vshll.u32 %v3216_v13, 16  ;;  %v9570_v13 = vld [vmem:[#allocation52_spill] sm:$0xff] }
 0x3c6   : > { %v3486_v3 = vor.u32 %v3484_v62, %v3483_v39  ;;  %v3410_v60 = vunpack.c.l.b16 %v3371_v48  ;;  %v3412_v43 = vunpack.c.h.b16 %v3371_v48  ;;  %v2999_v44 = vadd.f32 %v8746_v59, %v2964_v49 }
 0x3c7   : > { %v3271_v31 = vrot.slane %v3269_v14, 4  ;;  %v3274_v45 = vrot.slane %v3272_v16, 5  ;;  %v2528_v29 = vadd.f32 %v8720_v18, %v2364_v2  ;;  %v2369_v54 = vadd.f32 %v9570_v13, %v9569_v4  ;;  %v2843_v16 = vpop.f32.mrf.mxu2 }
 0x3c8   : > { %v8754_v22 = vsel %vm8728_vm7, %v6121_v17, %v3486_v3  ;;  %v3436_v25 = vpack.c.b16 %v3411_v26, %v3410_v60  ;;  %v3437_v63 = vpack.c.b16 %v3413_v57, %v3412_v43  ;;  %v3031_v7 = vmax.f32 %v2999_v44, 0.0  ;;  %v2532_v19 = vpop.f32.mrf.mxu3  ;;  %v2621_v18 = vpop.f32.mrf.mxu0  ;;  %v9571_v17 = vld [vmem:[#allocation62_spill] sm:$0xff] }
 0x3c9   : > { %v2927_v52 = vpop.f32.mrf.mxu1  ;;  %v3275_v34 = vor.u32 %v3274_v45, %v3271_v31  ;;  %v3624_v0 = vunpack.c.l.b16 %v8754_v22  ;;  %v3625_v26 = vunpack.c.h.b16 %v8754_v22  ;;  %v2617_v49 = vadd.f32 %v8735_v23, %v2528_v29  ;;  %v9572_v3 = vld [vmem:[#allocation50_spill] sm:$0xff]  ;;  %v6702_v22 = vld [vmem:[%s9442_s5 + $0x8] sm:$0xff] }
 0x3ca   : > { %v3489_v38 = vshrl.u32 %v3436_v25, 16  ;;  %v3494_v46 = vshrl.u32 %v3437_v63, 16  ;;  %v3049_v61 = vmax.f32 %v3029_v21, %v3031_v7  ;;  %v3497_v6 = vshll.u32 %v3437_v63, 16  ;;  %v9573_v25 = vld [vmem:[#allocation64_spill] sm:$0xff]  ;;  %v9574_v63 = vld [vmem:[#allocation54_spill] sm:$0xff] }
 0x3cb   : > { %3312 = vrot.lane.b32.xlu2 %v3275_v34, %s7113_s24  ;;  %v3638_v8 = vpack.c.b16 %v3624_v0, %v3622_v30  ;;  %v2928_v10 = vadd.f32 %v2927_v52, %v2838_v35  ;;  %v2533_v48 = vadd.f32 %v2532_v19, %v2369_v54  ;;  %v2366_v60 = vadd.f32 %v9572_v3, %v9571_v17 }
 0x3cc   : > { %v3496_v12 = vrot.slane %v3494_v46, 7  ;;  %3065 = vst.msk [vmem:[#allocation5 + $0x68] sm:$0xff] %vm1373_vm4, %v3049_v61  ;;  %v6122_v36 = vrot.slane %v3489_v38, 11  ;;  %v2371_v21 = vadd.f32 %v9574_v63, %v9573_v25 }
 0x3cd   : > { %3742 = vmatmul.bf16.vlgmr.msrb.gmra.mxu3 %v3638_v8  ;;  %v2965_v43 = vadd.f32 %v2928_v10, %v2617_v49  ;;  %v2530_v35 = vadd.f32 %v2529_v24, %v2366_v60  ;;  %v2622_v31 = vadd.f32 %v2621_v18, %v2533_v48 }
 0x3ce   : > { %v3499_v58 = vor.u32 %v3497_v6, %v3496_v12 }
 0x3cf   : > { %v3000_v7 = vadd.f32 %v8746_v59, %v2965_v43  ;;  %v2619_v34 = vadd.f32 %v2618_v1, %v2530_v35  ;;  %v2845_v24 = vpop.f32.mrf.mxu2 }
 0x3d0   : > { %v8766_v47 = vsel %vm8728_vm7, %v6122_v36, %v3499_v58  ;;  %v2534_v11 = vpop.f32.mrf.mxu3  ;;  %v2623_v46 = vpop.f32.mrf.mxu0 }
 0x3d1   : > { %v3626_v15 = vunpack.c.l.b16 %v8766_v47  ;;  %v3627_v20 = vunpack.c.h.b16 %v8766_v47  ;;  %v2929_v27 = vpop.f32.mrf.mxu1  ;;  %v3032_v61 = vmax.f32 %v3000_v7, 0.0 }
 0x3d2   : > { %v2930_v23 = vadd.f32 %v2929_v27, %v2840_v42  ;;  %v8802_v27 = vunpack.c.l.b16 %v3149_v9 }
 0x3d3   : > { %v8776_v57 = vpack.c.b16 %v3627_v20, %v3625_v26  ;;  %v8780_v5 = vpack.c.b16 %v3626_v15, %v3624_v0  ;;  %3300 = vrot.lane.b32.xlu2 %v3227_v37, %s7113_s24  ;;  %v3080_v39 = vld [vmem:[#allocation5 + $0x60] ss:$2 sm:$0xff]  ;;  %v3096_v62 = vld [vmem:[#allocation5 + $0x61] ss:$2 sm:$0xff]  ;;  %v2535_v0 = vadd.f32 %v2534_v11, %v2371_v21 }
 0x3d4   : > { %v3105_v50 = vmax.f32 %v3080_v39, %v3096_v62  ;;  %v2966_v8 = vadd.f32 %v2930_v23, %v2619_v34  ;;  %v3219_v54 = vpack.c.b16 %v8802_v27, %v8802_v27 }
 0x3d5   : > { %4081 = vmatmul.bf16.vlgmr.msra.gmra.mxu0 %v8780_v5  ;;  %6329 = vmatmul.msk.bf16.vlgmr.msra.gmra.mxu2 %vm1373_vm4, %v8776_v57  ;;  %v2624_v36 = vadd.f32 %v2623_v46, %v2535_v0 }
 0x3d6   : > { %v3113_v14 = vpack.c.bf16 %v3105_v50, %v3105_v50  ;;  %v3001_v1 = vadd.f32 %v8746_v59, %v2966_v8  ;;  %v3293_v50 = vshrl.u32 %v3219_v54, 16  ;;  %v3296_v18 = vshll.u32 %v3219_v54, 16 }
 0x3d8   : > { %3125 = vst.msk [vmem:[#allocation3 + $0x58] sm:$0xf] %vm375_vm1, %v3113_v14  ;;  %v3033_v39 = vmax.f32 %v3001_v1, 0.0  ;;  %v3295_v48 = vrot.slane %v3293_v50, 4  ;;  %v3298_v14 = vrot.slane %v3296_v18, 5 }
 0x3d9   : > { %v2932_v44 = vpop.f32.mrf.mxu1 }
 0x3da   : > { %v2933_v45 = vadd.f32 %v2932_v44, %v2843_v16  ;;  %v3154_v16 = vld [vmem:[#allocation3 + $0x38] sm:$0x1]  ;;  %v3299_v17 = vor.u32 %v3298_v14, %v3295_v48  ;;  %v3138_v44 = vld [vmem:[#allocation3 + $0x30] sm:$0x8] }
 0x3dc   : > { %v2967_v52 = vadd.f32 %v2933_v45, %v2622_v31  ;;  %v3188_v45 = vunpack.c.l.b16 %v3138_v44 }
 0x3de   : > { %v3002_v38 = vadd.f32 %v8746_v59, %v2967_v52  ;;  %v3204_v25 = vpack.c.b16 %v8598_v33, %v3188_v45 }
 0x3df   : > { %v3145_v51 = vld [vmem:[#allocation3 + $0x58] sm:$0xf] }
 0x3e0   : > { %v3034_v56 = vmax.f32 %v3002_v38, 0.0  ;;  %v8796_v6 = vunpack.c.l.b16 %v3145_v51 }
 0x3e1   : > { %v2934_v12 = vpop.f32.mrf.mxu1 }
 0x3e2   : > { %v3050_v58 = vmax.f32 %v3032_v61, %v3034_v56  ;;  %v2935_v37 = vadd.f32 %v2934_v12, %v2845_v24  ;;  %v3217_v42 = vpack.c.b16 %v8796_v6, %v8796_v6 }
 0x3e4   : > { %3066 = vst.msk [vmem:[#allocation5 + $0x70] sm:$0xff] %vm1373_vm4, %v3050_v58  ;;  %v2968_v53 = vadd.f32 %v2935_v37, %v2624_v36  ;;  %v3277_v2 = vshrl.u32 %v3217_v42, 16  ;;  %v3280_v19 = vshll.u32 %v3217_v42, 16 }
 0x3e6   : > { %v3003_v29 = vadd.f32 %v8746_v59, %v2968_v53  ;;  %v3279_v4 = vrot.slane %v3277_v2, 4  ;;  %v3282_v13 = vrot.slane %v3280_v19, 5  ;;  %v3334_v59 = vunpack.c.l.b16 %v3154_v16  ;;  %v3142_v16 = vld [vmem:[#allocation3 + $0x48] sm:$0x8] }
 0x3e8   : > { %v3035_v62 = vmax.f32 %v3003_v29, 0.0  ;;  %v3283_v10 = vor.u32 %v3282_v13, %v3279_v4  ;;  %v3344_v31 = vpack.c.b16 %v3334_v59, %v8598_v33  ;;  %v3155_v13 = vld [vmem:[#allocation3 + $0x44] sm:$0x1] }
 0x3e9   : > { %v3335_v54 = vunpack.c.l.b16 %v3155_v13 }
 0x3ea   : > { %v3051_v49 = vmax.f32 %v3033_v39, %v3035_v62  ;;  %3314 = vrot.lane.b32.xlu0 %v3283_v10, %s7113_s24  ;;  %v3354_v11 = vrot.slane %v3344_v31, 5  ;;  %v3140_v39 = vld [vmem:[#allocation3 + $0x3c] sm:$0x8]  ;;  %v3156_v10 = vld [vmem:[#allocation3 + $0x50] sm:$0x1] }
 0x3eb   : > { %v3345_v62 = vpack.c.b16 %v3335_v54, %v8642_v55  ;;  %v3190_v50 = vunpack.c.l.b16 %v3140_v39  ;;  %v3336_v18 = vunpack.c.l.b16 %v3156_v10  ;;  %v3157_v39 = vld [vmem:[#allocation3 + $0x5c] sm:$0x1]  ;;  %v3144_v10 = vld [vmem:[#allocation3 + $0x54] sm:$0x8] }
 0x3ec   : > { %3067 = vst.msk [vmem:[#allocation5 + $0x78] sm:$0xff] %vm1373_vm4, %v3051_v49  ;;  %v3415_v7 = vunpack.c.l.b16 %v3354_v11  ;;  %v3417_v23 = vunpack.c.h.b16 %v3354_v11 }
 0x3ed   : > { %v3355_v49 = vrot.slane %v3345_v62, 5  ;;  %v3205_v48 = vpack.c.b16 %v8642_v55, %v3190_v50  ;;  %v3346_v47 = vpack.c.b16 %v3336_v18, %v8733_v28  ;;  %v3337_v62 = vunpack.c.l.b16 %v3157_v39 }
 0x3ee   : > { %v3194_v18 = vunpack.c.l.b16 %v3144_v10 }
 0x3ef   : > { %v3347_v50 = vpack.c.b16 %v3337_v62, %v8796_v6 }
 0x3f2   : > { %3318 = vrot.lane.b32.xlu0 %v3299_v17, %s7113_s24  ;;  %v3421_v17 = vunpack.c.h.b16 %v3355_v49 }
 0x3f3   : > { %v3082_v3 = vld [vmem:[#allocation5 + $0x70] ss:$2 sm:$0xff]  ;;  %v3098_v60 = vld [vmem:[#allocation5 + $0x71] ss:$2 sm:$0xff] }
 0x3f4   : > { %v3106_v43 = vmax.f32 %v3082_v3, %v3098_v60  ;;  %v3192_v60 = vunpack.c.l.b16 %v3142_v16 }
 0x3f6   : > { %v3114_v35 = vpack.c.bf16 %v3106_v43, %v3106_v43  ;;  %v3206_v11 = vpack.c.b16 %v8733_v28, %v3192_v60  ;;  %v3159_v60 = vld [vmem:[#allocation3 + $0x74] sm:$0x1] }
 0x3f8   : > { %3126 = vst.msk [vmem:[#allocation3 + $0x64] sm:$0xf] %vm375_vm1, %v3114_v35  ;;  %v3356_v35 = vrot.slane %v3346_v47, 5 }
 0x3fc   : > { %v3309_v63 = vpop.permute.xlu0 %3308 }
 0x3fd   : > { %v3374_v21 = vsel %vm1373_vm4, %v3204_v25, %v3309_v63 }
 0x3fe   : > { %v3414_v52 = vunpack.c.l.b16 %v3374_v21  ;;  %v3416_v34 = vunpack.c.h.b16 %v3374_v21  ;;  %v3423_v21 = vunpack.c.l.b16 %v3356_v35 }
 0x3ff   : > { %v3147_v0 = vld [vmem:[#allocation3 + $0x64] sm:$0xf] }
 0x400   : > { %v3438_v38 = vpack.c.b16 %v3415_v7, %v3414_v52  ;;  %v3439_v46 = vpack.c.b16 %v3417_v23, %v3416_v34  ;;  %v8814_v61 = vunpack.c.l.b16 %v3147_v0  ;;  %v3425_v7 = vunpack.c.h.b16 %v3356_v35 }
 0x402   : > { %v3502_v8 = vshrl.u32 %v3438_v38, 16  ;;  %v3507_v56 = vshrl.u32 %v3439_v46, 16  ;;  %v3218_v51 = vpack.c.b16 %v8814_v61, %v8814_v61  ;;  %v3510_v12 = vshll.u32 %v3439_v46, 16 }
 0x404   : > { %v3509_v24 = vrot.slane %v3507_v56, 7  ;;  %v3285_v33 = vshrl.u32 %v3218_v51, 16  ;;  %v3288_v36 = vshll.u32 %v3218_v51, 16  ;;  %v6123_v58 = vrot.slane %v3502_v8, 11 }
 0x406   : > { %v3512_v37 = vor.u32 %v3510_v12, %v3509_v24  ;;  %v3287_v42 = vrot.slane %v3285_v33, 4  ;;  %v3290_v1 = vrot.slane %v3288_v36, 5 }
 0x408   : > { %v3291_v53 = vor.u32 %v3290_v1, %v3287_v42  ;;  %v3513_v9 = vsel %vm8728_vm7, %v6123_v58, %v3512_v37 }
 0x409   : > { %v3628_v2 = vunpack.c.l.b16 %v3513_v9  ;;  %v3629_v19 = vunpack.c.h.b16 %v3513_v9 }
 0x40a   : > { %3316 = vrot.lane.b32.xlu1 %v3291_v53, %s7113_s24  ;;  %s5691_s24 = sshll.u32 %s9361_s22, 4  ;;  %s5692_s24 = int_to_ptr.vmem [resolvable:$true] %s5691_s24 }
 0x40b   : > { %v3640_v29 = vpack.c.b16 %v3628_v2, %v3626_v15  ;;  %v8825_v4 = vpack.c.b16 %v3629_v19, %v3627_v20  ;;  %v3419_v20 = vunpack.c.l.b16 %v3355_v49  ;;  %v3357_v49 = vrot.slane %v3347_v50, 5 }
 0x40d   : > { %3747 = vmatmul.bf16.gmra.mxu3 %v3640_v29  ;;  %v3429_v47 = vunpack.c.h.b16 %v3357_v49 }
 0x41c   : > { %v3311_v14 = vpop.permute.xlu1 %3310 }
 0x41d   : > { %v3377_v15 = vsel %vm1373_vm4, %v3205_v48, %v3311_v14  ;;  %v3207_v48 = vpack.c.b16 %v8796_v6, %v3194_v18  ;;  %v6722_v6 = vld [vmem:[%s9442_s5 + $0xa8] sm:$0xff] }
 0x41e   : > { %v3418_v59 = vunpack.c.l.b16 %v3377_v15  ;;  %v3420_v3 = vunpack.c.h.b16 %v3377_v15  ;;  %v3427_v15 = vunpack.c.l.b16 %v3357_v49  ;;  %v6708_v49 = vld [vmem:[%s9442_s5 + $0x38] sm:$0xff] }
 0x420   : > { %v3440_v43 = vpack.c.b16 %v3419_v20, %v3418_v59  ;;  %v3441_v44 = vpack.c.b16 %v3421_v17, %v3420_v3 }
 0x422   : > { %v3515_v31 = vshrl.u32 %v3440_v43, 16  ;;  %v3520_v45 = vshrl.u32 %v3441_v44, 16  ;;  %v3523_v55 = vshll.u32 %v3441_v44, 16  ;;  %v3148_v43 = vld [vmem:[#allocation3 + $0x6c] sm:$0x8] }
 0x424   : > { %v3522_v25 = vrot.slane %v3520_v45, 7  ;;  %v6124_v52 = vrot.slane %v3515_v31, 11  ;;  %v3339_v31 = vunpack.c.l.b16 %v3159_v60 }
 0x425   : > { %v3313_v63 = vpop.permute.xlu2 %3312 }
 0x426   : > { %v3380_v23 = vsel %vm1373_vm4, %v3206_v11, %v3313_v63  ;;  %v3525_v34 = vor.u32 %v3523_v55, %v3522_v25  ;;  %v3198_v25 = vunpack.c.l.b16 %v3148_v43 }
 0x427   : > { %v3422_v0 = vunpack.c.l.b16 %v3380_v23  ;;  %v3424_v38 = vunpack.c.h.b16 %v3380_v23 }
 0x428   : > { %v3526_v56 = vsel %vm8728_vm7, %v6124_v52, %v3525_v34  ;;  %v3209_v23 = vpack.c.b16 %v8802_v27, %v3198_v25 }
 0x429   : > { %v3442_v46 = vpack.c.b16 %v3423_v21, %v3422_v0  ;;  %v3443_v8 = vpack.c.b16 %v3425_v7, %v3424_v38  ;;  %v3630_v51 = vunpack.c.l.b16 %v3526_v56  ;;  %v3631_v24 = vunpack.c.h.b16 %v3526_v56 }
 0x42a   : > { %v3349_v21 = vpack.c.b16 %v3339_v31, %v8802_v27  ;;  %v3158_v27 = vld [vmem:[#allocation3 + $0x68] sm:$0x1] }
 0x42b   : > { %v3528_v12 = vshrl.u32 %v3442_v46, 16  ;;  %v3533_v28 = vshrl.u32 %v3443_v8, 16  ;;  %v8835_v33 = vpack.c.b16 %v3630_v51, %v3628_v2  ;;  %v8837_v36 = vpack.c.b16 %v3631_v24, %v3629_v19  ;;  %v6724_v2 = vld [vmem:[%s9442_s5 + $0xb8] sm:$0xff]  ;;  %v6723_v19 = vld [vmem:[%s9442_s5 + $0xb0] sm:$0xff] }
 0x42c   : > { %v3536_v37 = vshll.u32 %v3443_v8, 16  ;;  %3767 = vmatpush.bf16.msra.mxu3 %v6724_v2  ;;  %v3359_v8 = vrot.slane %v3349_v21, 5 }
 0x42d   : > { %v3535_v58 = vrot.slane %v3533_v28, 7  ;;  %4086 = vmatmul.bf16.gmra.mxu0 %v8835_v33  ;;  %6330 = vmatmul.msk.bf16.gmra.mxu2 %vm1373_vm4, %v8837_v36  ;;  %v6125_v42 = vrot.slane %v3528_v12, 11  ;;  %v3338_v28 = vunpack.c.l.b16 %v3158_v27  ;;  %v6703_v27 = vld [vmem:[%s9442_s5 + $0x10] sm:$0xff] }
 0x42f   : > { %v3538_v1 = vor.u32 %v3536_v37, %v3535_v58  ;;  %v3950_v58 = vunpack.c.l.b16 %v3359_v8 }
 0x430   : > { %3768 = vmatpush.bf16.msra.mxu3 %v6723_v19 }
 0x431   : > { %v3539_v53 = vsel %vm8728_vm7, %v6125_v42, %v3538_v1  ;;  %v3146_v1 = vld [vmem:[#allocation3 + $0x60] sm:$0x8] }
 0x432   : > { %v3632_v9 = vunpack.c.l.b16 %v3539_v53  ;;  %v3633_v29 = vunpack.c.h.b16 %v3539_v53  ;;  %v3348_v53 = vpack.c.b16 %v3338_v28, %v8814_v61 }
 0x434   : > { %v3642_v13 = vpack.c.b16 %v3632_v9, %v3630_v51  ;;  %v8844_v54 = vpack.c.b16 %v3633_v29, %v3631_v24  ;;  %3769 = vmatpush.bf16.msra.mxu3 %v6722_v6  ;;  %v6721_v51 = vld [vmem:[%s9442_s5 + $0xa0] sm:$0xff]  ;;  %v3952_v24 = vunpack.c.h.b16 %v3359_v8  ;;  %v3358_v2 = vrot.slane %v3348_v53, 5  ;;  %v6706_v8 = vld [vmem:[%s9442_s5 + $0x28] sm:$0xff] }
 0x436   : > { %3752 = vmatmul.bf16.gmra.mxu3 %v3642_v13 }
 0x438   : > { %3770 = vmatpush.bf16.msra.mxu3 %v6721_v51  ;;  %v3623_v51 = vunpack.c.h.b16 %v8739_v32 }
 0x43c   : > { %3890 = vmatpush.bf16.msrb.mxu3 %v6708_v49 }
 0x45c   : > { %v3315_v14 = vpop.permute.xlu0 %3314 }
 0x45d   : > { %v3383_v16 = vsel %vm1373_vm4, %v3207_v48, %v3315_v14  ;;  %v3579_v48 = vunpack.c.l.b16 %v3358_v2  ;;  %v3581_v14 = vunpack.c.h.b16 %v3358_v2 }
 0x45e   : > { %v3426_v20 = vunpack.c.l.b16 %v3383_v16  ;;  %v3428_v17 = vunpack.c.h.b16 %v3383_v16 }
 0x460   : > { %v3444_v59 = vpack.c.b16 %v3427_v15, %v3426_v20  ;;  %v3445_v3 = vpack.c.b16 %v3429_v47, %v3428_v17  ;;  %v6707_v47 = vld [vmem:[%s9442_s5 + $0x30] sm:$0xff] }
 0x461   : > { %3891 = vmatpush.bf16.msrb.mxu3 %v6707_v47  ;;  %v6768_v47 = vld [vmem:[#allocation9 + $0xf8] sm:$0xff] }
 0x462   : > { %v3541_v44 = vshrl.u32 %v3444_v59, 16  ;;  %v3546_v35 = vshrl.u32 %v3445_v3, 16  ;;  %v3549_v11 = vshll.u32 %v3445_v3, 16  ;;  %4973 = vmatpush.bf16.msra.mxu1 %v6768_v47 }
 0x464   : > { %v3548_v45 = vrot.slane %v3546_v35, 7  ;;  %v6126_v55 = vrot.slane %v3541_v44, 11  ;;  %v3319_v0 = vpop.permute.xlu0 %3318 }
 0x465   : > { %v3389_v56 = vsel %vm1373_vm4, %v3209_v23, %v3319_v0  ;;  %3892 = vmatpush.bf16.msrb.mxu3 %v6706_v8 }
 0x466   : > { %v3551_v63 = vor.u32 %v3549_v11, %v3548_v45  ;;  %v3951_v12 = vunpack.c.h.b16 %v3389_v56  ;;  %v3949_v37 = vunpack.c.l.b16 %v3389_v56  ;;  %v6705_v56 = vld [vmem:[%s9442_s5 + $0x20] sm:$0xff] }
 0x468   : > { %v3552_v7 = vsel %vm8728_vm7, %v6126_v55, %v3551_v63  ;;  %v3954_v42 = vpack.c.b16 %v3952_v24, %v3951_v12  ;;  %v3150_v24 = vld [vmem:[#allocation3 + $0x8] sm:$0x1]  ;;  %v3130_v12 = vld [vmem:[#allocation3] sm:$0x8] }
 0x469   : > { %v3634_v52 = vunpack.c.l.b16 %v3552_v7  ;;  %v3635_v34 = vunpack.c.h.b16 %v3552_v7  ;;  %3893 = vmatpush.bf16.msrb.mxu3 %v6705_v56  ;;  %v3330_v28 = vunpack.c.l.b16 %v3150_v24 }
 0x46a   : > { %v3961_v13 = vshrl.u32 %v3954_v42, 16  ;;  %v3964_v10 = vshll.u32 %v3954_v42, 16 }
 0x46b   : > { %v8862_v38 = vpack.c.b16 %v3634_v52, %v3632_v9  ;;  %v8864_v46 = vpack.c.b16 %v3635_v34, %v3633_v29  ;;  %v3196_v9 = vunpack.c.l.b16 %v3146_v1  ;;  %v3953_v29 = vpack.c.b16 %v3950_v58, %v3949_v37  ;;  %v3301_v1 = vpop.permute.xlu2 %3300 }
 0x46c   : > { %v3963_v62 = vrot.slane %v3961_v13, 7  ;;  %v3180_v58 = vunpack.c.l.b16 %v3130_v12  ;;  %v3340_v37 = vpack.c.b16 %v3330_v28, %v8717_v41 }
 0x46d   : > { %4091 = vmatmul.bf16.gmra.mxu0 %v8862_v38  ;;  %6331 = vmatmul.msk.bf16.gmra.mxu2 %vm1373_vm4, %v8864_v46  ;;  %v3208_v19 = vpack.c.b16 %v8814_v61, %v3196_v9  ;;  %v3956_v39 = vshrl.u32 %v3953_v29, 16  ;;  %v6712_v9 = vld [vmem:[%s9442_s5 + $0x58] sm:$0xff] }
 0x46e   : > { %v3966_v20 = vor.u32 %v3964_v10, %v3963_v62  ;;  %v3200_v42 = vpack.c.b16 %v8717_v41, %v3180_v58 }
 0x46f   : > { %v6256_v61 = vrot.slane %v3956_v39, 11 }
 0x470   : > { %v3362_v53 = vsel %vm1373_vm4, %v3200_v42, %v3301_v1  ;;  %v6744_v42 = vld [vmem:[#allocation9 + $0x38] sm:$0xff] }
 0x471   : > { %v3967_v35 = vsel %vm8728_vm7, %v6256_v61, %v3966_v20  ;;  %v3400_v13 = vunpack.c.h.b16 %v3362_v53  ;;  %v6710_v20 = vld [vmem:[%s9442_s5 + $0x48] sm:$0xff]  ;;  %5231 = vmatpush.bf16.msrb.mxu2 %v6744_v42 }
 0x472   : > { %v3993_v11 = vunpack.c.l.b16 %v3967_v35  ;;  %v3994_v25 = vunpack.c.h.b16 %v3967_v35  ;;  %v6784_v1 = vld [vmem:[#allocation9 + $0x178] sm:$0xff] }
 0x473   : > { %5031 = vmatpush.bf16.msrb.mxu0 %v6784_v1 }
 0x47c   : > { %v3317_v50 = vpop.permute.xlu1 %3316 }
 0x47d   : > { %v3386_v18 = vsel %vm1373_vm4, %v3208_v19, %v3317_v50  ;;  %v3398_v19 = vunpack.c.l.b16 %v3362_v53 }
 0x47e   : > { %v3578_v16 = vunpack.c.l.b16 %v3386_v18  ;;  %v3580_v15 = vunpack.c.h.b16 %v3386_v18 }
 0x480   : > { %v3582_v17 = vpack.c.b16 %v3579_v48, %v3578_v16  ;;  %v3583_v59 = vpack.c.b16 %v3581_v14, %v3580_v15  ;;  %v8927_v15 = vpop.f32.mrf.mxu3 }
 0x482   : > { %v3585_v3 = vshrl.u32 %v3582_v17, 16  ;;  %v3590_v60 = vshrl.u32 %v3583_v59, 16  ;;  %v3593_v44 = vshll.u32 %v3583_v59, 16 }
 0x484   : > { %v3592_v43 = vrot.slane %v3590_v60, 7  ;;  %v6127_v31 = vrot.slane %v3585_v3, 11  ;;  %v6709_v3 = vld [vmem:[%s9442_s5 + $0x40] sm:$0xff] }
 0x485   : > { %v6767_v60 = vld [vmem:[#allocation9 + $0xf0] sm:$0xff] }
 0x486   : > { %v3595_v45 = vor.u32 %v3593_v44, %v3592_v43  ;;  %4974 = vmatpush.bf16.msra.mxu1 %v6767_v60 }
 0x488   : > { %v3596_v6 = vsel %vm8728_vm7, %v6127_v31, %v3595_v45  ;;  %v8934_v17 = vpop.f32.mrf.mxu3  ;;  %v6766_v45 = vld [vmem:[#allocation9 + $0xe8] sm:$0xff] }
 0x489   : > { %v3636_v55 = vunpack.c.l.b16 %v3596_v6  ;;  %v3637_v63 = vunpack.c.h.b16 %v3596_v6 }
 0x48a   : > { %4975 = vmatpush.bf16.msra.mxu1 %v6766_v45 }
 0x48b   : > { %v3644_v21 = vpack.c.b16 %v3636_v55, %v3634_v52  ;;  %v3995_v7 = vpack.c.b16 %v3993_v11, %v3636_v55  ;;  %v3996_v23 = vpack.c.b16 %v3994_v25, %v3637_v63  ;;  %v3645_v0 = vpack.c.b16 %v3637_v63, %v3635_v34  ;;  %v6704_v34 = vld [vmem:[%s9442_s5 + $0x18] sm:$0xff]  ;;  %v6765_v55 = vld [vmem:[#allocation9 + $0xe0] sm:$0xff] }
 0x48c   : > { %v3639_v52 = vpack.c.b16 %v3625_v26, %v3623_v51  ;;  %3894 = vmatpush.bf16.msrb.mxu3 %v6704_v34  ;;  %v6701_v26 = vld [vmem:[%s9442_s5] sm:$0xff] }
 0x48d   : > { %3757 = vmatmul.bf16.gmra.mxu3 %v3644_v21  ;;  %4096 = vmatmul.bf16.gmra.mxu0 %v3995_v7  ;;  %v6763_v34 = vld [vmem:[#allocation9 + $0xd0] sm:$0xff] }
 0x48e   : > { %6332 = vmatmul.msk.bf16.gmra.mxu2 %vm1373_vm4, %v3996_v23  ;;  %4976 = vmatpush.bf16.msra.mxu1 %v6765_v55  ;;  %v6764_v23 = vld [vmem:[#allocation9 + $0xd8] sm:$0xff] }
 0x490   : > { %3895 = vmatpush.bf16.msrb.mxu3 %v6703_v27  ;;  %v8936_v59 = vpop.f32.mrf.mxu3 }
 0x492   : > { %4977 = vmatpush.bf16.msra.mxu1 %v6764_v23 }
 0x494   : > { %3896 = vmatpush.bf16.msrb.mxu3 %v6702_v22 }
 0x496   : > { %4978 = vmatpush.bf16.msra.mxu1 %v6763_v34 }
 0x498   : > { %3897 = vmatpush.bf16.msrb.mxu3 %v6701_v26 }
 0x49d   : > { %6200 = vmatmul.msk.bf16.vlgmr.msra.gmra.mxu3 %vm1373_vm4, %v3639_v52 }
 0x49e   : > { %3923 = vmatpush.bf16.msra.mxu3 %v6712_v9  ;;  %v4179_v9 = vld [vmem:[#allocation4 + $0x4] sm:$0xf] }
 0x4ad   : > { %6201 = vmatmul.msk.bf16.gmra.mxu3 %vm1373_vm4, %v8825_v4  ;;  %v3350_v4 = vrot.slane %v3340_v37, 5 }
 0x4af   : > { %v3401_v29 = vunpack.c.h.b16 %v3350_v4  ;;  %v3399_v2 = vunpack.c.l.b16 %v3350_v4  ;;  %v6743_v4 = vld [vmem:[#allocation9 + $0x30] sm:$0xff] }
 0x4b0   : > { %5232 = vmatpush.bf16.msrb.mxu2 %v6743_v4  ;;  %v6779_v4 = vld [vmem:[#allocation9 + $0x150] sm:$0xff] }
 0x4b1   : > { %v3431_v39 = vpack.c.b16 %v3401_v29, %v3400_v13  ;;  %v3430_v62 = vpack.c.b16 %v3399_v2, %v3398_v19  ;;  %v6783_v2 = vld [vmem:[#allocation9 + $0x170] sm:$0xff]  ;;  %v6742_v19 = vld [vmem:[#allocation9 + $0x28] sm:$0xff] }
 0x4b2   : > { %5032 = vmatpush.bf16.msrb.mxu0 %v6783_v2 }
 0x4b3   : > { %v3455_v10 = vshrl.u32 %v3431_v39, 16  ;;  %v3450_v41 = vshrl.u32 %v3430_v62, 16  ;;  %v3458_v18 = vshll.u32 %v3431_v39, 16  ;;  %v9005_v39 = vunpack.c.l.b16 %v4179_v9  ;;  %v6738_v9 = vld [vmem:[#allocation9 + $0x8] sm:$0xff] }
 0x4b4   : > { %5233 = vmatpush.bf16.msrb.mxu2 %v6742_v19 }
 0x4b5   : > { %v3457_v50 = vrot.slane %v3455_v10, 7  ;;  %v6119_v49 = vrot.slane %v3450_v41, 11  ;;  %v4248_v62 = vpack.c.b16 %v9005_v39, %v9005_v39  ;;  %v6782_v10 = vld [vmem:[#allocation9 + $0x168] sm:$0xff]  ;;  %v6741_v41 = vld [vmem:[#allocation9 + $0x20] sm:$0xff] }
 0x4b6   : > { %5033 = vmatpush.bf16.msrb.mxu0 %v6782_v10 }
 0x4b7   : > { %v3460_v48 = vor.u32 %v3458_v18, %v3457_v50  ;;  %v4259_v50 = vshrl.u32 %v4248_v62, 16  ;;  %v4262_v18 = vshll.u32 %v4248_v62, 16 }
 0x4b8   : > { %5234 = vmatpush.bf16.msrb.mxu2 %v6741_v41 }
 0x4b9   : > { %v3461_v14 = vsel %vm8728_vm7, %v6119_v49, %v3460_v48  ;;  %v4261_v49 = vrot.slane %v4259_v50, 4  ;;  %v4264_v48 = vrot.slane %v4262_v18, 5  ;;  %v6737_v18 = vld [vmem:[#allocation9] sm:$0xff] }
 0x4ba   : > { %v3792_v16 = vunpack.c.l.b16 %v3461_v14  ;;  %v3793_v35 = vunpack.c.h.b16 %v3461_v14 }
 0x4bc   : > { %v3794_v61 = vpack.c.b16 %v3622_v30, %v3792_v16  ;;  %v8942_v30 = vpop.f32.mrf.mxu3  ;;  %v3795_v11 = vpack.c.b16 %v3623_v51, %v3793_v35  ;;  %v4082_v51 = vpop.f32.mrf.mxu0  ;;  %v9013_v35 = vld [vmem:[%s9443_s6] ss:$0 sm:$0xff] }
 0x4bd   : > { %6202 = vmatmul.msk.bf16.gmra.mxu3 %vm1373_vm4, %v8844_v54  ;;  %v6711_v54 = vld [vmem:[%s9442_s5 + $0x50] sm:$0xff] }
 0x4be   : > { %3924 = vmatpush.bf16.msra.mxu3 %v6711_v54 }
 0x4c2   : > { %3925 = vmatpush.bf16.msra.mxu3 %v6710_v20  ;;  %v6740_v20 = vld [vmem:[#allocation9 + $0x18] sm:$0xff] }
 0x4c3   : > { %5235 = vmatpush.bf16.msrb.mxu2 %v6740_v20 }
 0x4c4   : > { %v8945_v43 = vpop.f32.mrf.mxu3  ;;  %v8983_v27 = vpop.f32.mrf.mxu0 }
 0x4c6   : > { %3926 = vmatpush.bf16.msra.mxu3 %v6709_v3  ;;  %v4265_v3 = vor.u32 %v4264_v48, %v4261_v49 }
 0x4c8   : > { %v4378_v19 = vunpack.c.l.b16 %v4265_v3 }
 0x4cc   : > { %v8947_v44 = vpop.f32.mrf.mxu3  ;;  %v8989_v24 = vpop.f32.mrf.mxu0 }
 0x4cd   : > { %6203 = vmatmul.msk.bf16.gmra.mxu3 %vm1373_vm4, %v3645_v0 }
 0x4d4   : > { %v8995_v58 = vpop.f32.mrf.mxu0 }
 0x4dd   : > { %3898 = vmatmul.bf16.vlgmr.msrb.gmra.mxu3 %v3794_v61  ;;  %v6781_v61 = vld [vmem:[#allocation9 + $0x160] sm:$0xff] }
 0x4de   : > { %6810 = vmatpush.bf16.msrb.mxu3 %v6768_v47  ;;  %5034 = vmatpush.bf16.msrb.mxu0 %v6781_v61 }
 0x4e2   : > { %6811 = vmatpush.bf16.msrb.mxu3 %v6767_v60 }
 0x4e6   : > { %6812 = vmatpush.bf16.msrb.mxu3 %v6766_v45 }
 0x4ea   : > { %6813 = vmatpush.bf16.msrb.mxu3 %v6765_v55  ;;  %v9001_v29 = vpop.f32.mrf.mxu0  ;;  %v6739_v55 = vld [vmem:[#allocation9 + $0x10] sm:$0xff] }
 0x4eb   : > { %5236 = vmatpush.bf16.msrb.mxu2 %v6739_v55 }
 0x4ed   : > { %3903 = vmatmul.bf16.gmra.mxu3 %v8780_v5 }
 0x4ee   : > { %6814 = vmatpush.bf16.msrb.mxu3 %v6764_v23 }
 0x4ef   : > { %5237 = vmatpush.bf16.msrb.mxu2 %v6738_v9 }
 0x4f2   : > { %6815 = vmatpush.bf16.msrb.mxu3 %v6763_v34  ;;  %v4094_v45 = vpop.f32.mrf.mxu0 }
 0x4f3   : > { %5238 = vmatpush.bf16.msrb.mxu2 %v6737_v18 }
 0x4fd   : > { %3908 = vmatmul.bf16.gmra.mxu3 %v8835_v33 }
 0x50a   : > { %v4097_v41 = vpop.f32.mrf.mxu0 }
 0x50d   : > { %3913 = vmatmul.bf16.gmra.mxu3 %v8862_v38 }
 0x510   : > { %v3758_v5 = vpop.f32.mrf.mxu3 }
 0x518   : > { %v8950_v31 = vpop.f32.mrf.mxu3 }
 0x51d   : > { %6252 = vmatmul.msk.bf16.vlgmr.msra.gmra.mxu3 %vm1373_vm4, %v3795_v11  ;;  %v6762_v11 = vld [vmem:[#allocation9 + $0xc8] sm:$0xff] }
 0x51e   : > { %4979 = vmatpush.bf16.msra.mxu1 %v6762_v11  ;;  %6816 = vmatpush.bf16.msrb.mxu3 %v6762_v11 }
 0x520   : > { %v3772_v25 = vpop.f32.mrf.mxu3 }
 0x521   : > { %v3773_v54 = vadd.f32 %v3772_v25, %v8927_v15  ;;  %v6780_v25 = vld [vmem:[#allocation9 + $0x158] sm:$0xff] }
 0x522   : > { %5035 = vmatpush.bf16.msrb.mxu0 %v6780_v25 }
 0x526   : > { %5036 = vmatpush.bf16.msrb.mxu0 %v6779_v4 }
 0x528   : > { %v8955_v33 = vpop.f32.mrf.mxu3 }
 0x529   : > { %v3775_v23 = vadd.f32 %v8955_v33, %v8934_v17 }
 0x52d   : > { %6253 = vmatmul.msk.bf16.gmra.mxu3 %vm1373_vm4, %v8776_v57 }
 0x530   : > { %v8959_v6 = vpop.f32.mrf.mxu3 }
 0x531   : > { %v3778_v48 = vadd.f32 %v8959_v6, %v8936_v59 }
 0x538   : > { %v8961_v38 = vpop.f32.mrf.mxu3 }
 0x53d   : > { %6254 = vmatmul.msk.bf16.gmra.mxu3 %vm1373_vm4, %v8837_v36  ;;  %v4111_v36 = vpop.f32.mrf.mxu2 }
 0x53e   : > { %v4112_v60 = vadd.f32 %v4111_v36, %v4082_v51  ;;  %v4178_v36 = vld [vmem:[#allocation4] sm:$0x8] }
 0x53f   : > { %v4228_v2 = vunpack.c.l.b16 %v4178_v36 }
 0x540   : > { %v8965_v32 = vpop.f32.mrf.mxu3 }
 0x548   : > { %v8967_v63 = vpop.f32.mrf.mxu3 }
 0x54d   : > { %6255 = vmatmul.msk.bf16.gmra.mxu3 %vm1373_vm4, %v8864_v46  ;;  %v8981_v46 = vpop.f32.mrf.mxu2 }
 0x54e   : > { %v4114_v17 = vadd.f32 %v8981_v46, %v8983_v27 }
 0x550   : > { %v3787_v21 = vpop.f32.mrf.mxu3 }
 0x551   : > { %v8971_v7 = vadd.f32 %v3787_v21, %v3758_v5  ;;  %v4380_v21 = vunpack.c.h.b16 %v4265_v3 }
 0x553   : > { %v4412_v62 = vpack.c.b16 %v4380_v21, %v9005_v39 }
 0x555   : > { %v8987_v26 = vpop.f32.mrf.mxu2  ;;  %v4448_v49 = vshrl.u32 %v4412_v62, 16 }
 0x557   : > { %v4450_v3 = vrot.slane %v4448_v49, 7  ;;  %v9071_v49 = vld [vmem:[#allocation4 + $0x38] sm:$0x1] }
 0x558   : > { %v8973_v57 = vpop.f32.mrf.mxu3 }
 0x55d   : > { %v8993_v28 = vpop.f32.mrf.mxu2 }
 0x55e   : > { %v4119_v59 = vadd.f32 %v8993_v28, %v8995_v58  ;;  %v3783_v28 = vadd.f32 %v8965_v32, %v8945_v43  ;;  %v3785_v58 = vadd.f32 %v8967_v63, %v8947_v44  ;;  %v9057_v32 = vld [vmem:[#allocation4 + $0x2c] sm:$0x1] }
 0x560   : > { %v3899_v0 = vpop.f32.mrf.mxu3 }
 0x561   : > { %v3900_v14 = vadd.f32 %v3899_v0, %v3773_v54  ;;  %v4410_v54 = vpack.c.b16 %v4378_v19, %v4228_v2 }
 0x563   : > { %v4443_v20 = vshrl.u32 %v4410_v54, 16  ;;  %v9069_v54 = vld [vmem:[#allocation4 + $0x24] sm:$0x8] }
 0x565   : > { %v8999_v53 = vpop.f32.mrf.mxu2 }
 0x566   : > { %v9032_v6 = vadd.f32 %v8999_v53, %v9001_v29  ;;  %v6333_v53 = vrot.slane %v4443_v20, 11 }
 0x568   : > { %v8975_v8 = vpop.f32.mrf.mxu3 }
 0x569   : > { %v3902_v51 = vadd.f32 %v8975_v8, %v3775_v23  ;;  %v6778_v8 = vld [vmem:[#allocation9 + $0x148] sm:$0xff] }
 0x56a   : > { %5037 = vmatpush.bf16.msrb.mxu0 %v6778_v8 }
 0x56d   : > { %v4123_v16 = vpop.f32.mrf.mxu2 }
 0x570   : > { %v8977_v56 = vpop.f32.mrf.mxu3 }
 0x571   : > { %v3905_v46 = vadd.f32 %v8977_v56, %v3778_v48  ;;  %v9034_v56 = vadd.f32 %v4123_v16, %v4094_v45  ;;  %v6761_v16 = vld [vmem:[#allocation9 + $0xc0] sm:$0xff] }
 0x572   : > { %4980 = vmatpush.bf16.msra.mxu1 %v6761_v16  ;;  %6817 = vmatpush.bf16.msrb.mxu3 %v6761_v16 }
 0x575   : > { %v4126_v42 = vpop.f32.mrf.mxu2 }
 0x578   : > { %v8979_v52 = vpop.f32.mrf.mxu3 }
 0x57d   : > { %v4128_v21 = vpop.f32.mrf.mxu2 }
 0x580   : > { %v8985_v22 = vpop.f32.mrf.mxu3 }
 0x581   : > { %v3910_v43 = vadd.f32 %v8985_v22, %v3783_v28 }
 0x588   : > { %v8991_v12 = vpop.f32.mrf.mxu3 }
 0x589   : > { %v9055_v44 = vadd.f32 %v8991_v12, %v3785_v58 }
 0x590   : > { %v8997_v37 = vpop.f32.mrf.mxu3 }
 0x598   : > { %v9003_v13 = vpop.f32.mrf.mxu3 }
 0x5a0   : > { %v3928_v47 = vpop.f32.mrf.mxu3 }
 0x5a1   : > { %v3929_v5 = vadd.f32 %v3928_v47, %v3900_v14  ;;  %v4199_v47 = vld [vmem:[#allocation4 + $0x14] sm:$0x1] }
 0x5a2   : > { %v4349_v55 = vunpack.c.l.b16 %v4199_v47  ;;  %v4351_v47 = vunpack.c.l.b16 %v9057_v32 }
 0x5a3   : > { %v4131_v15 = vadd.f32 %v4112_v60, %v3929_v5  ;;  %v4451_v60 = vshll.u32 %v4412_v62, 16  ;;  %v6777_v5 = vld [vmem:[#allocation9 + $0x140] sm:$0xff] }
 0x5a4   : > { %5038 = vmatpush.bf16.msrb.mxu0 %v6777_v5  ;;  %v9059_v62 = vld [vmem:[#allocation4 + $0x18] sm:$0x8]  ;;  %v6751_v5 = vld [vmem:[#allocation9 + $0x70] sm:$0xff] }
 0x5a5   : > { %v4142_v0 = vadd.f32 %v9013_v35, %v4131_v15  ;;  %v4117_v15 = vadd.f32 %v8987_v26, %v8989_v24  ;;  %v3780_v26 = vadd.f32 %v8961_v38, %v8942_v30  ;;  %v4453_v29 = vor.u32 %v4451_v60, %v4450_v3  ;;  %v4200_v38 = vld [vmem:[#allocation4 + $0x20] sm:$0x1] }
 0x5a6   : > { %v4350_v12 = vunpack.c.l.b16 %v4200_v38 }
 0x5a7   : > { %v4150_v34 = vmax.f32 %v4142_v0, 0.0  ;;  %v9036_v0 = vadd.f32 %v4126_v42, %v4097_v41  ;;  %v4180_v42 = vld [vmem:[#allocation4 + $0xc] sm:$0x8]  ;;  %v3907_v4 = vadd.f32 %v8979_v52, %v3780_v26  ;;  %v9067_v22 = vsel %vm8728_vm7, %v6333_v53, %v4453_v29 }
 0x5a8   : > { %v3930_v1 = vpop.f32.mrf.mxu3 }
 0x5a9   : > { %v4158_v33 = vpack.c.bf16 %v4150_v34, %v4150_v34  ;;  %v3931_v10 = vadd.f32 %v3930_v1, %v3902_v51  ;;  %v4099_v51 = vpop.f32.mrf.mxu0 }
 0x5aa   : > { %v9046_v45 = vadd.f32 %v4128_v21, %v4099_v51 }
 0x5ab   : > { %4168 = vst [vmem:[#allocation4 + $0x10] sm:$0xf] %v4158_v33  ;;  %v4132_v50 = vadd.f32 %v4114_v17, %v3931_v10  ;;  %v9063_v17 = vadd.f32 %v8997_v37, %v8971_v7  ;;  %v4230_v33 = vunpack.c.l.b16 %v4180_v42  ;;  %v6752_v10 = vld [vmem:[#allocation9 + $0x78] sm:$0xff]  ;;  %v4232_v37 = vunpack.c.l.b16 %v9059_v62 }
 0x5ac   : > { %5260 = vmatpush.bf16.msrb.mxu1 %v6752_v10 }
 0x5ad   : > { %v4143_v14 = vadd.f32 %v9013_v35, %v4132_v50 }
 0x5af   : > { %v4151_v27 = vmax.f32 %v4143_v14, 0.0 }
 0x5b0   : > { %v3933_v61 = vpop.f32.mrf.mxu3  ;;  %5261 = vmatpush.bf16.msrb.mxu1 %v6751_v5 }
 0x5b1   : > { %v4159_v11 = vpack.c.bf16 %v4151_v27, %v4151_v27  ;;  %v3934_v25 = vadd.f32 %v3933_v61, %v3905_v46  ;;  %v5060_v61 = vunpack.c.l.b16 %v9067_v22 }
 0x5b2   : > { %v4181_v23 = vld [vmem:[#allocation4 + $0x10] sm:$0xf] }
 0x5b3   : > { %4169 = vst [vmem:[#allocation4 + $0x1c] sm:$0xf] %v4159_v11  ;;  %v4133_v24 = vadd.f32 %v4117_v15, %v3934_v25  ;;  %v9040_v36 = vunpack.c.l.b16 %v4181_v23  ;;  %v4234_v15 = vunpack.c.l.b16 %v9069_v54  ;;  %v4352_v11 = vunpack.c.l.b16 %v9071_v49 }
 0x5b5   : > { %v4144_v34 = vadd.f32 %v9013_v35, %v4133_v24  ;;  %v4249_v30 = vpack.c.b16 %v9040_v36, %v9040_v36  ;;  %v4359_v1 = vpack.c.b16 %v4349_v55, %v9040_v36 }
 0x5b7   : > { %v4152_v63 = vmax.f32 %v4144_v34, 0.0  ;;  %v4267_v9 = vshrl.u32 %v4249_v30, 16  ;;  %v4270_v2 = vshll.u32 %v4249_v30, 16  ;;  %v4369_v19 = vrot.slane %v4359_v1, 5  ;;  %v6750_v1 = vld [vmem:[#allocation9 + $0x68] sm:$0xff] }
 0x5b8   : > { %v3935_v52 = vpop.f32.mrf.mxu3  ;;  %5262 = vmatpush.bf16.msrb.mxu1 %v6750_v1 }
 0x5b9   : > { %v4160_v41 = vpack.c.bf16 %v4152_v63, %v4152_v63  ;;  %v3936_v50 = vadd.f32 %v3935_v52, %v3907_v4  ;;  %v4269_v8 = vrot.slane %v4267_v9, 4  ;;  %v4272_v18 = vrot.slane %v4270_v2, 5 }
 0x5ba   : > { %v4183_v48 = vld [vmem:[#allocation4 + $0x1c] sm:$0xf]  ;;  %v4383_v14 = vunpack.c.l.b16 %v4369_v19  ;;  %v4385_v7 = vunpack.c.h.b16 %v4369_v19 }
 0x5bb   : > { %4170 = vst [vmem:[#allocation4 + $0x28] sm:$0xf] %v4160_v41  ;;  %v4134_v46 = vadd.f32 %v4119_v59, %v3936_v50  ;;  %v4273_v27 = vor.u32 %v4272_v18, %v4269_v8  ;;  %v9076_v20 = vunpack.c.l.b16 %v4183_v48  ;;  %v6749_v8 = vld [vmem:[#allocation9 + $0x60] sm:$0xff] }
 0x5bc   : > { %v4415_v3 = vpack.c.b16 %v4383_v14, %v4383_v14  ;;  %v4417_v60 = vpack.c.b16 %v4385_v7, %v4385_v7  ;;  %5263 = vmatpush.bf16.msrb.mxu1 %v6749_v8 }
 0x5bd   : > { %v4145_v25 = vadd.f32 %v9013_v35, %v4134_v46  ;;  %v4382_v55 = vunpack.c.l.b16 %v4273_v27  ;;  %v4384_v21 = vunpack.c.h.b16 %v4273_v27  ;;  %v4360_v23 = vpack.c.b16 %v4350_v12, %v9076_v20 }
 0x5be   : > { %v4482_v26 = vshrl.u32 %v4415_v3, 16  ;;  %v4487_v59 = vshrl.u32 %v4417_v60, 16  ;;  %v4490_v24 = vshll.u32 %v4417_v60, 16  ;;  %v4250_v51 = vpack.c.b16 %v9076_v20, %v9076_v20 }
 0x5bf   : > { %v4153_v28 = vmax.f32 %v4145_v25, 0.0  ;;  %v4414_v58 = vpack.c.b16 %v4382_v55, %v4230_v33  ;;  %v4416_v53 = vpack.c.b16 %v4384_v21, %v9040_v36  ;;  %v4370_v29 = vrot.slane %v4360_v23, 5 }
 0x5c0   : > { %v3938_v16 = vpop.f32.mrf.mxu3  ;;  %v6336_v34 = vrot.slane %v4482_v26, 11  ;;  %v4489_v42 = vrot.slane %v4487_v59, 7  ;;  %v4275_v30 = vshrl.u32 %v4250_v51, 16  ;;  %v4278_v38 = vshll.u32 %v4250_v51, 16 }
 0x5c1   : > { %v4161_v4 = vpack.c.bf16 %v4153_v28, %v4153_v28  ;;  %v3939_v32 = vadd.f32 %v3938_v16, %v3910_v43  ;;  %v4469_v63 = vshrl.u32 %v4414_v58, 16  ;;  %v4474_v9 = vshrl.u32 %v4416_v53, 16 }
 0x5c2   : > { %v4477_v2 = vshll.u32 %v4416_v53, 16  ;;  %v4387_v19 = vunpack.c.l.b16 %v4370_v29  ;;  %v4389_v52 = vunpack.c.h.b16 %v4370_v29  ;;  %v4492_v12 = vor.u32 %v4490_v24, %v4489_v42  ;;  %v4185_v10 = vld [vmem:[#allocation4 + $0x28] sm:$0xf] }
 0x5c3   : > { %4171 = vst [vmem:[#allocation4 + $0x34] sm:$0xf] %v4161_v4  ;;  %v4135_v36 = vadd.f32 %v9032_v6, %v3939_v32  ;;  %v6335_v33 = vrot.slane %v4469_v63, 11  ;;  %v4476_v41 = vrot.slane %v4474_v9, 7  ;;  %v4277_v50 = vrot.slane %v4275_v30, 4 }
 0x5c4   : > { %v4419_v18 = vpack.c.b16 %v4387_v19, %v4387_v19  ;;  %v4421_v48 = vpack.c.b16 %v4389_v52, %v4389_v52  ;;  %v9088_v43 = vsel %vm8728_vm7, %v6336_v34, %v4492_v12  ;;  %v4280_v14 = vrot.slane %v4278_v38, 5 }
 0x5c5   : > { %v4146_v7 = vadd.f32 %v9013_v35, %v4135_v36  ;;  %v4479_v46 = vor.u32 %v4477_v2, %v4476_v41  ;;  %v4783_v27 = vunpack.c.l.b16 %v9088_v43  ;;  %v4235_v3 = vunpack.c.l.b16 %v4185_v10 }
 0x5c6   : > { %v4508_v60 = vshrl.u32 %v4419_v18, 16  ;;  %v4513_v5 = vshrl.u32 %v4421_v48, 16  ;;  %v4516_v6 = vshll.u32 %v4421_v48, 16  ;;  %v4281_v25 = vor.u32 %v4280_v14, %v4277_v50 }
 0x5c7   : > { %v4154_v55 = vmax.f32 %v4146_v7, 0.0  ;;  %v9094_v21 = vsel %vm8728_vm7, %v6335_v33, %v4479_v46  ;;  %v4251_v23 = vpack.c.b16 %v4235_v3, %v4235_v3  ;;  %v4361_v26 = vpack.c.b16 %v4351_v47, %v4235_v3  ;;  %v6748_v33 = vld [vmem:[#allocation9 + $0x58] sm:$0xff] }
 0x5c8   : > { %v3940_v59 = vpop.f32.mrf.mxu3  ;;  %v4781_v24 = vunpack.c.l.b16 %v9094_v21  ;;  %v6338_v51 = vrot.slane %v4508_v60, 11  ;;  %v4515_v28 = vrot.slane %v4513_v5, 7  ;;  %v4386_v58 = vunpack.c.l.b16 %v4281_v25  ;;  %5264 = vmatpush.bf16.msrb.mxu1 %v6748_v33  ;;  %v6747_v5 = vld [vmem:[#allocation9 + $0x50] sm:$0xff] }
 0x5c9   : > { %v4162_v53 = vpack.c.bf16 %v4154_v55, %v4154_v55  ;;  %v3941_v29 = vadd.f32 %v3940_v59, %v9055_v44  ;;  %v4388_v16 = vunpack.c.h.b16 %v4281_v25  ;;  %v4283_v34 = vshrl.u32 %v4251_v23, 16 }
 0x5ca   : > { %v5063_v42 = vpack.c.b16 %v4781_v24, %v5060_v61  ;;  %v4518_v30 = vor.u32 %v4516_v6, %v4515_v28  ;;  %v4418_v47 = vpack.c.b16 %v4386_v58, %v4232_v37  ;;  %v4286_v38 = vshll.u32 %v4251_v23, 16  ;;  %v4187_v1 = vld [vmem:[#allocation4 + $0x34] sm:$0xf] }
 0x5cb   : > { %4172 = vst [vmem:[#allocation4 + $0x40] sm:$0xf] %v4162_v53  ;;  %v4136_v4 = vadd.f32 %v9034_v56, %v3941_v29  ;;  %v4420_v32 = vpack.c.b16 %v4388_v16, %v9076_v20  ;;  %v4285_v63 = vrot.slane %v4283_v34, 4  ;;  %v9106_v44 = vunpack.c.l.b16 %v4187_v1 }
 0x5cc   : > { %5239 = vmatmul.bf16.vlgmr.msrb.gmra.mxu2 %v5063_v42  ;;  %v9110_v9 = vsel %vm8728_vm7, %v6338_v51, %v4518_v30  ;;  %v4495_v61 = vshrl.u32 %v4418_v47, 16  ;;  %v4288_v2 = vrot.slane %v4286_v38, 5  ;;  %v4371_v19 = vrot.slane %v4361_v26, 5  ;;  %5265 = vmatpush.bf16.msrb.mxu1 %v6747_v5  ;;  %v6746_v47 = vld [vmem:[#allocation9 + $0x48] sm:$0xff]  ;;  %v6800_v38 = vld [vmem:[#allocation9 + $0x1f8] sm:$0xff]  ;;  %v6799_v5 = vld [vmem:[#allocation9 + $0x1f0] sm:$0xff] }
 0x5cd   : > { %v4147_v62 = vadd.f32 %v9013_v35, %v4136_v4  ;;  %v4786_v37 = vunpack.c.l.b16 %v9110_v9  ;;  %v4500_v52 = vshrl.u32 %v4420_v32, 16  ;;  %v4503_v12 = vshll.u32 %v4420_v32, 16  ;;  %5583 = vmatpush.bf16.msra.mxu2 %v6800_v38  ;;  %v4188_v38 = vld [vmem:[#allocation4 + $0x3c] sm:$0x8] }
 0x5ce   : > { %v6337_v56 = vrot.slane %v4495_v61, 11  ;;  %v4289_v10 = vor.u32 %v4288_v2, %v4285_v63  ;;  %v4362_v20 = vpack.c.b16 %v4352_v11, %v9106_v44  ;;  %v4391_v36 = vunpack.c.l.b16 %v4371_v19 }
 0x5cf   : > { %v4155_v41 = vmax.f32 %v4147_v62, 0.0  ;;  %v4807_v50 = vpack.c.b16 %v4786_v37, %v4783_v27  ;;  %v4502_v8 = vrot.slane %v4500_v52, 7  ;;  %v4393_v18 = vunpack.c.h.b16 %v4371_v19 }
 0x5d0   : > { %v3943_v48 = vpop.f32.mrf.mxu3  ;;  %v4390_v14 = vunpack.c.l.b16 %v4289_v10  ;;  %v4392_v7 = vunpack.c.h.b16 %v4289_v10  ;;  %v4372_v46 = vrot.slane %v4362_v20, 5  ;;  %v4423_v60 = vpack.c.b16 %v4391_v36, %v4391_v36  ;;  %v4186_v10 = vld [vmem:[#allocation4 + $0x30] sm:$0x8]  ;;  %5266 = vmatpush.bf16.msrb.mxu1 %v6746_v47 }
 0x5d1   : > { %v4163_v6 = vpack.c.bf16 %v4155_v41, %v4155_v41  ;;  %v3944_v49 = vadd.f32 %v3943_v48, %v9063_v17  ;;  %5039 = vmatmul.bf16.vlgmr.msrb.gmra.mxu0 %v4807_v50  ;;  %v4505_v11 = vor.u32 %v4503_v12, %v4502_v8  ;;  %v4425_v25 = vpack.c.b16 %v4393_v18, %v4393_v18 }
 0x5d2   : > { %v4422_v55 = vpack.c.b16 %v4390_v14, %v4234_v15  ;;  %v4424_v23 = vpack.c.b16 %v4392_v7, %v4235_v3  ;;  %v4395_v26 = vunpack.c.l.b16 %v4372_v46  ;;  %v4397_v59 = vunpack.c.h.b16 %v4372_v46  ;;  %v4189_v20 = vld [vmem:[#allocation4 + $0x40] sm:$0xf]  ;;  %v6745_v46 = vld [vmem:[#allocation9 + $0x40] sm:$0xff]  ;;  %5584 = vmatpush.bf16.msra.mxu2 %v6799_v5 }
 0x5d3   : > { %v3790_v51 = vadd.f32 %v8973_v57, %v8950_v31  ;;  %4173 = vst [vmem:[#allocation4 + $0x4c] sm:$0xf] %v4163_v6  ;;  %v4137_v28 = vadd.f32 %v9036_v0, %v3944_v49  ;;  %v9129_v58 = vsel %vm8728_vm7, %v6337_v56, %v4505_v11  ;;  %v4539_v17 = vshrl.u32 %v4425_v25, 16 }
 0x5d4   : > { %v4784_v53 = vunpack.c.l.b16 %v9129_v58  ;;  %v4521_v29 = vshrl.u32 %v4422_v55, 16  ;;  %v4526_v16 = vshrl.u32 %v4424_v23, 16  ;;  %v4534_v54 = vshrl.u32 %v4423_v60, 16  ;;  %v6792_v60 = vld [vmem:[#allocation9 + $0x1b8] sm:$0xff]  ;;  %v4203_v55 = vld [vmem:[#allocation4 + $0x44] sm:$0x1]  ;;  %5267 = vmatpush.bf16.msrb.mxu1 %v6745_v46 }
 0x5d5   : > { %v3917_v15 = vadd.f32 %v9003_v13, %v3790_v51  ;;  %v4148_v3 = vadd.f32 %v9013_v35, %v4137_v28  ;;  %v4427_v34 = vpack.c.b16 %v4395_v26, %v4395_v26  ;;  %v4429_v31 = vpack.c.b16 %v4397_v59, %v4397_v59  ;;  %v4204_v28 = vld [vmem:[#allocation4 + $0x50] sm:$0x1]  ;;  %5554 = vmatpush.bf16.msra.mxu0 %v6792_v60 }
 0x5d6   : > { %v4805_v57 = vpack.c.b16 %v4784_v53, %v4781_v24  ;;  %v4528_v0 = vrot.slane %v4526_v16, 7  ;;  %v4529_v42 = vshll.u32 %v4424_v23, 16  ;;  %v4541_v30 = vrot.slane %v4539_v17, 7  ;;  %v6776_v23 = vld [vmem:[#allocation9 + $0x138] sm:$0xff] }
 0x5d7   : > { %v4156_v1 = vmax.f32 %v4148_v3, 0.0  ;;  %v4542_v4 = vshll.u32 %v4425_v25, 16  ;;  %v4560_v32 = vshrl.u32 %v4427_v34, 16  ;;  %v4565_v63 = vshrl.u32 %v4429_v31, 16  ;;  %5002 = vmatpush.bf16.msra.mxu3 %v6776_v23  ;;  %v6791_v34 = vld [vmem:[#allocation9 + $0x1b0] sm:$0xff] }
 0x5d8   : > { %4981 = vmatmul.bf16.vlgmr.msra.gmra.mxu1 %v4805_v57  ;;  %v3945_v61 = vpop.f32.mrf.mxu3  ;;  %v6339_v2 = vrot.slane %v4521_v29, 11  ;;  %v4531_v13 = vor.u32 %v4529_v42, %v4528_v0  ;;  %v6340_v19 = vrot.slane %v4534_v54, 11  ;;  %v4252_v62 = vpack.c.b16 %v9106_v44, %v9106_v44  ;;  %v6775_v57 = vld [vmem:[#allocation9 + $0x130] sm:$0xff] }
 0x5d9   : > { %v4164_v52 = vpack.c.bf16 %v4156_v1, %v4156_v1  ;;  %v3946_v24 = vadd.f32 %v3945_v61, %v3917_v15  ;;  %v4544_v12 = vor.u32 %v4542_v4, %v4541_v30  ;;  %v4568_v56 = vshll.u32 %v4429_v31, 16  ;;  %v6798_v31 = vld [vmem:[#allocation9 + $0x1e8] sm:$0xff]  ;;  %5555 = vmatpush.bf16.msra.mxu0 %v6791_v34 }
 0x5da   : > { %v9140_v36 = vsel %vm8728_vm7, %v6339_v2, %v4531_v13  ;;  %v4567_v33 = vrot.slane %v4565_v63, 7  ;;  %v4291_v41 = vshrl.u32 %v4252_v62, 16  ;;  %v4294_v50 = vshll.u32 %v4252_v62, 16  ;;  %v4191_v8 = vld [vmem:[#allocation4 + $0x4c] sm:$0xf]  ;;  %5585 = vmatpush.bf16.msra.mxu2 %v6798_v31  ;;  %v6774_v62 = vld [vmem:[#allocation9 + $0x128] sm:$0xff] }
 0x5db   : > { %4174 = vst [vmem:[#allocation4 + $0x58] sm:$0xf] %v4164_v52  ;;  %v4138_v18 = vadd.f32 %v9046_v45, %v3946_v24  ;;  %v4787_v48 = vunpack.c.l.b16 %v9140_v36  ;;  %v4545_v14 = vsel %vm8728_vm7, %v6340_v19, %v4544_v12  ;;  %v6342_v7 = vrot.slane %v4560_v32, 11  ;;  %v6790_v32 = vld [vmem:[#allocation9 + $0x1a8] sm:$0xff]  ;;  %5003 = vmatpush.bf16.msra.mxu3 %v6775_v57  ;;  %v6797_v19 = vld [vmem:[#allocation9 + $0x1e0] sm:$0xff] }
 0x5dc   : > { %v4570_v6 = vor.u32 %v4568_v56, %v4567_v33  ;;  %v4789_v49 = vunpack.c.l.b16 %v4545_v14  ;;  %v4293_v11 = vrot.slane %v4291_v41, 4  ;;  %v4296_v25 = vrot.slane %v4294_v50, 5  ;;  %v4190_v52 = vld [vmem:[#allocation4 + $0x48] sm:$0x8] }
 0x5dd   : > { %v4149_v26 = vadd.f32 %v9013_v35, %v4138_v18  ;;  %v9149_v45 = vpack.c.b16 %v4787_v48, %v4784_v53  ;;  %v4236_v59 = vunpack.c.l.b16 %v4186_v10  ;;  %v9151_v51 = vunpack.c.l.b16 %v4189_v20  ;;  %5556 = vmatpush.bf16.msra.mxu0 %v6790_v32 }
 0x5de   : > { %v9155_v17 = vsel %vm8728_vm7, %v6342_v7, %v4570_v6  ;;  %v9159_v29 = vpack.c.b16 %v4789_v49, %v4786_v37  ;;  %v4297_v16 = vor.u32 %v4296_v25, %v4293_v11  ;;  %v9161_v35 = vunpack.c.l.b16 %v4191_v8  ;;  %5586 = vmatpush.bf16.msra.mxu2 %v6797_v19 }
 0x5df   : > { %v4157_v53 = vmax.f32 %v4149_v26, 0.0  ;;  %5244 = vmatmul.bf16.gmra.mxu2 %v9149_v45  ;;  %v4792_v54 = vunpack.c.l.b16 %v9155_v17  ;;  %v4253_v15 = vpack.c.b16 %v9151_v51, %v9151_v51  ;;  %v4353_v3 = vunpack.c.l.b16 %v4203_v55  ;;  %5004 = vmatpush.bf16.msra.mxu3 %v6774_v62  ;;  %v6805_v17 = vld [vmem:[#allocation9 + $0x220] sm:$0xff] }
 0x5e0   : > { %v4394_v9 = vunpack.c.l.b16 %v4297_v16  ;;  %v4396_v37 = vunpack.c.h.b16 %v4297_v16  ;;  %v4254_v0 = vpack.c.b16 %v9161_v35, %v9161_v35  ;;  %v4354_v42 = vunpack.c.l.b16 %v4204_v28 }
 0x5e1   : > { %v4165_v30 = vpack.c.bf16 %v4157_v53, %v4157_v53  ;;  %v4810_v47 = vpack.c.b16 %v4792_v54, %v4789_v49  ;;  %v4299_v1 = vshrl.u32 %v4253_v15, 16  ;;  %v4302_v4 = vshll.u32 %v4253_v15, 16 }
 0x5e2   : > { %v4426_v63 = vpack.c.b16 %v4394_v9, %v4236_v59  ;;  %v4428_v61 = vpack.c.b16 %v4396_v37, %v9106_v44  ;;  %v4307_v2 = vshrl.u32 %v4254_v0, 16  ;;  %v4310_v13 = vshll.u32 %v4254_v0, 16 }
 0x5e3   : > { %4175 = vst [vmem:[#allocation4 + $0x64] sm:$0xf] %v4165_v30  ;;  %5044 = vmatmul.bf16.gmra.mxu0 %v4810_v47  ;;  %v4301_v24 = vrot.slane %v4299_v1, 4  ;;  %v4304_v12 = vrot.slane %v4302_v4, 5  ;;  %v4363_v56 = vpack.c.b16 %v4353_v3, %v9151_v51  ;;  %v4364_v10 = vpack.c.b16 %v4354_v42, %v9161_v35  ;;  %v6789_v30 = vld [vmem:[#allocation9 + $0x1a0] sm:$0xff]  ;;  %v6796_v47 = vld [vmem:[#allocation9 + $0x1d8] sm:$0xff] }
 0x5e4   : > { %v4547_v20 = vshrl.u32 %v4426_v63, 16  ;;  %v4552_v33 = vshrl.u32 %v4428_v61, 16  ;;  %v4238_v41 = vunpack.c.l.b16 %v4188_v38  ;;  %v4309_v50 = vrot.slane %v4307_v2, 4  ;;  %v6773_v38 = vld [vmem:[#allocation9 + $0x120] sm:$0xff]  ;;  %5557 = vmatpush.bf16.msra.mxu0 %v6789_v30  ;;  %5587 = vmatpush.bf16.msra.mxu2 %v6796_v47  ;;  %v6788_v2 = vld [vmem:[#allocation9 + $0x198] sm:$0xff]  ;;  %v6786_v47 = vld [vmem:[#allocation9 + $0x188] sm:$0xff] }
 0x5e5   : > { %v4305_v44 = vor.u32 %v4304_v12, %v4301_v24  ;;  %v4312_v8 = vrot.slane %v4310_v13, 5  ;;  %v4373_v18 = vrot.slane %v4363_v56, 5  ;;  %v4374_v14 = vrot.slane %v4364_v10, 5  ;;  %v6795_v13 = vld [vmem:[#allocation9 + $0x1d0] sm:$0xff]  ;;  %v4193_v24 = vld [vmem:[#allocation4 + $0x58] sm:$0xf]  ;;  %5005 = vmatpush.bf16.msra.mxu3 %v6773_v38 }
 0x5e6   : > { %v6341_v7 = vrot.slane %v4547_v20, 11  ;;  %v4554_v46 = vrot.slane %v4552_v33, 7  ;;  %v4555_v60 = vshll.u32 %v4428_v61, 16  ;;  %v4240_v5 = vunpack.c.l.b16 %v4190_v52  ;;  %v4205_v33 = vld [vmem:[#allocation4 + $0x5c] sm:$0x1] }
 0x5e7   : > { %v4313_v6 = vor.u32 %v4312_v8, %v4309_v50  ;;  %v4398_v49 = vunpack.c.l.b16 %v4305_v44  ;;  %v4400_v11 = vunpack.c.h.b16 %v4305_v44  ;;  %v4399_v25 = vunpack.c.l.b16 %v4373_v18  ;;  %v6793_v38 = vld [vmem:[#allocation9 + $0x1c0] sm:$0xff] }
 0x5e8   : > { %v4557_v55 = vor.u32 %v4555_v60, %v4554_v46  ;;  %v4401_v23 = vunpack.c.h.b16 %v4373_v18  ;;  %v4403_v26 = vunpack.c.l.b16 %v4374_v14  ;;  %v4405_v59 = vunpack.c.h.b16 %v4374_v14  ;;  %5558 = vmatpush.bf16.msra.mxu0 %v6788_v2  ;;  %5588 = vmatpush.bf16.msra.mxu2 %v6795_v13  ;;  %v6772_v60 = vld [vmem:[#allocation9 + $0x118] sm:$0xff] }
 0x5e9   : > { %v4402_v28 = vunpack.c.l.b16 %v4313_v6  ;;  %v4404_v16 = vunpack.c.h.b16 %v4313_v6  ;;  %v4430_v53 = vpack.c.b16 %v4398_v49, %v4238_v41  ;;  %v4432_v15 = vpack.c.b16 %v4400_v11, %v9151_v51  ;;  %v6794_v6 = vld [vmem:[#allocation9 + $0x1c8] sm:$0xff]  ;;  %5006 = vmatpush.bf16.msra.mxu3 %v6772_v60 }
 0x5ea   : > { %v9177_v3 = vsel %vm8728_vm7, %v6341_v7, %v4557_v55  ;;  %v4431_v34 = vpack.c.b16 %v4399_v25, %v4399_v25  ;;  %v4433_v31 = vpack.c.b16 %v4401_v23, %v4401_v23  ;;  %v4435_v57 = vpack.c.b16 %v4403_v26, %v4403_v26  ;;  %v4195_v8 = vld [vmem:[#allocation4 + $0x64] sm:$0xf]  ;;  %v4206_v23 = vld [vmem:[#allocation4 + $0x68] sm:$0x1] }
 0x5eb   : > { %v4790_v9 = vunpack.c.l.b16 %v9177_v3  ;;  %v4434_v37 = vpack.c.b16 %v4402_v28, %v4240_v5  ;;  %v4436_v0 = vpack.c.b16 %v4404_v16, %v9161_v35  ;;  %v4573_v42 = vshrl.u32 %v4430_v53, 16  ;;  %v6787_v5 = vld [vmem:[#allocation9 + $0x190] sm:$0xff] }
 0x5ec   : > { %v4578_v1 = vshrl.u32 %v4432_v15, 16  ;;  %v4437_v4 = vpack.c.b16 %v4405_v59, %v4405_v59  ;;  %v4586_v32 = vshrl.u32 %v4431_v34, 16  ;;  %v4581_v52 = vshll.u32 %v4432_v15, 16  ;;  %v6771_v53 = vld [vmem:[#allocation9 + $0x110] sm:$0xff]  ;;  %5559 = vmatpush.bf16.msra.mxu0 %v6787_v5  ;;  %5589 = vmatpush.bf16.msra.mxu2 %v6794_v6  ;;  %v4194_v5 = vld [vmem:[#allocation4 + $0x60] sm:$0x8] }
 0x5ed   : > { %v4808_v51 = vpack.c.b16 %v4790_v9, %v4787_v48  ;;  %v4599_v63 = vshrl.u32 %v4434_v37, 16  ;;  %v4604_v61 = vshrl.u32 %v4436_v0, 16  ;;  %v6343_v19 = vrot.slane %v4573_v42, 11  ;;  %5007 = vmatpush.bf16.msra.mxu3 %v6771_v53 }
 0x5ee   : > { %v4580_v62 = vrot.slane %v4578_v1, 7  ;;  %v4591_v35 = vshrl.u32 %v4433_v31, 16  ;;  %v4607_v56 = vshll.u32 %v4436_v0, 16  ;;  %v6344_v10 = vrot.slane %v4586_v32, 11 }
 0x5ef   : > { %4986 = vmatmul.bf16.gmra.mxu1 %v4808_v51  ;;  %v4606_v12 = vrot.slane %v4604_v61, 7  ;;  %v4612_v20 = vshrl.u32 %v4435_v57, 16  ;;  %v4594_v50 = vshll.u32 %v4433_v31, 16  ;;  %v4617_v44 = vshrl.u32 %v4437_v4, 16  ;;  %v4192_v61 = vld [vmem:[#allocation4 + $0x54] sm:$0x8] }
 0x5f0   : > { %v4583_v41 = vor.u32 %v4581_v52, %v4580_v62  ;;  %v4593_v48 = vrot.slane %v4591_v35, 7  ;;  %v6345_v18 = vrot.slane %v4599_v63, 11  ;;  %v4620_v46 = vshll.u32 %v4437_v4, 16  ;;  %5560 = vmatpush.bf16.msra.mxu0 %v6786_v47  ;;  %5590 = vmatpush.bf16.msra.mxu2 %v6793_v38 }
 0x5f1   : > { %v4609_v14 = vor.u32 %v4607_v56, %v4606_v12  ;;  %v6346_v7 = vrot.slane %v4612_v20, 11  ;;  %v4619_v25 = vrot.slane %v4617_v44, 7  ;;  %v9187_v55 = vunpack.c.l.b16 %v4193_v24 }
 0x5f2   : > { %v9185_v49 = vsel %vm8728_vm7, %v6343_v19, %v4583_v41  ;;  %v4596_v11 = vor.u32 %v4594_v50, %v4593_v48  ;;  %v9194_v28 = vunpack.c.l.b16 %v4195_v8  ;;  %v4355_v16 = vunpack.c.l.b16 %v4205_v33  ;;  %v6770_v19 = vld [vmem:[#allocation9 + $0x108] sm:$0xff] }
 0x5f3   : > { %v9191_v26 = vsel %vm8728_vm7, %v6345_v18, %v4609_v14  ;;  %v4793_v59 = vunpack.c.l.b16 %v9185_v49  ;;  %v4622_v31 = vor.u32 %v4620_v46, %v4619_v25  ;;  %v4255_v57 = vpack.c.b16 %v9187_v55, %v9187_v55  ;;  %5008 = vmatpush.bf16.msra.mxu3 %v6770_v19  ;;  %v6785_v14 = vld [vmem:[#allocation9 + $0x180] sm:$0xff] }
 0x5f4   : > { %v4796_v15 = vunpack.c.l.b16 %v9191_v26  ;;  %v9199_v34 = vsel %vm8728_vm7, %v6344_v10, %v4596_v11  ;;  %v4782_v0 = vunpack.c.h.b16 %v9094_v21  ;;  %v4356_v42 = vunpack.c.l.b16 %v4206_v23  ;;  %5561 = vmatpush.bf16.msra.mxu0 %v6785_v14 }
 0x5f5   : > { %v9203_v37 = vpack.c.b16 %v4793_v59, %v4790_v9  ;;  %v4365_v30 = vpack.c.b16 %v4355_v16, %v9187_v55  ;;  %v9211_v4 = vsel %vm8728_vm7, %v6346_v7, %v4622_v31  ;;  %v4315_v32 = vshrl.u32 %v4255_v57, 16  ;;  %v6769_v7 = vld [vmem:[#allocation9 + $0x100] sm:$0xff] }
 0x5f6   : > { %v4811_v1 = vpack.c.b16 %v4796_v15, %v4793_v59  ;;  %v4318_v51 = vshll.u32 %v4255_v57, 16  ;;  %v4795_v9 = vunpack.c.l.b16 %v9199_v34  ;;  %v4798_v63 = vunpack.c.l.b16 %v9211_v4  ;;  %v6758_v34 = vld [vmem:[#allocation9 + $0xa8] sm:$0xff] }
 0x5f7   : > { %5249 = vmatmul.bf16.gmra.mxu2 %v9203_v37  ;;  %v4366_v2 = vpack.c.b16 %v4356_v42, %v9194_v28  ;;  %v4375_v13 = vrot.slane %v4365_v30, 5  ;;  %v5061_v62 = vunpack.c.h.b16 %v9067_v22  ;;  %v4317_v52 = vrot.slane %v4315_v32, 4  ;;  %5009 = vmatpush.bf16.msra.mxu3 %v6769_v7 }
 0x5f8   : > { %4991 = vmatmul.bf16.vlgmr.msrb.gmra.mxu3 %v4811_v1  ;;  %v4320_v35 = vrot.slane %v4318_v51, 5  ;;  %v4256_v24 = vpack.c.b16 %v9194_v28, %v9194_v28  ;;  %v4813_v12 = vpack.c.b16 %v4798_v63, %v4795_v9  ;;  %v4242_v33 = vunpack.c.l.b16 %v4192_v61 }
 0x5f9   : > { %v4376_v56 = vrot.slane %v4366_v2, 5  ;;  %v4407_v10 = vunpack.c.l.b16 %v4375_v13  ;;  %v4409_v20 = vunpack.c.h.b16 %v4375_v13  ;;  %v5064_v25 = vpack.c.b16 %v4782_v0, %v5061_v62 }
 0x5fa   : > { %v4321_v41 = vor.u32 %v4320_v35, %v4317_v52  ;;  %v4323_v48 = vshrl.u32 %v4256_v24, 16  ;;  %v4326_v50 = vshll.u32 %v4256_v24, 16  ;;  %5049 = vmatmul.bf16.gmra.mxu0 %v4813_v12  ;;  %v4244_v1 = vunpack.c.l.b16 %v4194_v5  ;;  %v6760_v52 = vld [vmem:[#allocation9 + $0xb8] sm:$0xff] }
 0x5fb   : > { %v4439_v22 = vpack.c.b16 %v4407_v10, %v4407_v10  ;;  %v4441_v44 = vpack.c.b16 %v4409_v20, %v4409_v20  ;;  %v4699_v8 = vunpack.c.l.b16 %v4376_v56  ;;  %v4701_v18 = vunpack.c.h.b16 %v4376_v56  ;;  %v6808_v35 = vld [vmem:[#allocation9 + $0x238] sm:$0xff]  ;;  %5289 = vmatpush.bf16.msrb.mxu3 %v6760_v52 }
 0x5fc   : > { %v4406_v46 = vunpack.c.l.b16 %v4321_v41  ;;  %v4408_v60 = vunpack.c.h.b16 %v4321_v41  ;;  %v4325_v6 = vrot.slane %v4323_v48, 4  ;;  %v4328_v11 = vrot.slane %v4326_v50, 5  ;;  %5612 = vmatpush.bf16.msra.mxu1 %v6808_v35  ;;  %v6807_v41 = vld [vmem:[#allocation9 + $0x230] sm:$0xff] }
 0x5fd   : > { %v4638_v23 = vshrl.u32 %v4439_v22, 16  ;;  %v4643_v59 = vshrl.u32 %v4441_v44, 16  ;;  %v4703_v16 = vpack.c.b16 %v4699_v8, %v4699_v8  ;;  %v4705_v57 = vpack.c.b16 %v4701_v18, %v4701_v18  ;;  %v6759_v48 = vld [vmem:[#allocation9 + $0xb0] sm:$0xff] }
 0x5fe   : > { %v4438_v53 = vpack.c.b16 %v4406_v46, %v4242_v33  ;;  %v4440_v31 = vpack.c.b16 %v4408_v60, %v9187_v55  ;;  %v4329_v42 = vor.u32 %v4328_v11, %v4325_v6  ;;  %v4646_v47 = vshll.u32 %v4441_v44, 16 }
 0x5ff   : > { %5268 = vmatmul.bf16.vlgmr.msrb.gmra.mxu1 %v5064_v25  ;;  %v4645_v30 = vrot.slane %v4643_v59, 7  ;;  %v4720_v38 = vshrl.u32 %v4703_v16, 16  ;;  %v4725_v61 = vshrl.u32 %v4705_v57, 16  ;;  %v6348_v13 = vrot.slane %v4638_v23, 11  ;;  %5290 = vmatpush.bf16.msrb.mxu3 %v6759_v48 }
 0x600   : > { %v4625_v32 = vshrl.u32 %v4438_v53, 16  ;;  %v4630_v51 = vshrl.u32 %v4440_v31, 16  ;;  %v4633_v2 = vshll.u32 %v4440_v31, 16  ;;  %v4698_v62 = vunpack.c.l.b16 %v4329_v42  ;;  %5613 = vmatpush.bf16.msra.mxu1 %v6807_v41  ;;  %v6754_v41 = vld [vmem:[#allocation9 + $0x88] sm:$0xff] }
 0x601   : > { %v4648_v19 = vor.u32 %v4646_v47, %v4645_v30  ;;  %v4727_v12 = vrot.slane %v4725_v61, 7  ;;  %v4728_v55 = vshll.u32 %v4705_v57, 16  ;;  %v4700_v56 = vunpack.c.h.b16 %v4329_v42  ;;  %v6803_v47 = vld [vmem:[#allocation9 + $0x210] sm:$0xff]  ;;  %v6802_v61 = vld [vmem:[#allocation9 + $0x208] sm:$0xff] }
 0x602   : > { %v4632_v24 = vrot.slane %v4630_v51, 7  ;;  %v6347_v10 = vrot.slane %v4625_v32, 11  ;;  %v6350_v20 = vrot.slane %v4720_v38, 11  ;;  %v4702_v33 = vpack.c.b16 %v4698_v62, %v4244_v1  ;;  %v4197_v38 = vld [vmem:[#allocation4 + $0x70] sm:$0xf] }
 0x603   : > { %v9229_v22 = vsel %vm8728_vm7, %v6348_v13, %v4648_v19  ;;  %v4730_v44 = vor.u32 %v4728_v55, %v4727_v12  ;;  %v4704_v8 = vpack.c.b16 %v4700_v56, %v9194_v28  ;;  %v4788_v59 = vunpack.c.h.b16 %v9140_v36  ;;  %5291 = vmatpush.bf16.msrb.mxu3 %v6758_v34  ;;  %v6801_v13 = vld [vmem:[#allocation9 + $0x200] sm:$0xff] }
 0x604   : > { %v4635_v50 = vor.u32 %v4633_v2, %v4632_v24  ;;  %v4707_v7 = vshrl.u32 %v4702_v33, 16  ;;  %v4801_v5 = vunpack.c.l.b16 %v9229_v22  ;;  %v9254_v16 = vpack.c.b16 %v4795_v9, %v4792_v54  ;;  %v6804_v9 = vld [vmem:[#allocation9 + $0x218] sm:$0xff]  ;;  %v4196_v33 = vld [vmem:[#allocation4 + $0x6c] sm:$0x8] }
 0x605   : > { %v9238_v14 = vsel %vm8728_vm7, %v6350_v20, %v4730_v44  ;;  %v4712_v46 = vshrl.u32 %v4704_v8, 16  ;;  %v4715_v28 = vshll.u32 %v4704_v8, 16  ;;  %v4785_v57 = vunpack.c.h.b16 %v9129_v58  ;;  %v6757_v58 = vld [vmem:[#allocation9 + $0xa0] sm:$0xff] }
 0x606   : > { %v9234_v18 = vsel %vm8728_vm7, %v6347_v10, %v4635_v50  ;;  %v4804_v6 = vunpack.c.l.b16 %v9238_v14  ;;  %v6349_v53 = vrot.slane %v4707_v7, 11  ;;  %v4794_v1 = vunpack.c.h.b16 %v9185_v49  ;;  %v6756_v49 = vld [vmem:[#allocation9 + $0x98] sm:$0xff]  ;;  %v6753_v44 = vld [vmem:[#allocation9 + $0x80] sm:$0xff] }
 0x607   : > { %v4799_v60 = vunpack.c.l.b16 %v9234_v18  ;;  %v4714_v11 = vrot.slane %v4712_v46, 7  ;;  %v5067_v30 = vpack.c.b16 %v4788_v59, %v4785_v57  ;;  %5292 = vmatpush.bf16.msrb.mxu3 %v6757_v58  ;;  %v9266_v32 = vunpack.c.l.b16 %v4197_v38 }
 0x608   : > { %v4816_v23 = vpack.c.b16 %v4804_v6, %v4801_v5  ;;  %v4791_v51 = vunpack.c.h.b16 %v9177_v3  ;;  %v4806_v62 = vpack.c.b16 %v4785_v57, %v4782_v0  ;;  %v4800_v12 = vunpack.c.h.b16 %v9234_v18 }
 0x609   : > { %v9245_v25 = vpack.c.b16 %v4799_v60, %v4796_v15  ;;  %v4717_v31 = vor.u32 %v4715_v28, %v4714_v11  ;;  %v6806_v15 = vld [vmem:[#allocation9 + $0x228] sm:$0xff]  ;;  %v4257_v19 = vpack.c.b16 %v9266_v32, %v9266_v32  ;;  %v4797_v21 = vunpack.c.h.b16 %v9191_v26 }
 0x60a   : > { %5054 = vmatmul.bf16.gmra.mxu0 %v4816_v23  ;;  %5614 = vmatpush.bf16.msra.mxu1 %v6806_v15  ;;  %v5070_v2 = vpack.c.b16 %v4794_v1, %v4791_v51  ;;  %v9279_v56 = vpack.c.b16 %v4801_v5, %v4798_v63  ;;  %v4809_v20 = vpack.c.b16 %v4791_v51, %v4788_v59  ;;  %v4246_v48 = vunpack.c.l.b16 %v4196_v33  ;;  %v4207_v59 = vld [vmem:[#allocation4 + $0x74] sm:$0x1] }
 0x60b   : > { %5254 = vmatmul.bf16.gmra.mxu2 %v9245_v25  ;;  %v9260_v42 = vsel %vm8728_vm7, %v6349_v53, %v4717_v31  ;;  %v4331_v52 = vshrl.u32 %v4257_v19, 16  ;;  %v4334_v35 = vshll.u32 %v4257_v19, 16  ;;  %5293 = vmatpush.bf16.msrb.mxu3 %v6756_v49  ;;  %v5073_v0 = vpack.c.b16 %v4800_v12, %v4797_v21 }
 0x60c   : > { %v4802_v36 = vunpack.c.l.b16 %v9260_v42  ;;  %v4812_v11 = vpack.c.b16 %v4797_v21, %v4794_v1  ;;  %v4803_v31 = vunpack.c.h.b16 %v9260_v42 }
 0x60d   : > { %v4333_v24 = vrot.slane %v4331_v52, 4  ;;  %v4336_v3 = vrot.slane %v4334_v35, 5 }
 0x60e   : > { %v4814_v54 = vpack.c.b16 %v4802_v36, %v4799_v60  ;;  %5615 = vmatpush.bf16.msra.mxu1 %v6805_v17  ;;  %v4815_v38 = vpack.c.b16 %v4803_v31, %v4800_v12 }
 0x60f   : > { %5273 = vmatmul.bf16.gmra.mxu1 %v5067_v30  ;;  %v4337_v55 = vor.u32 %v4336_v3, %v4333_v24 }
 0x610   : > { %4996 = vmatmul.bf16.gmra.mxu3 %v4814_v54 }
 0x611   : > { %v5320_v10 = vunpack.c.h.b16 %v4337_v55  ;;  %v5318_v50 = vunpack.c.l.b16 %v4337_v55 }
 0x612   : > { %5616 = vmatpush.bf16.msra.mxu1 %v6804_v9 }
 0x613   : > { %v5324_v22 = vpack.c.b16 %v5320_v10, %v9266_v32  ;;  %v5322_v8 = vpack.c.b16 %v5318_v50, %v4246_v48 }
 0x615   : > { %v5332_v26 = vshrl.u32 %v5324_v22, 16  ;;  %v5327_v4 = vshrl.u32 %v5322_v8, 16  ;;  %v5335_v7 = vshll.u32 %v5324_v22, 16 }
 0x616   : > { %5617 = vmatpush.bf16.msra.mxu1 %v6803_v47 }
 0x617   : > { %v5334_v63 = vrot.slane %v5332_v26, 7  ;;  %v6543_v60 = vrot.slane %v5327_v4, 11 }
 0x619   : > { %v5337_v5 = vor.u32 %v5335_v7, %v5334_v63 }
 0x61a   : > { %5562 = vmatmul.bf16.vlgmr.msra.gmra.mxu0 %v9149_v45  ;;  %5618 = vmatpush.bf16.msra.mxu1 %v6802_v61  ;;  %v6755_v45 = vld [vmem:[#allocation9 + $0x90] sm:$0xff] }
 0x61b   : > { %5591 = vmatmul.bf16.vlgmr.msra.gmra.mxu2 %v5067_v30  ;;  %5294 = vmatpush.bf16.msrb.mxu3 %v6755_v45  ;;  %v5338_v23 = vsel %vm8728_vm7, %v6543_v60, %v5337_v5  ;;  %v4357_v30 = vunpack.c.l.b16 %v4207_v59 }
 0x61c   : > { %v5402_v57 = vunpack.c.h.b16 %v5338_v23  ;;  %v5401_v15 = vunpack.c.l.b16 %v5338_v23 }
 0x61d   : > { %v4367_v34 = vpack.c.b16 %v4357_v30, %v9266_v32 }
 0x61e   : > { %5619 = vmatpush.bf16.msra.mxu1 %v6801_v13  ;;  %v5404_v54 = vpack.c.b16 %v5401_v15, %v4802_v36 }
 0x61f   : > { %5278 = vmatmul.bf16.gmra.mxu1 %v5070_v2  ;;  %5295 = vmatpush.bf16.msrb.mxu3 %v6754_v41  ;;  %v4377_v47 = vrot.slane %v4367_v34, 5 }
 0x620   : > { %5010 = vmatmul.bf16.vlgmr.msra.gmra.mxu3 %v4806_v62 }
 0x621   : > { %v5319_v62 = vunpack.c.l.b16 %v4377_v47 }
 0x623   : > { %5296 = vmatpush.bf16.msrb.mxu3 %v6753_v44  ;;  %v5323_v32 = vpack.c.b16 %v5319_v62, %v5319_v62 }
 0x625   : > { %v5340_v45 = vshrl.u32 %v5323_v32, 16 }
 0x627   : > { %v6544_v55 = vrot.slane %v5340_v45, 11 }
 0x62a   : > { %5567 = vmatmul.bf16.gmra.mxu0 %v9203_v37  ;;  %v4198_v37 = vld [vmem:[#allocation4 + $0x8] sm:$0x1] }
 0x62b   : > { %5596 = vmatmul.bf16.gmra.mxu2 %v5070_v2  ;;  %v4348_v18 = vunpack.c.l.b16 %v4198_v37  ;;  %v5321_v2 = vunpack.c.h.b16 %v4377_v47 }
 0x62d   : > { %v4358_v46 = vpack.c.b16 %v4348_v18, %v9005_v39  ;;  %v5405_v39 = vpack.c.b16 %v5402_v57, %v4803_v31  ;;  %v5325_v42 = vpack.c.b16 %v5321_v2, %v5321_v2 }
 0x62f   : > { %5283 = vmatmul.bf16.gmra.mxu1 %v5073_v0  ;;  %v4368_v28 = vrot.slane %v4358_v46, 5  ;;  %v5345_v49 = vshrl.u32 %v5325_v42, 16  ;;  %v5348_v3 = vshll.u32 %v5325_v42, 16 }
 0x630   : > { %5015 = vmatmul.bf16.gmra.mxu3 %v4809_v20 }
 0x631   : > { %v4381_v53 = vunpack.c.h.b16 %v4368_v28  ;;  %v5347_v24 = vrot.slane %v5345_v49, 7 }
 0x633   : > { %v4413_v17 = vpack.c.b16 %v4381_v53, %v4381_v53  ;;  %v5350_v21 = vor.u32 %v5348_v3, %v5347_v24  ;;  %v9357_v24 = vld [vmem:[%s9445_s8] ss:$0 sm:$0xff] }
 0x635   : > { %v4461_v58 = vshrl.u32 %v4413_v17, 16  ;;  %v4464_v61 = vshll.u32 %v4413_v17, 16  ;;  %v5351_v10 = vsel %vm8728_vm7, %v6544_v55, %v5350_v21 }
 0x636   : > { %v5403_v20 = vunpack.c.l.b16 %v5351_v10 }
 0x637   : > { %v4463_v51 = vrot.slane %v4461_v58, 7 }
 0x638   : > { %v5406_v33 = vpack.c.b16 %v5403_v20, %v4804_v6 }
 0x639   : > { %v4466_v19 = vor.u32 %v4464_v61, %v4463_v51 }
 0x63a   : > { %5572 = vmatmul.bf16.gmra.mxu0 %v9245_v25  ;;  %v4379_v25 = vunpack.c.l.b16 %v4368_v28 }
 0x63b   : > { %5601 = vmatmul.bf16.gmra.mxu2 %v5073_v0 }
 0x63c   : > { %v4411_v9 = vpack.c.b16 %v4379_v25, %v4379_v25 }
 0x63e   : > { %v4456_v1 = vshrl.u32 %v4411_v9, 16 }
 0x63f   : > { %5620 = vmatmul.bf16.vlgmr.msra.gmra.mxu1 %v9159_v29 }
 0x640   : > { %5020 = vmatmul.bf16.gmra.mxu3 %v4812_v11  ;;  %v6334_v13 = vrot.slane %v4456_v1, 11 }
 0x642   : > { %v4467_v36 = vsel %vm8728_vm7, %v6334_v13, %v4466_v19 }
 0x643   : > { %v5062_v52 = vunpack.c.l.b16 %v4467_v36 }
 0x645   : > { %v5065_v12 = vpack.c.b16 %v4783_v27, %v5062_v52 }
 0x64a   : > { %5577 = vmatmul.bf16.gmra.mxu0 %v5404_v54 }
 0x64b   : > { %5606 = vmatmul.bf16.gmra.mxu2 %v5405_v39 }
 0x64e   : > { %v5040_v50 = vpop.f32.mrf.mxu0 }
 0x64f   : > { %5625 = vmatmul.bf16.gmra.mxu1 %v9254_v16  ;;  %v5240_v27 = vpop.f32.mrf.mxu2 }
 0x650   : > { %5025 = vmatmul.bf16.gmra.mxu3 %v4815_v38 }
 0x655   : > { %v4982_v35 = vpop.f32.mrf.mxu1 }
 0x656   : > { %v5042_v37 = vpop.f32.mrf.mxu0 }
 0x657   : > { %v5242_v40 = vpop.f32.mrf.mxu2 }
 0x65d   : > { %v4984_v0 = vpop.f32.mrf.mxu1 }
 0x65f   : > { %5630 = vmatmul.bf16.gmra.mxu1 %v9279_v56 }
 0x660   : > { %5297 = vmatmul.bf16.vlgmr.msrb.gmra.mxu3 %v5065_v12 }
 0x662   : > { %v9312_v6 = vpop.f32.mrf.mxu2 }
 0x66c   : > { %v4987_v41 = vpop.f32.mrf.mxu1 }
 0x66f   : > { %5635 = vmatmul.bf16.gmra.mxu1 %v5406_v33 }
 0x670   : > { %5302 = vmatmul.bf16.gmra.mxu3 %v9159_v29  ;;  %v5045_v29 = vpop.f32.mrf.mxu0 }
 0x674   : > { %v9302_v48 = vpop.f32.mrf.mxu1 }
 0x678   : > { %v9320_v4 = vpop.f32.mrf.mxu0 }
 0x67b   : > { %v9304_v43 = vpop.f32.mrf.mxu3 }
 0x67c   : > { %v5269_v22 = vpop.f32.mrf.mxu1 }
 0x680   : > { %5307 = vmatmul.bf16.gmra.mxu3 %v9254_v16  ;;  %v9318_v16 = vpop.f32.mrf.mxu2  ;;  %v9326_v60 = vpop.f32.mrf.mxu0 }
 0x683   : > { %v9307_v44 = vpop.f32.mrf.mxu3 }
 0x684   : > { %v5271_v8 = vpop.f32.mrf.mxu1 }
 0x688   : > { %v9324_v46 = vpop.f32.mrf.mxu2  ;;  %v9332_v23 = vpop.f32.mrf.mxu0 }
 0x68c   : > { %v9314_v26 = vpop.f32.mrf.mxu1 }
 0x690   : > { %5312 = vmatmul.bf16.gmra.mxu3 %v9279_v56  ;;  %v9330_v11 = vpop.f32.mrf.mxu2  ;;  %v9338_v57 = vpop.f32.mrf.mxu0 }
 0x693   : > { %v9310_v14 = vpop.f32.mrf.mxu3 }
 0x694   : > { %v9322_v63 = vpop.f32.mrf.mxu1 }
 0x698   : > { %v9336_v31 = vpop.f32.mrf.mxu2  ;;  %v9344_v17 = vpop.f32.mrf.mxu0 }
 0x69b   : > { %v9316_v18 = vpop.f32.mrf.mxu3 }
 0x69c   : > { %v9328_v56 = vpop.f32.mrf.mxu1 }
 0x6a0   : > { %v9342_v25 = vpop.f32.mrf.mxu2  ;;  %v5563_v9 = vpop.f32.mrf.mxu0 }
 0x6a3   : > { %v5011_v7 = vpop.f32.mrf.mxu3 }
 0x6a4   : > { %v9334_v59 = vpop.f32.mrf.mxu1  ;;  %v5012_v38 = vadd.f32 %v5011_v7, %v4982_v35 }
 0x6a6   : > { %v5041_v1 = vadd.f32 %v5040_v50, %v5012_v38 }
 0x6a8   : > { %v5592_v34 = vpop.f32.mrf.mxu2  ;;  %v5565_v2 = vpop.f32.mrf.mxu0  ;;  %v5241_v62 = vadd.f32 %v5240_v27, %v5041_v1 }
 0x6a9   : > { %v5593_v42 = vadd.f32 %v5592_v34, %v5563_v9 }
 0x6aa   : > { %v5270_v32 = vadd.f32 %v5269_v22, %v5241_v62 }
 0x6ab   : > { %v5013_v5 = vpop.f32.mrf.mxu3 }
 0x6ac   : > { %v9340_v15 = vpop.f32.mrf.mxu1  ;;  %v5014_v19 = vadd.f32 %v5013_v5, %v4984_v0 }
 0x6ae   : > { %v5043_v36 = vadd.f32 %v5042_v37, %v5014_v19 }
 0x6b0   : > { %v5594_v51 = vpop.f32.mrf.mxu2  ;;  %v5568_v3 = vpop.f32.mrf.mxu0  ;;  %v5243_v21 = vadd.f32 %v5242_v40, %v5043_v36 }
 0x6b1   : > { %v5595_v20 = vadd.f32 %v5594_v51, %v5565_v2 }
 0x6b2   : > { %v5272_v50 = vadd.f32 %v5271_v8, %v5243_v21 }
 0x6b3   : > { %v5016_v28 = vpop.f32.mrf.mxu3 }
 0x6b4   : > { %v9346_v39 = vpop.f32.mrf.mxu1  ;;  %v5017_v12 = vadd.f32 %v5016_v28, %v4987_v41 }
 0x6b6   : > { %v5046_v33 = vadd.f32 %v5045_v29, %v5017_v12 }
 0x6b8   : > { %v5597_v35 = vpop.f32.mrf.mxu2  ;;  %v5246_v40 = vadd.f32 %v9312_v6, %v5046_v33  ;;  %v5570_v34 = vpop.f32.mrf.mxu0 }
 0x6ba   : > { %v5275_v1 = vadd.f32 %v9314_v26, %v5246_v40 }
 0x6bb   : > { %v5018_v53 = vpop.f32.mrf.mxu3 }
 0x6bc   : > { %v5621_v58 = vpop.f32.mrf.mxu1  ;;  %v5019_v41 = vadd.f32 %v5018_v53, %v9302_v48 }
 0x6bd   : > { %v5622_v52 = vadd.f32 %v5621_v58, %v5593_v42  ;;  %v5598_v58 = vadd.f32 %v5597_v35, %v5568_v3 }
 0x6be   : > { %v5048_v8 = vadd.f32 %v9320_v4, %v5019_v41 }
 0x6c0   : > { %v5599_v28 = vpop.f32.mrf.mxu2  ;;  %v5248_v6 = vadd.f32 %v9318_v16, %v5048_v8  ;;  %v5573_v36 = vpop.f32.mrf.mxu0 }
 0x6c1   : > { %v5600_v42 = vadd.f32 %v5599_v28, %v5570_v34 }
 0x6c2   : > { %v5277_v26 = vadd.f32 %v9322_v63, %v5248_v6 }
 0x6c3   : > { %v5021_v30 = vpop.f32.mrf.mxu3 }
 0x6c4   : > { %v5623_v13 = vpop.f32.mrf.mxu1  ;;  %v5022_v48 = vadd.f32 %v5021_v30, %v9304_v43 }
 0x6c5   : > { %v5624_v37 = vadd.f32 %v5623_v13, %v5595_v20 }
 0x6c6   : > { %v5051_v4 = vadd.f32 %v9326_v60, %v5022_v48 }
 0x6c8   : > { %v5602_v62 = vpop.f32.mrf.mxu2  ;;  %v5251_v30 = vadd.f32 %v9324_v46, %v5051_v4  ;;  %v5575_v33 = vpop.f32.mrf.mxu0 }
 0x6c9   : > { %v5603_v12 = vadd.f32 %v5602_v62, %v5573_v36 }
 0x6ca   : > { %v5280_v63 = vadd.f32 %v9328_v56, %v5251_v30 }
 0x6cb   : > { %v9348_v54 = vpop.f32.mrf.mxu3 }
 0x6cc   : > { %v5626_v10 = vpop.f32.mrf.mxu1  ;;  %v5024_v43 = vadd.f32 %v9348_v54, %v9307_v44 }
 0x6cd   : > { %v5627_v2 = vadd.f32 %v5626_v10, %v5598_v58 }
 0x6ce   : > { %v5053_v60 = vadd.f32 %v9332_v23, %v5024_v43 }
 0x6d0   : > { %v5604_v21 = vpop.f32.mrf.mxu2  ;;  %v5253_v54 = vadd.f32 %v9330_v11, %v5053_v60  ;;  %v5578_v28 = vpop.f32.mrf.mxu0 }
 0x6d1   : > { %v5605_v23 = vadd.f32 %v5604_v21, %v5575_v33 }
 0x6d3   : > { %v9350_v47 = vpop.f32.mrf.mxu3 }
 0x6d4   : > { %v5628_v29 = vpop.f32.mrf.mxu1  ;;  %v5027_v44 = vadd.f32 %v9350_v47, %v9310_v14 }
 0x6d8   : > { %v5607_v40 = vpop.f32.mrf.mxu2 }
 0x6db   : > { %v9352_v61 = vpop.f32.mrf.mxu3 }
 0x6dc   : > { %v5029_v14 = vadd.f32 %v9352_v61, %v9316_v18 }
 0x6e0   : > { %v5609_v61 = vpop.f32.mrf.mxu2 }
 0x6e3   : > { %v5298_v49 = vpop.f32.mrf.mxu3 }
 0x6e4   : > { %v5299_v45 = vadd.f32 %v5298_v49, %v5270_v32  ;;  %v5631_v49 = vpop.f32.mrf.mxu1 }
 0x6e6   : > { %v5641_v55 = vadd.f32 %v5622_v52, %v5299_v45  ;;  %v5629_v45 = vadd.f32 %v5628_v29, %v5600_v42 }
 0x6e8   : > { %v5652_v0 = vadd.f32 %v9357_v24, %v5641_v55 }
 0x6ea   : > { %v5660_v27 = vmax.f32 %v5652_v0, 0.0  ;;  %v5632_v0 = vadd.f32 %v5631_v49, %v5603_v12 }
 0x6eb   : > { %v5300_v22 = vpop.f32.mrf.mxu3 }
 0x6ec   : > { %5670 = vst [vmem:[%s9361_s22] sm:$0xff] %v5660_v27  ;;  %v5301_v7 = vadd.f32 %v5300_v22, %v5272_v50  ;;  %v5633_v27 = vpop.f32.mrf.mxu1  ;;  %v5056_v22 = vadd.f32 %v9338_v57, %v5027_v44 }
 0x6ed   : > { %v5634_v41 = vadd.f32 %v5633_v27, %v5605_v23 }
 0x6ee   : > { %v5642_v5 = vadd.f32 %v5624_v37, %v5301_v7  ;;  %v5282_v37 = vadd.f32 %v9334_v59, %v5253_v54  ;;  %v5256_v11 = vadd.f32 %v9336_v31, %v5056_v22  ;;  %v5058_v59 = vadd.f32 %v9344_v17, %v5029_v14 }
 0x6f0   : > { %v5653_v9 = vadd.f32 %v9357_v24, %v5642_v5  ;;  %v5285_v58 = vadd.f32 %v9340_v15, %v5256_v11  ;;  %v5258_v31 = vadd.f32 %v9342_v25, %v5058_v59 }
 0x6f2   : > { %v5661_v38 = vmax.f32 %v5653_v9, 0.0  ;;  %v5608_v9 = vadd.f32 %v5607_v40, %v5578_v28  ;;  %v5287_v15 = vadd.f32 %v9346_v39, %v5258_v31 }
 0x6f3   : > { %v5303_v51 = vpop.f32.mrf.mxu3 }
 0x6f4   : > { %5671 = vst [vmem:[%s9361_s22 + $0x8] sm:$0xff] %v5661_v38  ;;  %v5304_v13 = vadd.f32 %v5303_v51, %v5275_v1  ;;  %v5636_v34 = vpop.f32.mrf.mxu1 }
 0x6f5   : > { %v5637_v38 = vadd.f32 %v5636_v34, %v5608_v9 }
 0x6f6   : > { %v5643_v53 = vadd.f32 %v5627_v2, %v5304_v13  ;;  %v5580_v2 = vpop.f32.mrf.mxu0 }
 0x6f7   : > { %v5610_v17 = vadd.f32 %v5609_v61, %v5580_v2 }
 0x6f8   : > { %v5654_v19 = vadd.f32 %v9357_v24, %v5643_v53 }
 0x6fa   : > { %v5662_v32 = vmax.f32 %v5654_v19, 0.0 }
 0x6fb   : > { %v5305_v52 = vpop.f32.mrf.mxu3 }
 0x6fc   : > { %5672 = vst [vmem:[%s9361_s22 + $0x10] sm:$0xff] %v5662_v32  ;;  %v5306_v35 = vadd.f32 %v5305_v52, %v5277_v26  ;;  %v5638_v13 = vpop.f32.mrf.mxu1 }
 0x6fd   : > { %v5639_v6 = vadd.f32 %v5638_v13, %v5610_v17 }
 0x6fe   : > { %v5644_v16 = vadd.f32 %v5629_v45, %v5306_v35 }
 0x700   : > { %v5655_v3 = vadd.f32 %v9357_v24, %v5644_v16 }
 0x702   : > { %v5663_v55 = vmax.f32 %v5655_v3, 0.0 }
 0x703   : > { %v5308_v10 = vpop.f32.mrf.mxu3 }
 0x704   : > { %5673 = vst [vmem:[%s9361_s22 + $0x18] sm:$0xff] %v5663_v55  ;;  %v5309_v20 = vadd.f32 %v5308_v10, %v5280_v63 }
 0x706   : > { %v5645_v46 = vadd.f32 %v5632_v0, %v5309_v20 }
 0x708   : > { %v5656_v50 = vadd.f32 %v9357_v24, %v5645_v46 }
 0x70a   : > { %v5664_v56 = vmax.f32 %v5656_v50, 0.0 }
 0x70b   : > { %v5310_v7 = vpop.f32.mrf.mxu3 }
 0x70c   : > { %5674 = vst [vmem:[%s9361_s22 + $0x20] sm:$0xff] %v5664_v56  ;;  %v5311_v5 = vadd.f32 %v5310_v7, %v5282_v37 }
 0x70e   : > { %v5646_v47 = vadd.f32 %v5634_v41, %v5311_v5 }
 0x710   : > { %v5657_v57 = vadd.f32 %v9357_v24, %v5646_v47 }
 0x712   : > { %v5665_v29 = vmax.f32 %v5657_v57, 0.0 }
 0x713   : > { %v5313_v8 = vpop.f32.mrf.mxu3 }
 0x714   : > { %5675 = vst [vmem:[%s9361_s22 + $0x28] sm:$0xff] %v5665_v29  ;;  %v5314_v1 = vadd.f32 %v5313_v8, %v5285_v58 }
 0x716   : > { %v5647_v18 = vadd.f32 %v5637_v38, %v5314_v1 }
 0x718   : > { %v5658_v51 = vadd.f32 %v9357_v24, %v5647_v18 }
 0x71a   : > { %v5666_v48 = vmax.f32 %v5658_v51, 0.0 }
 0x71b   : > { %v5315_v53 = vpop.f32.mrf.mxu3 }
 0x71c   : > { %5676 = vst [vmem:[%s9361_s22 + $0x30] sm:$0xff] %v5666_v48  ;;  %v5316_v25 = vadd.f32 %v5315_v53, %v5287_v15 }
 0x71e   : > { %v5648_v19 = vadd.f32 %v5639_v6, %v5316_v25 }
 0x720   : > { %v5659_v62 = vadd.f32 %v9357_v24, %v5648_v19 }
 0x722   : > { %v5667_v42 = vmax.f32 %v5659_v62, 0.0 }
 0x724   : > { %5677 = vst [vmem:[%s9361_s22 + $0x38] sm:$0xff] %v5667_v42 }
 0x725   : > { %7046 = shalt.err (!%p7043_p10)
}
 0x726   : > { %s7114_s7 = smov 128   ;;  %s7115_s22 = smov 8  }
 0x727   : > { %6824 = dma.vmem_to_hbm [thread:$0]  (%p7235_p3), %s5692_s24, 1024, %s5694_s13, %s5679_s19, %s7114_s7, %s7114_s7, %s7115_s22  }
 0x728 PF: > { %s5708_s15 = sand.u32 1, %s7095_s30   ;;  %p9575_p12 = scmp.ge.s32.totalorder %s7107_s12, 2 }
 0x729   : > { %s5709_s27 = scalar_lea.sflag [#allocation8], %s5708_s15 }
 0x72a   : > { %p6835_p13 = pnand %p9575_p12, %p7201_p6 }
 0x72c   : > { %p6836_p0 = pneg %p6835_p13 }
 0x72e   : > { %7072 = dma.done.wait (%p6836_p0), %s5709_s27, 1024  }
 0x72f   : > { %7074 = vsyncadd (%p6836_p0), %s5709_s27, 4294966272  ;;  %s9576_s18 = sld [smem:[#allocation15_spill]]  ;;  %p23_p5 = scmp.ge.s32.totalorder %s7219_s23, 4  }
 0x730   : > { %s9577_s11 = sld [smem:[#allocation16_spill]]  ;;  %s9578_s30 = smov %s7099_s10 }
 0x731   : > { %s9580_s12 = smov %s7219_s23  ;;  %25 = sbr.rel (!%p23_p5) target bundleno = 8 (0x8), region = 137 }
 0x735   : > { %s9579_s10 = smov %s9576_s18 }
 0x736   :  { %5715 = vsyncpa [#allocation7], 1 }
 0x737   :  { %5717 = vsyncpa [#allocation7 + $0x1], 1 }
 0x738   :  { %5718 = vsyncpa [#allocation10], 1 }
 0x739   :  { %5719 = vsyncpa [#allocation8], 1 }
 0x73a   :  { %5721 = vsyncpa [#allocation8 + $0x1], 1 }

</bundles_post_ra>
